<compile_context>
chip_gen: v6e
topology: v6e:2x2x1
jax: 0.10.0
libtpu: 0.0.40
codegen_flags: <defaults>
</compile_context>

<pallas_src>
import jax
import jax.numpy as jnp
from jax import lax
from jax.experimental import pallas as pl
from jax.experimental.pallas import tpu as pltpu


# ------------------------------ Pallas kernel -------------------------------

def dense_layer_kernel(x_ref, src_ref, dst_ref,
                       wr1_ref, wo1_ref, s1_ref,
                       wr2_ref, wo2_ref, s2_ref,
                       out_ref):
    """Fused DenseLayer forward on one VMEM-resident (batched) graph.

    x_ref:    (N, Fin)    bf16 concatenated node features
    src/dst:  (1, E)      int32 edge endpoints (padded with -1)
    wr*/wo*:  (Cin, Cout) bf16 BN-folded GraphConv weights (neighbor / root)
    s*:       (1, Cout)   f32 BN-folded bias/shift
    out_ref:  (N, C2)     f32
    """
    N = x_ref.shape[0]
    E = src_ref.shape[1]

    x = x_ref[...]                                                 # (N, Fin) bf16

    # One-hot incidence matrices built on the VPU (0/1 -> exact in bf16):
    #   D[i, e] = [dst[e] == i],  S[i, e] = [src[e] == i].
    # Padded edges carry -1 and never match a node id -> zero columns.
    node_ids = lax.broadcasted_iota(jnp.int32, (N, E), 0)
    D = (dst_ref[...] == node_ids).astype(jnp.bfloat16)            # (N, E)
    S = (src_ref[...] == node_ids).astype(jnp.bfloat16)            # (N, E)

    # Dense adjacency with edge multiplicity: A[i, j] = #edges j -> i.
    # Contract the E axis directly (no explicit S^T materialization).
    A = lax.dot_general(D, S, dimension_numbers=(((1,), (1,)), ((), ())),
                        preferred_element_type=jnp.float32)        # (N, N)
    A = A.astype(jnp.bfloat16)   # small integer counts -> exact in bf16

    # --- GraphConvBn #1 (Fin -> C1) + ReLU -----------------------------------
    # Fin < C1, so aggregating the raw features first keeps the N x N GEMM narrow.
    agg1 = jnp.dot(A, x, preferred_element_type=jnp.float32
                   ).astype(jnp.bfloat16)                          # (N, Fin)
    h1 = (jnp.dot(agg1, wr1_ref[...], preferred_element_type=jnp.float32)
          + jnp.dot(x, wo1_ref[...], preferred_element_type=jnp.float32)
          + s1_ref[...])
    h1 = jnp.maximum(h1, 0.0).astype(jnp.bfloat16)                 # (N, C1)

    # --- GraphConvBn #2 (C1 -> C2) + ReLU ------------------------------------
    # Reordered: project down to C2 first, then run the adjacency GEMM at width
    # C2 (=growth_rate) instead of C1 — GraphConv is linear, so A @ (h1 @ W) ==
    # (A @ h1) @ W.
    z_r = jnp.dot(h1, wr2_ref[...], preferred_element_type=jnp.float32
                  ).astype(jnp.bfloat16)                           # (N, C2)
    z_o = jnp.dot(h1, wo2_ref[...], preferred_element_type=jnp.float32)
    h2 = (jnp.dot(A, z_r, preferred_element_type=jnp.float32)
          + z_o + s2_ref[...])
    out_ref[...] = jnp.maximum(h2, 0.0).astype(out_ref.dtype)


# ------------------------------ host wrappers --------------------------------

def _fold_graphconv_bn(w_rel, b_rel, w_root, gamma, beta, mean, var, eps=1e-5):
    """Fold inference-mode NodeLevelBatchNorm into GraphConv weights/bias.

    Weights are returned in bf16 (MXU operand dtype); the shift stays f32.
    """
    scale = gamma / jnp.sqrt(var + eps)                 # (Cout,)
    wr = (w_rel * scale[None, :]).astype(jnp.bfloat16)
    wo = (w_root * scale[None, :]).astype(jnp.bfloat16)
    shift = ((b_rel - mean) * scale + beta).reshape(1, -1).astype(jnp.float32)
    return wr, wo, shift


def _pad_edges(edge_index, multiple=128):
    """Pad edge list to a lane-aligned length with sentinel (-1) edges."""
    e = edge_index.shape[1]
    ep = ((e + multiple - 1) // multiple) * multiple
    edge_index = edge_index.astype(jnp.int32)
    if ep != e:
        pad = -jnp.ones((2, ep - e), jnp.int32)
        edge_index = jnp.concatenate([edge_index, pad], axis=1)
    return edge_index


def dense_layer_forward(params, x_list, edge_index):
    """DenseLayer.forward.  x_list: list of (N, Fi) node-feature arrays (data.x)."""
    if isinstance(x_list, (list, tuple)):
        x = jnp.concatenate(list(x_list), axis=1)       # torch.cat(data.x, 1)
    else:
        x = x_list
    x = x.astype(jnp.bfloat16)                          # MXU operand dtype
    N, Fin = x.shape

    wr1, wo1, s1 = _fold_graphconv_bn(params["w_rel1"], params["b_rel1"],
                                      params["w_root1"], params["gamma1"],
                                      params["beta1"], params["mean1"],
                                      params["var1"])
    wr2, wo2, s2 = _fold_graphconv_bn(params["w_rel2"], params["b_rel2"],
                                      params["w_root2"], params["gamma2"],
                                      params["beta2"], params["mean2"],
                                      params["var2"])
    C1 = wr1.shape[1]
    C2 = wr2.shape[1]

    edges = _pad_edges(edge_index)
    src = edges[0].reshape(1, -1)
    dst = edges[1].reshape(1, -1)

    # Single invocation (no grid): whole-array VMEM residency, no pointless
    # double-buffering of inputs; explicit (conservative) VMEM limit.
    vmem_spec = pl.BlockSpec(memory_space=pltpu.MemorySpace.VMEM)
    return pl.pallas_call(
        dense_layer_kernel,
        out_shape=jax.ShapeDtypeStruct((N, C2), jnp.float32),
        in_specs=[vmem_spec] * 9,
        out_specs=vmem_spec,
        compiler_params=pltpu.CompilerParams(
            vmem_limit_bytes=32 * 1024 * 1024),
    )(x, src, dst, wr1, wo1, s1, wr2, wo2, s2)


# ------------------------------ params / reference ---------------------------

def init_params(key, num_input_features, growth_rate=32, bn_size=4):
    c1 = int(growth_rate * bn_size)     # 128
    c2 = growth_rate                    # 32
    k = jax.random.split(key, 14)
    n = lambda kk, shape, s: s * jax.random.normal(kk, shape, jnp.float32)
    return {
        "w_rel1": n(k[0], (num_input_features, c1), 0.1),
        "w_root1": n(k[1], (num_input_features, c1), 0.1),
        "b_rel1": n(k[2], (c1,), 0.1),
        "gamma1": 1.0 + n(k[3], (c1,), 0.1),
        "beta1": n(k[4], (c1,), 0.1),
        "mean1": n(k[5], (c1,), 0.1),
        "var1": 1.0 + jax.random.uniform(k[6], (c1,), jnp.float32, 0.0, 0.5),
        "w_rel2": n(k[7], (c1, c2), 0.05),
        "w_root2": n(k[8], (c1, c2), 0.05),
        "b_rel2": n(k[9], (c2,), 0.1),
        "gamma2": 1.0 + n(k[10], (c2,), 0.1),
        "beta2": n(k[11], (c2,), 0.1),
        "mean2": n(k[12], (c2,), 0.1),
        "var2": 1.0 + jax.random.uniform(k[13], (c2,), jnp.float32, 0.0, 0.5),
    }


def reference(params, x_list, edge_index, eps=1e-5):
    """Pure-JAX f32 reference (scatter-add aggregation, unfolded BN)."""
    x = jnp.concatenate(list(x_list), axis=1) if isinstance(x_list, (list, tuple)) else x_list
    x = x.astype(jnp.float32)
    src, dst = edge_index[0], edge_index[1]

    def graph_conv_bn(h, wr, br, wo, gamma, beta, mean, var):
        agg = jnp.zeros_like(h).at[dst].add(h[src])          # sum_{j->i} h_j
        y = agg @ wr + br + h @ wo
        y = (y - mean) / jnp.sqrt(var + eps) * gamma + beta
        return jnp.maximum(y, 0.0)

    h1 = graph_conv_bn(x, params["w_rel1"], params["b_rel1"], params["w_root1"],
                       params["gamma1"], params["beta1"], params["mean1"], params["var1"])
    h2 = graph_conv_bn(h1, params["w_rel2"], params["b_rel2"], params["w_root2"],
                       params["gamma2"], params["beta2"], params["mean2"], params["var2"])
    return h2


# ------------------------------------ main ------------------------------------

if __name__ == "__main__":
    # 8 graphs of 32 nodes each, batched into one block-diagonal graph so the
    # node (M) dimension is 256 and the MXU rows are actually filled.
    # data.x is a list of two 32-dim feature tensors (num_input_features = 64),
    # growth_rate=32, bn_size=4.
    feature_parts = (32, 32)
    growth_rate, bn_size = 32, 4
    num_graphs, nodes_per_graph, edges_per_graph = 8, 32, 100
    N = num_graphs * nodes_per_graph          # 256
    E = num_graphs * edges_per_graph          # 800 (padded to 896 in-wrapper)

    key = jax.random.PRNGKey(0)
    k_x1, k_x2, k_e, k_p = jax.random.split(key, 4)
    x_list = [jax.random.normal(k_x1, (N, feature_parts[0]), jnp.float32),
              jax.random.normal(k_x2, (N, feature_parts[1]), jnp.float32)]

    # Per-graph random edges, offset into the block-diagonal batched graph.
    local_edges = jax.random.randint(k_e, (2, E), 0, nodes_per_graph, dtype=jnp.int32)
    offsets = jnp.repeat(jnp.arange(num_graphs, dtype=jnp.int32) * nodes_per_graph,
                         edges_per_graph)
    edge_index = local_edges + offsets[None, :]

    params = init_params(k_p, sum(feature_parts), growth_rate, bn_size)

    fwd = jax.jit(dense_layer_forward)
    out = fwd(params, x_list, edge_index)
    out = jax.block_until_ready(out)

    ref = reference(params, x_list, edge_index)
    assert out.shape == (N, growth_rate), out.shape
    max_err = float(jnp.max(jnp.abs(out - ref)))
    rel_fro = float(jnp.linalg.norm(out - ref) / (jnp.linalg.norm(ref) + 1e-12))
    # bf16 MXU operands (f32 accumulation) -> tolerance looser than pure-f32.
    assert max_err < 0.25, max_err
    assert rel_fro < 2.5e-2, rel_fro
    print("KERNEL_OK")
</pallas_src>

<mosaic_0001>
module attributes {stable_mosaic.version = 11 : i64} {
  func.func @dense_layer_kernel(%arg0: memref<256x64xbf16, #tpu.memory_space<vmem>>, %arg1: memref<1x896xi32, #tpu.memory_space<vmem>>, %arg2: memref<1x896xi32, #tpu.memory_space<vmem>>, %arg3: memref<64x128xbf16, #tpu.memory_space<vmem>>, %arg4: memref<64x128xbf16, #tpu.memory_space<vmem>>, %arg5: memref<1x128xf32, #tpu.memory_space<vmem>>, %arg6: memref<128x32xbf16, #tpu.memory_space<vmem>>, %arg7: memref<128x32xbf16, #tpu.memory_space<vmem>>, %arg8: memref<1x32xf32, #tpu.memory_space<vmem>>, %arg9: memref<256x32xf32, #tpu.memory_space<vmem>>) attributes {dimension_semantics = [], scalar_prefetch = 0 : i64, scratch_operands = 0 : i64, tpu.core_type = #tpu.core_type<tc>} {
    %c0 = arith.constant 0 : index
    %c0_0 = arith.constant 0 : index
    %0 = vector.load %arg0[%c0, %c0_0] : memref<256x64xbf16, #tpu.memory_space<vmem>>, vector<256x64xbf16>
    %1 = tpu.iota {dimensions = array<i32: 0>} : vector<256x896xi32>
    %c0_1 = arith.constant 0 : index
    %c0_2 = arith.constant 0 : index
    %2 = vector.load %arg2[%c0_1, %c0_2] : memref<1x896xi32, #tpu.memory_space<vmem>>, vector<1x896xi32>
    %3 = vector.broadcast %2 : vector<1x896xi32> to vector<256x896xi32>
    %4 = arith.cmpi eq, %3, %1 : vector<256x896xi32>
    %5 = arith.extui %4 : vector<256x896xi1> to vector<256x896xi32>
    %6 = arith.sitofp %5 : vector<256x896xi32> to vector<256x896xf32>
    %7 = arith.truncf %6 : vector<256x896xf32> to vector<256x896xbf16>
    %c0_3 = arith.constant 0 : index
    %c0_4 = arith.constant 0 : index
    %8 = vector.load %arg1[%c0_3, %c0_4] : memref<1x896xi32, #tpu.memory_space<vmem>>, vector<1x896xi32>
    %9 = vector.broadcast %8 : vector<1x896xi32> to vector<256x896xi32>
    %10 = arith.cmpi eq, %9, %1 : vector<256x896xi32>
    %11 = arith.extui %10 : vector<256x896xi1> to vector<256x896xi32>
    %12 = arith.sitofp %11 : vector<256x896xi32> to vector<256x896xf32>
    %13 = arith.truncf %12 : vector<256x896xf32> to vector<256x896xbf16>
    %cst = arith.constant dense<0.000000e+00> : vector<256x256xf32>
    %14 = tpu.matmul %7, %13, %cst {dimension_numbers = #tpu.dot_dimension_numbers<[1], [1], [0], [0], [0, 0, 1, 0], [], []>} : vector<256x896xbf16>, vector<256x896xbf16>, vector<256x256xf32> -> vector<256x256xf32>
    %15 = arith.truncf %14 : vector<256x256xf32> to vector<256x256xbf16>
    %cst_5 = arith.constant dense<0.000000e+00> : vector<256x64xf32>
    %16 = tpu.matmul %15, %0, %cst_5 {dimension_numbers = #tpu.dot_dimension_numbers<[1], [0], [0], [1], [0, 0, 1, 1], [], []>} : vector<256x256xbf16>, vector<256x64xbf16>, vector<256x64xf32> -> vector<256x64xf32>
    %17 = arith.truncf %16 : vector<256x64xf32> to vector<256x64xbf16>
    %c0_6 = arith.constant 0 : index
    %c0_7 = arith.constant 0 : index
    %18 = vector.load %arg3[%c0_6, %c0_7] : memref<64x128xbf16, #tpu.memory_space<vmem>>, vector<64x128xbf16>
    %cst_8 = arith.constant dense<0.000000e+00> : vector<256x128xf32>
    %19 = tpu.matmul %17, %18, %cst_8 {dimension_numbers = #tpu.dot_dimension_numbers<[1], [0], [0], [1], [0, 0, 1, 1], [], []>} : vector<256x64xbf16>, vector<64x128xbf16>, vector<256x128xf32> -> vector<256x128xf32>
    %c0_9 = arith.constant 0 : index
    %c0_10 = arith.constant 0 : index
    %20 = vector.load %arg4[%c0_9, %c0_10] : memref<64x128xbf16, #tpu.memory_space<vmem>>, vector<64x128xbf16>
    %cst_11 = arith.constant dense<0.000000e+00> : vector<256x128xf32>
    %21 = tpu.matmul %0, %20, %cst_11 {dimension_numbers = #tpu.dot_dimension_numbers<[1], [0], [0], [1], [0, 0, 1, 1], [], []>} : vector<256x64xbf16>, vector<64x128xbf16>, vector<256x128xf32> -> vector<256x128xf32>
    %22 = arith.addf %19, %21 : vector<256x128xf32>
    %c0_12 = arith.constant 0 : index
    %c0_13 = arith.constant 0 : index
    %23 = vector.load %arg5[%c0_12, %c0_13] : memref<1x128xf32, #tpu.memory_space<vmem>>, vector<1x128xf32>
    %24 = vector.broadcast %23 : vector<1x128xf32> to vector<256x128xf32>
    %25 = arith.addf %22, %24 : vector<256x128xf32>
    %cst_14 = arith.constant 0.000000e+00 : f32
    %26 = vector.broadcast %cst_14 : f32 to vector<256x128xf32>
    %27 = arith.maximumf %25, %26 : vector<256x128xf32>
    %28 = arith.truncf %27 : vector<256x128xf32> to vector<256x128xbf16>
    %c0_15 = arith.constant 0 : index
    %c0_16 = arith.constant 0 : index
    %29 = vector.load %arg6[%c0_15, %c0_16] : memref<128x32xbf16, #tpu.memory_space<vmem>>, vector<128x32xbf16>
    %cst_17 = arith.constant dense<0.000000e+00> : vector<256x32xf32>
    %30 = tpu.matmul %28, %29, %cst_17 {dimension_numbers = #tpu.dot_dimension_numbers<[1], [0], [0], [1], [0, 0, 1, 1], [], []>} : vector<256x128xbf16>, vector<128x32xbf16>, vector<256x32xf32> -> vector<256x32xf32>
    %31 = arith.truncf %30 : vector<256x32xf32> to vector<256x32xbf16>
    %c0_18 = arith.constant 0 : index
    %c0_19 = arith.constant 0 : index
    %32 = vector.load %arg7[%c0_18, %c0_19] : memref<128x32xbf16, #tpu.memory_space<vmem>>, vector<128x32xbf16>
    %cst_20 = arith.constant dense<0.000000e+00> : vector<256x32xf32>
    %33 = tpu.matmul %28, %32, %cst_20 {dimension_numbers = #tpu.dot_dimension_numbers<[1], [0], [0], [1], [0, 0, 1, 1], [], []>} : vector<256x128xbf16>, vector<128x32xbf16>, vector<256x32xf32> -> vector<256x32xf32>
    %cst_21 = arith.constant dense<0.000000e+00> : vector<256x32xf32>
    %34 = tpu.matmul %15, %31, %cst_21 {dimension_numbers = #tpu.dot_dimension_numbers<[1], [0], [0], [1], [0, 0, 1, 1], [], []>} : vector<256x256xbf16>, vector<256x32xbf16>, vector<256x32xf32> -> vector<256x32xf32>
    %35 = arith.addf %34, %33 : vector<256x32xf32>
    %c0_22 = arith.constant 0 : index
    %c0_23 = arith.constant 0 : index
    %36 = vector.load %arg8[%c0_22, %c0_23] : memref<1x32xf32, #tpu.memory_space<vmem>>, vector<1x32xf32>
    %37 = vector.broadcast %36 : vector<1x32xf32> to vector<256x32xf32>
    %38 = arith.addf %35, %37 : vector<256x32xf32>
    %cst_24 = arith.constant 0.000000e+00 : f32
    %39 = vector.broadcast %cst_24 : f32 to vector<256x32xf32>
    %40 = arith.maximumf %38, %39 : vector<256x32xf32>
    %c0_25 = arith.constant 0 : index
    %c0_26 = arith.constant 0 : index
    %41 = vector.load %arg9[%c0_25, %c0_26] : memref<256x32xf32, #tpu.memory_space<vmem>>, vector<256x32xf32>
    tpu.vector_store %arg9[%c0_25, %c0_26], %40 {strides = array<i32>} : memref<256x32xf32, #tpu.memory_space<vmem>>, vector<256x32xf32>,
    return
  }
}

</mosaic_0001>

<bundles_post_ra>
// kernel: dense_layer_forward.1
= control target key start
LH: loop header
LB: loop body
LE: loop exit
PB: predicated region body
PF: predicated region fallthrough
CT: control target
= control target key end

     0   :  { %v65_v0 = vlaneseq  ;;  %v8421_v15 = vmov 1.0|1.0   ;;  %s8411_s1 = inlined_call_operand.vmem [shape: s32[1,896], index: 1, kind: input, shape index: {}]   ;;  %s8412_s2 = inlined_call_operand.vmem [shape: s32[1,896], index: 2, kind: input, shape index: {}]   ;;  %s8413_s0 = inlined_call_operand.vmem [shape: bf16[256,64], index: 0, kind: input, shape index: {}]   ;;  %s8414_s4 = inlined_call_operand.vmem [shape: bf16[64,128], index: 4, kind: input, shape index: {}]   ;;  %s8415_s3 = inlined_call_operand.vmem [shape: bf16[64,128], index: 3, kind: input, shape index: {}]   ;;  %s8416_s6 = inlined_call_operand.vmem [shape: bf16[128,32], index: 6, kind: input, shape index: {}]   ;;  %s8417_s7 = inlined_call_operand.vmem [shape: bf16[128,32], index: 7, kind: input, shape index: {}]   ;;  %s8418_s5 = inlined_call_operand.vmem [shape: f32[1,128], index: 5, kind: input, shape index: {}]   ;;  %s8419_s8 = inlined_call_operand.vmem [shape: f32[1,32], index: 8, kind: input, shape index: {}]   ;;  %s8420_s9 = inlined_call_operand.vmem [shape: f32[256,32], index: 9, kind: output, shape index: {}]  }
   0x1   :  { %v5743_v2 = vld [vmem:[%s8411_s1] sm:$0xff] }
   0x2   :  { %v5738_v1 = vshrl.u32 %v65_v0, 7  ;;  %v5985_v29 = vld [vmem:[%s8412_s2] sm:$0xff] }
   0x4   :  { %v5746_v3 = vadd.s32 112, %v5738_v1  ;;  %v5749_v4 = vadd.s32 120, %v5738_v1  ;;  %v105_v5 = vsub.s32 1, %v5738_v1  ;;  %v113_v6 = vsub.s32 3, %v5738_v1 }
   0x5   :  { %v101_v7 = vsub.s32 0, %v5738_v1  ;;  %v109_v8 = vsub.s32 2, %v5738_v1  ;;  %v5766_v11 = vadd.s32 96, %v5738_v1  ;;  %v5769_v12 = vadd.s32 104, %v5738_v1 }
   0x6   :  { %v5758_v9 = vrot.slane %v5743_v2, %v105_v5  ;;  %v5763_v10 = vrot.slane %v5743_v2, %v113_v6  ;;  %v5808_v16 = vadd.s32 80, %v5738_v1  ;;  %v5811_v17 = vadd.s32 88, %v5738_v1 }
   0x7   :  { %v5774_v13 = vrot.slane %v5743_v2, %v101_v7  ;;  %v5779_v14 = vrot.slane %v5743_v2, %v109_v8  ;;  %v5834_v18 = vadd.s32 64, %v5738_v1  ;;  %v5837_v19 = vadd.s32 72, %v5738_v1 }
   0x8   :  { %vm1039_vm0 = vcmp.eq.s32.totalorder %v5758_v9, %v5746_v3  ;;  %vm1046_vm1 = vcmp.eq.s32.totalorder %v5758_v9, %v5749_v4  ;;  %vm1041_vm2 = vcmp.eq.s32.totalorder %v5763_v10, %v5746_v3  ;;  %vm1048_vm3 = vcmp.eq.s32.totalorder %v5763_v10, %v5749_v4 }
   0x9   :  { %vm4554_vm4 = vmpackc.low %vm1046_vm1, %vm1039_vm0  ;;  %vm1038_vm5 = vcmp.eq.s32.totalorder %v5774_v13, %v5746_v3  ;;  %vm1045_vm6 = vcmp.eq.s32.totalorder %v5774_v13, %v5749_v4  ;;  %vm1040_vm7 = vcmp.eq.s32.totalorder %v5779_v14, %v5746_v3  ;;  %vm1047_vm8 = vcmp.eq.s32.totalorder %v5779_v14, %v5749_v4 }
   0xa   :  { %4555 = vmatprep.subr.msk.bf16.mxu0 %vm4554_vm4, %v8421_v15  ;;  %vm4682_vm9 = vmpackc.low %vm1048_vm3, %vm1041_vm2  ;;  %vm1025_vm10 = vcmp.eq.s32.totalorder %v5758_v9, %v5766_v11  ;;  %vm1032_vm11 = vcmp.eq.s32.totalorder %v5758_v9, %v5769_v12  ;;  %vm1027_vm13 = vcmp.eq.s32.totalorder %v5763_v10, %v5766_v11  ;;  %vm1034_vm14 = vcmp.eq.s32.totalorder %v5763_v10, %v5769_v12 }
   0xb   :  { %4683 = vmatprep.subr.msk.bf16.mxu1 %vm4682_vm9, %v8421_v15  ;;  %vm4556_vm12 = vmpackc.low %vm1045_vm6, %vm1038_vm5  ;;  %vm1024_vm1 = vcmp.eq.s32.totalorder %v5774_v13, %v5766_v11  ;;  %vm1031_vm2 = vcmp.eq.s32.totalorder %v5774_v13, %v5769_v12  ;;  %vm1026_vm4 = vcmp.eq.s32.totalorder %v5779_v14, %v5766_v11  ;;  %vm1033_vm5 = vcmp.eq.s32.totalorder %v5779_v14, %v5769_v12 }
   0xc   :  { %4557 = vmatpush1.bf16.xpose.msk.msra.mxu0 %vm4556_vm12, %v8421_v15  ;;  %vm4684_vm15 = vmpackc.low %vm1047_vm8, %vm1040_vm7  ;;  %vm1011_vm6 = vcmp.eq.s32.totalorder %v5758_v9, %v5808_v16  ;;  %vm1018_vm7 = vcmp.eq.s32.totalorder %v5758_v9, %v5811_v17  ;;  %vm1013_vm9 = vcmp.eq.s32.totalorder %v5763_v10, %v5808_v16  ;;  %v5860_v20 = vadd.s32 48, %v5738_v1 }
   0xd   :  { %4685 = vmatpush1.bf16.xpose.msk.msra.mxu1 %vm4684_vm15, %v8421_v15  ;;  %vm4558_vm0 = vmpackc.low %vm1032_vm11, %vm1025_vm10  ;;  %vm1020_vm10 = vcmp.eq.s32.totalorder %v5763_v10, %v5811_v17  ;;  %vm1017_vm15 = vcmp.eq.s32.totalorder %v5774_v13, %v5811_v17  ;;  %v5863_v21 = vadd.s32 56, %v5738_v1  ;;  %v5886_v22 = vadd.s32 32, %v5738_v1 }
   0xe   :  { %4559 = vmatprep.subr.msk.bf16.mxu0 %vm4558_vm0, %v8421_v15  ;;  %vm4686_vm3 = vmpackc.low %vm1034_vm14, %vm1027_vm13  ;;  %vm1010_vm14 = vcmp.eq.s32.totalorder %v5774_v13, %v5808_v16  ;;  %vm1012_vm0 = vcmp.eq.s32.totalorder %v5779_v14, %v5808_v16  ;;  %v5889_v23 = vadd.s32 40, %v5738_v1  ;;  %v5912_v24 = vadd.s32 16, %v5738_v1 }
   0xf   :  { %4687 = vmatprep.subr.msk.bf16.mxu1 %vm4686_vm3, %v8421_v15  ;;  %vm4560_vm8 = vmpackc.low %vm1031_vm2, %vm1024_vm1  ;;  %vm1019_vm1 = vcmp.eq.s32.totalorder %v5779_v14, %v5811_v17  ;;  %vm997_vm2 = vcmp.eq.s32.totalorder %v5758_v9, %v5834_v18  ;;  %vm1004_vm3 = vcmp.eq.s32.totalorder %v5758_v9, %v5837_v19  ;;  %v5915_v25 = vadd.s32 24, %v5738_v1 }
  0x10   :  { %vm4688_vm11 = vmpackc.low %vm1033_vm5, %vm1026_vm4  ;;  %vm999_vm5 = vcmp.eq.s32.totalorder %v5763_v10, %v5834_v18  ;;  %v5938_v26 = vadd.s32 8, %v5738_v1  ;;  %v5961_v27 = vadd.s32 240, %v5738_v1  ;;  %v5964_v28 = vadd.s32 248, %v5738_v1 }
  0x11   :  { %vm4562_vm12 = vmpackc.low %vm1018_vm7, %vm1011_vm6  ;;  %vm1006_vm6 = vcmp.eq.s32.totalorder %v5763_v10, %v5837_v19  ;;  %v5992_v30 = vadd.s32 224, %v5738_v1  ;;  %v5995_v31 = vadd.s32 232, %v5738_v1  ;;  %v6000_v32 = vrot.slane %v5985_v29, %v105_v5 }
  0x12   :  { %vm4690_vm13 = vmpackc.low %vm1020_vm10, %vm1013_vm9  ;;  %vm996_vm10 = vcmp.eq.s32.totalorder %v5774_v13, %v5834_v18  ;;  %v6009_v33 = vrot.slane %v5985_v29, %v113_v6  ;;  %v6041_v35 = vadd.s32 208, %v5738_v1  ;;  %v6044_v36 = vadd.s32 216, %v5738_v1 }
  0x13   :  { %vm4564_vm4 = vmpackc.low %vm1017_vm15, %vm1010_vm14  ;;  %vm983_vm14 = vcmp.eq.s32.totalorder %v5758_v9, %v5860_v20  ;;  %vm990_vm15 = vcmp.eq.s32.totalorder %v5758_v9, %v5863_v21  ;;  %v6070_v37 = vadd.s32 192, %v5738_v1  ;;  %v6073_v38 = vadd.s32 200, %v5738_v1 }
  0x14   :  { %4561 = vmatpush1.bf16.xpose.msk.msra.mxu0 %vm4560_vm8, %v8421_v15  ;;  %vm4692_vm7 = vmpackc.low %vm1019_vm1, %vm1012_vm0  ;;  %vm985_vm1 = vcmp.eq.s32.totalorder %v5763_v10, %v5860_v20  ;;  %v6096_v39 = vadd.s32 176, %v5738_v1  ;;  %v6099_v40 = vadd.s32 184, %v5738_v1  ;;  %v6122_v41 = vadd.s32 160, %v5738_v1 }
  0x15   :  { %4689 = vmatpush1.bf16.xpose.msk.msra.mxu1 %vm4688_vm11, %v8421_v15  ;;  %4563 = vmatprep.subr.msk.bf16.mxu0 %vm4562_vm12, %v8421_v15  ;;  %vm4566_vm8 = vmpackc.low %vm1004_vm3, %vm997_vm2  ;;  %vm1003_vm11 = vcmp.eq.s32.totalorder %v5774_v13, %v5837_v19  ;;  %vm998_vm12 = vcmp.eq.s32.totalorder %v5779_v14, %v5834_v18  ;;  %vm992_vm2 = vcmp.eq.s32.totalorder %v5763_v10, %v5863_v21  ;;  %v6125_v42 = vadd.s32 168, %v5738_v1 }
  0x16   :  { %4691 = vmatprep.subr.msk.bf16.mxu1 %vm4690_vm13, %v8421_v15  ;;  %vm4694_vm9 = vmpackc.low %vm1006_vm6, %vm999_vm5  ;;  %vm1005_vm13 = vcmp.eq.s32.totalorder %v5779_v14, %v5837_v19  ;;  %vm982_vm6 = vcmp.eq.s32.totalorder %v5774_v13, %v5860_v20  ;;  %v6148_v43 = vadd.s32 144, %v5738_v1  ;;  %v6151_v44 = vadd.s32 152, %v5738_v1 }
  0x17   :  { %vm4568_vm0 = vmpackc.low %vm1003_vm11, %vm996_vm10  ;;  %vm969_vm10 = vcmp.eq.s32.totalorder %v5758_v9, %v5886_v22  ;;  %vm976_vm11 = vcmp.eq.s32.totalorder %v5758_v9, %v5889_v23  ;;  %v6174_v45 = vadd.s32 128, %v5738_v1  ;;  %v6177_v46 = vadd.s32 136, %v5738_v1 }
  0x18   :  { %vm4696_vm3 = vmpackc.low %vm1005_vm13, %vm998_vm12  ;;  %vm971_vm13 = vcmp.eq.s32.totalorder %v5763_v10, %v5886_v22  ;;  %v121_v47 = vsub.s32 5, %v5738_v1  ;;  %v117_v49 = vsub.s32 4, %v5738_v1  ;;  %v6221_v50 = vrot.slane %v5985_v29, %v101_v7 }
  0x19   :  { %vm4698_vm5 = vmpackc.low %vm992_vm2, %vm985_vm1  ;;  %vm968_vm2 = vcmp.eq.s32.totalorder %v5774_v13, %v5886_v22  ;;  %v6230_v51 = vrot.slane %v5985_v29, %v109_v8 }
  0x1a   :  { %v6203_v48 = vrot.slane %v5743_v2, %v121_v47  ;;  %v6235_v52 = vrot.slane %v5743_v2, %v117_v49 }
  0x1c   :  { %4565 = vmatpush1.bf16.xpose.msk.msra.mxu0 %vm4564_vm4, %v8421_v15  ;;  %vm4570_vm4 = vmpackc.low %vm990_vm15, %vm983_vm14  ;;  %vm978_vm14 = vcmp.eq.s32.totalorder %v5763_v10, %v5889_v23 }
  0x1d   :  { %4693 = vmatpush1.bf16.xpose.msk.msra.mxu1 %vm4692_vm7, %v8421_v15  ;;  %4567 = vmatprep.subr.msk.bf16.mxu0 %vm4566_vm8, %v8421_v15  ;;  %vm989_vm7 = vcmp.eq.s32.totalorder %v5774_v13, %v5863_v21  ;;  %vm984_vm8 = vcmp.eq.s32.totalorder %v5779_v14, %v5860_v20  ;;  %vm4702_vm1 = vmpackc.low %vm978_vm14, %vm971_vm13  ;;  %vm954_vm14 = vcmp.eq.s32.totalorder %v5774_v13, %v5912_v24 }
  0x1e   :  { %4695 = vmatprep.subr.msk.bf16.mxu1 %vm4694_vm9, %v8421_v15  ;;  %vm991_vm9 = vcmp.eq.s32.totalorder %v5779_v14, %v5863_v21  ;;  %vm4572_vm12 = vmpackc.low %vm989_vm7, %vm982_vm6  ;;  %vm955_vm6 = vcmp.eq.s32.totalorder %v5758_v9, %v5912_v24  ;;  %vm962_vm7 = vcmp.eq.s32.totalorder %v5758_v9, %v5915_v25 }
  0x1f   :  { %vm4700_vm15 = vmpackc.low %vm991_vm9, %vm984_vm8  ;;  %vm957_vm9 = vcmp.eq.s32.totalorder %v5763_v10, %v5912_v24 }
  0x24   :  { %4569 = vmatpush1.bf16.xpose.msk.msra.mxu0 %vm4568_vm0, %v8421_v15  ;;  %vm4574_vm0 = vmpackc.low %vm976_vm11, %vm969_vm10  ;;  %vm964_vm10 = vcmp.eq.s32.totalorder %v5763_v10, %v5915_v25 }
  0x25   :  { %4697 = vmatpush1.bf16.xpose.msk.msra.mxu1 %vm4696_vm3, %v8421_v15  ;;  %4571 = vmatprep.subr.msk.bf16.mxu0 %vm4570_vm4, %v8421_v15  ;;  %vm975_vm3 = vcmp.eq.s32.totalorder %v5774_v13, %v5889_v23  ;;  %vm970_vm4 = vcmp.eq.s32.totalorder %v5779_v14, %v5886_v22  ;;  %vm4706_vm13 = vmpackc.low %vm964_vm10, %vm957_vm9  ;;  %vm940_vm10 = vcmp.eq.s32.totalorder %v5774_v13, %v5738_v1 }
  0x26   :  { %4699 = vmatprep.subr.msk.bf16.mxu1 %vm4698_vm5, %v8421_v15  ;;  %vm977_vm5 = vcmp.eq.s32.totalorder %v5779_v14, %v5889_v23  ;;  %vm4576_vm8 = vmpackc.low %vm975_vm3, %vm968_vm2  ;;  %vm941_vm2 = vcmp.eq.s32.totalorder %v5758_v9, %v5738_v1  ;;  %vm948_vm3 = vcmp.eq.s32.totalorder %v5758_v9, %v5938_v26 }
  0x27   :  { %vm4704_vm11 = vmpackc.low %vm977_vm5, %vm970_vm4  ;;  %vm943_vm5 = vcmp.eq.s32.totalorder %v5763_v10, %v5738_v1 }
  0x2c   :  { %4573 = vmatpush1.bf16.xpose.msk.msra.mxu0 %vm4572_vm12, %v8421_v15  ;;  %vm4578_vm12 = vmpackc.low %vm962_vm7, %vm955_vm6  ;;  %vm950_vm6 = vcmp.eq.s32.totalorder %v5763_v10, %v5938_v26 }
  0x2d   :  { %4701 = vmatpush1.bf16.xpose.msk.msra.mxu1 %vm4700_vm15, %v8421_v15  ;;  %4575 = vmatprep.subr.msk.bf16.mxu0 %vm4574_vm0, %v8421_v15  ;;  %vm961_vm15 = vcmp.eq.s32.totalorder %v5774_v13, %v5915_v25  ;;  %vm956_vm0 = vcmp.eq.s32.totalorder %v5779_v14, %v5912_v24  ;;  %vm4710_vm9 = vmpackc.low %vm950_vm6, %vm943_vm5  ;;  %vm1150_vm6 = vcmp.eq.s32.totalorder %v5774_v13, %v5961_v27 }
  0x2e   :  { %4703 = vmatprep.subr.msk.bf16.mxu1 %vm4702_vm1, %v8421_v15  ;;  %vm963_vm1 = vcmp.eq.s32.totalorder %v5779_v14, %v5915_v25  ;;  %vm4580_vm4 = vmpackc.low %vm961_vm15, %vm954_vm14  ;;  %vm1151_vm14 = vcmp.eq.s32.totalorder %v5758_v9, %v5961_v27  ;;  %vm1158_vm15 = vcmp.eq.s32.totalorder %v5758_v9, %v5964_v28 }
  0x2f   :  { %vm4708_vm7 = vmpackc.low %vm963_vm1, %vm956_vm0  ;;  %vm1153_vm1 = vcmp.eq.s32.totalorder %v5763_v10, %v5961_v27 }
  0x34   :  { %4577 = vmatpush1.bf16.xpose.msk.msra.mxu0 %vm4576_vm8, %v8421_v15  ;;  %vm4582_vm8 = vmpackc.low %vm948_vm3, %vm941_vm2  ;;  %vm1160_vm2 = vcmp.eq.s32.totalorder %v5763_v10, %v5964_v28 }
  0x35   :  { %4705 = vmatpush1.bf16.xpose.msk.msra.mxu1 %vm4704_vm11, %v8421_v15  ;;  %4579 = vmatprep.subr.msk.bf16.mxu0 %vm4578_vm12, %v8421_v15  ;;  %vm947_vm11 = vcmp.eq.s32.totalorder %v5774_v13, %v5938_v26  ;;  %vm942_vm12 = vcmp.eq.s32.totalorder %v5779_v14, %v5738_v1  ;;  %vm4714_vm5 = vmpackc.low %vm1160_vm2, %vm1153_vm1  ;;  %vm137_vm1 = vcmp.eq.s32.totalorder %v6009_v33, %v5938_v26 }
  0x36   :  { %4707 = vmatprep.subr.msk.bf16.mxu1 %vm4706_vm13, %v8421_v15  ;;  %vm949_vm13 = vcmp.eq.s32.totalorder %v5779_v14, %v5938_v26  ;;  %vm4584_vm0 = vmpackc.low %vm947_vm11, %vm940_vm10  ;;  %vm1137_vm10 = vcmp.eq.s32.totalorder %v5758_v9, %v5992_v30  ;;  %vm1144_vm11 = vcmp.eq.s32.totalorder %v5758_v9, %v5995_v31 }
  0x37   :  { %vm4712_vm3 = vmpackc.low %vm949_vm13, %vm942_vm12  ;;  %vm128_vm13 = vcmp.eq.s32.totalorder %v6000_v32, %v5738_v1 }
  0x38   :  { %vm4590_vm2 = vmpackc.low %vm1144_vm11, %vm1137_vm10  ;;  %vm1138_vm10 = vcmp.eq.s32.totalorder %v5779_v14, %v5992_v30  ;;  %vm1145_vm11 = vcmp.eq.s32.totalorder %v5779_v14, %v5995_v31 }
  0x3c   :  { %4581 = vmatpush1.bf16.xpose.msk.msra.mxu0 %vm4580_vm4, %v8421_v15  ;;  %vm4586_vm4 = vmpackc.low %vm1158_vm15, %vm1151_vm14  ;;  %vm135_vm14 = vcmp.eq.s32.totalorder %v6000_v32, %v5938_v26 }
  0x3d   :  { %4709 = vmatpush1.bf16.xpose.msk.msra.mxu1 %vm4708_vm7, %v8421_v15  ;;  %4583 = vmatprep.subr.msk.bf16.mxu0 %vm4582_vm8, %v8421_v15  ;;  %vm1157_vm7 = vcmp.eq.s32.totalorder %v5774_v13, %v5964_v28  ;;  %vm1152_vm8 = vcmp.eq.s32.totalorder %v5779_v14, %v5961_v27 }
  0x3e   :  { %4711 = vmatprep.subr.msk.bf16.mxu1 %vm4710_vm9, %v8421_v15  ;;  %vm1159_vm9 = vcmp.eq.s32.totalorder %v5779_v14, %v5964_v28  ;;  %vm6023_vm12 = vmpackc.low %vm1157_vm7, %vm1150_vm6 }
  0x3f   :  { %vm4716_vm15 = vmpackc.low %vm1159_vm9, %vm1152_vm8  ;;  %vm1136_vm8 = vcmp.eq.s32.totalorder %v5774_v13, %v5992_v30  ;;  %vm1143_vm9 = vcmp.eq.s32.totalorder %v5774_v13, %v5995_v31 }
  0x44   :  { %4585 = vmatpush1.bf16.xpose.msk.msra.mxu0 %vm4584_vm0, %v8421_v15  ;;  %vm130_vm0 = vcmp.eq.s32.totalorder %v6009_v33, %v5738_v1 }
  0x45   :  { %4713 = vmatpush1.bf16.xpose.msk.msra.mxu1 %vm4712_vm3, %v8421_v15  ;;  %4587 = vmatprep.subr.msk.bf16.mxu0 %vm4586_vm4, %v8421_v15  ;;  %vm1139_vm3 = vcmp.eq.s32.totalorder %v5763_v10, %v5992_v30  ;;  %vm1146_vm4 = vcmp.eq.s32.totalorder %v5763_v10, %v5995_v31  ;;  %vm4746_vm6 = vmpackc.low %vm137_vm1, %vm130_vm0  ;;  %vm1132_vm0 = vcmp.eq.s32.totalorder %v5763_v10, %v6044_v36 }
  0x46   :  { %4715 = vmatprep.subr.msk.bf16.mxu1 %vm4714_vm5, %v8421_v15  ;;  %vm4618_vm5 = vmpackc.low %vm135_vm14, %vm128_vm13  ;;  %4747 = vmatprep.mubr.msk.bf16.mxu1 %vm4746_vm6, %v8421_v15  ;;  %vm1130_vm13 = vcmp.eq.s32.totalorder %v5758_v9, %v6044_v36  ;;  %vm1124_vm6 = vcmp.eq.s32.totalorder %v5779_v14, %v6041_v35 }
  0x47   :  { %4619 = vmatprep.mubr.msk.bf16.mxu0 %vm4618_vm5, %v8421_v15  ;;  %vm4718_vm7 = vmpackc.low %vm1146_vm4, %vm1139_vm3  ;;  %vm1122_vm4 = vcmp.eq.s32.totalorder %v5774_v13, %v6041_v35  ;;  %vm1129_vm5 = vcmp.eq.s32.totalorder %v5774_v13, %v6044_v36 }
  0x48   :  { %vm4592_vm14 = vmpackc.low %vm1143_vm9, %vm1136_vm8  ;;  %vm1109_vm8 = vcmp.eq.s32.totalorder %v5758_v9, %v6070_v37  ;;  %vm1116_vm9 = vcmp.eq.s32.totalorder %v5758_v9, %v6073_v38 }
  0x49   :  { %vm4720_vm1 = vmpackc.low %vm1145_vm11, %vm1138_vm10  ;;  %vm1111_vm11 = vcmp.eq.s32.totalorder %v5763_v10, %v6070_v37 }
  0x4a   :  { %vm4596_vm10 = vmpackc.low %vm1129_vm5, %vm1122_vm4  ;;  %vm1095_vm4 = vcmp.eq.s32.totalorder %v5758_v9, %v6096_v39  ;;  %vm1102_vm5 = vcmp.eq.s32.totalorder %v5758_v9, %v6099_v40 }
  0x4c   :  { %4589 = vmatpush2.bf16.xpose.msk.msra.mxu0 %vm6023_vm12, %v8421_v15  ;;  %vm1123_vm12 = vcmp.eq.s32.totalorder %v5758_v9, %v6041_v35 }
  0x4d   :  { %4717 = vmatpush2.bf16.xpose.msk.msra.mxu1 %vm4716_vm15, %v8421_v15  ;;  %4591 = vmatprep.subr.msk.bf16.mxu0 %vm4590_vm2, %v8421_v15  ;;  %vm1125_vm15 = vcmp.eq.s32.totalorder %v5763_v10, %v6041_v35  ;;  %vm4594_vm2 = vmpackc.low %vm1130_vm13, %vm1123_vm12  ;;  %vm1118_vm12 = vcmp.eq.s32.totalorder %v5763_v10, %v6073_v38 }
  0x4e   :  { %4719 = vmatprep.subr.msk.bf16.mxu1 %vm4718_vm7, %v8421_v15  ;;  %vm4722_vm3 = vmpackc.low %vm1132_vm0, %vm1125_vm15  ;;  %vm1131_vm7 = vcmp.eq.s32.totalorder %v5779_v14, %v6044_v36  ;;  %vm1108_vm0 = vcmp.eq.s32.totalorder %v5774_v13, %v6070_v37 }
  0x4f   :  { %vm4724_vm13 = vmpackc.low %vm1131_vm7, %vm1124_vm6  ;;  %vm1097_vm7 = vcmp.eq.s32.totalorder %v5763_v10, %v6096_v39 }
  0x50   :  { %vm4726_vm15 = vmpackc.low %vm1118_vm12, %vm1111_vm11  ;;  %vm1094_vm12 = vcmp.eq.s32.totalorder %v5774_v13, %v6096_v39 }
  0x54   :  { %4593 = vmatpush2.bf16.xpose.msk.msra.mxu0 %vm4592_vm14, %v8421_v15  ;;  %vm4598_vm14 = vmpackc.low %vm1116_vm9, %vm1109_vm8  ;;  %vm1104_vm8 = vcmp.eq.s32.totalorder %v5763_v10, %v6099_v40 }
  0x55   :  { %4721 = vmatpush2.bf16.xpose.msk.msra.mxu1 %vm4720_vm1, %v8421_v15  ;;  %4595 = vmatprep.subr.msk.bf16.mxu0 %vm4594_vm2, %v8421_v15  ;;  %vm1115_vm1 = vcmp.eq.s32.totalorder %v5774_v13, %v6073_v38  ;;  %vm1110_vm2 = vcmp.eq.s32.totalorder %v5779_v14, %v6070_v37  ;;  %vm4730_vm11 = vmpackc.low %vm1104_vm8, %vm1097_vm7  ;;  %vm1080_vm8 = vcmp.eq.s32.totalorder %v5774_v13, %v6122_v41 }
  0x56   :  { %4723 = vmatprep.subr.msk.bf16.mxu1 %vm4722_vm3, %v8421_v15  ;;  %vm1117_vm3 = vcmp.eq.s32.totalorder %v5779_v14, %v6073_v38  ;;  %vm4600_vm6 = vmpackc.low %vm1115_vm1, %vm1108_vm0  ;;  %vm1081_vm0 = vcmp.eq.s32.totalorder %v5758_v9, %v6122_v41  ;;  %vm1088_vm1 = vcmp.eq.s32.totalorder %v5758_v9, %v6125_v42 }
  0x57   :  { %vm4728_vm9 = vmpackc.low %vm1117_vm3, %vm1110_vm2  ;;  %vm1083_vm3 = vcmp.eq.s32.totalorder %v5763_v10, %v6122_v41 }
  0x5c   :  { %4597 = vmatpush2.bf16.xpose.msk.msra.mxu0 %vm4596_vm10, %v8421_v15  ;;  %vm4602_vm10 = vmpackc.low %vm1102_vm5, %vm1095_vm4  ;;  %vm1090_vm4 = vcmp.eq.s32.totalorder %v5763_v10, %v6125_v42 }
  0x5d   :  { %4725 = vmatpush2.bf16.xpose.msk.msra.mxu1 %vm4724_vm13, %v8421_v15  ;;  %4599 = vmatprep.subr.msk.bf16.mxu0 %vm4598_vm14, %v8421_v15  ;;  %vm1101_vm13 = vcmp.eq.s32.totalorder %v5774_v13, %v6099_v40  ;;  %vm1096_vm14 = vcmp.eq.s32.totalorder %v5779_v14, %v6096_v39  ;;  %vm4734_vm7 = vmpackc.low %vm1090_vm4, %vm1083_vm3  ;;  %vm1066_vm4 = vcmp.eq.s32.totalorder %v5774_v13, %v6148_v43 }
  0x5e   :  { %4727 = vmatprep.subr.msk.bf16.mxu1 %vm4726_vm15, %v8421_v15  ;;  %vm1103_vm15 = vcmp.eq.s32.totalorder %v5779_v14, %v6099_v40  ;;  %vm4604_vm2 = vmpackc.low %vm1101_vm13, %vm1094_vm12  ;;  %vm1067_vm12 = vcmp.eq.s32.totalorder %v5758_v9, %v6148_v43  ;;  %vm1074_vm13 = vcmp.eq.s32.totalorder %v5758_v9, %v6151_v44 }
  0x5f   :  { %vm4732_vm5 = vmpackc.low %vm1103_vm15, %vm1096_vm14  ;;  %vm1069_vm15 = vcmp.eq.s32.totalorder %v5763_v10, %v6148_v43 }
  0x64   :  { %4601 = vmatpush2.bf16.xpose.msk.msra.mxu0 %vm4600_vm6, %v8421_v15  ;;  %vm4606_vm6 = vmpackc.low %vm1088_vm1, %vm1081_vm0  ;;  %vm1076_vm0 = vcmp.eq.s32.totalorder %v5763_v10, %v6151_v44 }
  0x65   :  { %4729 = vmatpush2.bf16.xpose.msk.msra.mxu1 %vm4728_vm9, %v8421_v15  ;;  %4603 = vmatprep.subr.msk.bf16.mxu0 %vm4602_vm10, %v8421_v15  ;;  %vm1087_vm9 = vcmp.eq.s32.totalorder %v5774_v13, %v6125_v42  ;;  %vm1082_vm10 = vcmp.eq.s32.totalorder %v5779_v14, %v6122_v41  ;;  %vm4738_vm3 = vmpackc.low %vm1076_vm0, %vm1069_vm15  ;;  %vm1052_vm0 = vcmp.eq.s32.totalorder %v5774_v13, %v6174_v45 }
  0x66   :  { %4731 = vmatprep.subr.msk.bf16.mxu1 %vm4730_vm11, %v8421_v15  ;;  %vm1089_vm11 = vcmp.eq.s32.totalorder %v5779_v14, %v6125_v42  ;;  %vm4608_vm14 = vmpackc.low %vm1087_vm9, %vm1080_vm8  ;;  %vm1053_vm8 = vcmp.eq.s32.totalorder %v5758_v9, %v6174_v45  ;;  %vm1060_vm9 = vcmp.eq.s32.totalorder %v5758_v9, %v6177_v46  ;;  %v125_v9 = vsub.s32 6, %v5738_v1 }
  0x67   :  { %vm4736_vm1 = vmpackc.low %vm1089_vm11, %vm1082_vm10  ;;  %vm1055_vm11 = vcmp.eq.s32.totalorder %v5763_v10, %v6174_v45 }
  0x6c   :  { %4605 = vmatpush2.bf16.xpose.msk.msra.mxu0 %vm4604_vm2, %v8421_v15  ;;  %vm4610_vm2 = vmpackc.low %vm1074_vm13, %vm1067_vm12  ;;  %vm1062_vm12 = vcmp.eq.s32.totalorder %v5763_v10, %v6177_v46 }
  0x6d   :  { %4733 = vmatpush2.bf16.xpose.msk.msra.mxu1 %vm4732_vm5, %v8421_v15  ;;  %4607 = vmatprep.subr.msk.bf16.mxu0 %vm4606_vm6, %v8421_v15  ;;  %vm1073_vm5 = vcmp.eq.s32.totalorder %v5774_v13, %v6151_v44  ;;  %vm1068_vm6 = vcmp.eq.s32.totalorder %v5779_v14, %v6148_v43  ;;  %vm4742_vm15 = vmpackc.low %vm1062_vm12, %vm1055_vm11  ;;  %vm129_vm11 = vcmp.eq.s32.totalorder %v6230_v51, %v5738_v1 }
  0x6e   :  { %4735 = vmatprep.subr.msk.bf16.mxu1 %vm4734_vm7, %v8421_v15  ;;  %vm1075_vm7 = vcmp.eq.s32.totalorder %v5779_v14, %v6151_v44  ;;  %vm4612_vm10 = vmpackc.low %vm1073_vm5, %vm1066_vm4  ;;  %vm1043_vm4 = vcmp.eq.s32.totalorder %v6203_v48, %v5746_v3  ;;  %vm1050_vm5 = vcmp.eq.s32.totalorder %v6203_v48, %v5749_v4  ;;  %vm136_vm12 = vcmp.eq.s32.totalorder %v6230_v51, %v5938_v26 }
  0x6f   :  { %vm4740_vm13 = vmpackc.low %vm1075_vm7, %vm1068_vm6 }
  0x74   :  { %4609 = vmatpush2.bf16.xpose.msk.msra.mxu0 %vm4608_vm14, %v8421_v15  ;;  %vm4614_vm14 = vmpackc.low %vm1060_vm9, %vm1053_vm8  ;;  %vm127_vm9 = vcmp.eq.s32.totalorder %v6221_v50, %v5738_v1 }
  0x75   :  { %4737 = vmatpush2.bf16.xpose.msk.msra.mxu1 %vm4736_vm1, %v8421_v15  ;;  %4611 = vmatprep.subr.msk.bf16.mxu0 %vm4610_vm2, %v8421_v15  ;;  %vm1059_vm1 = vcmp.eq.s32.totalorder %v5774_v13, %v6177_v46  ;;  %vm1054_vm2 = vcmp.eq.s32.totalorder %v5779_v14, %v6174_v45  ;;  %vm4810_vm8 = vmpackc.low %vm1050_vm5, %vm1043_vm4  ;;  %vm151_vm4 = vcmp.eq.s32.totalorder %v6009_v33, %v5915_v25  ;;  %v6845_v13 = vld [vmem:[%s8412_s2] sm:$0xff] }
  0x76   :  { %4739 = vmatprep.subr.msk.bf16.mxu1 %vm4738_vm3, %v8421_v15  ;;  %vm1061_vm3 = vcmp.eq.s32.totalorder %v5779_v14, %v6177_v46  ;;  %vm4616_vm6 = vmpackc.low %vm1059_vm1, %vm1052_vm0  ;;  %vm142_vm0 = vcmp.eq.s32.totalorder %v6000_v32, %v5912_v24  ;;  %vm149_vm1 = vcmp.eq.s32.totalorder %v6000_v32, %v5915_v25  ;;  %v6850_v14 = vrot.slane %v6845_v13, %v121_v47 }
  0x77   :  { %vm4744_vm7 = vmpackc.low %vm1061_vm3, %vm1054_vm2  ;;  %vm144_vm3 = vcmp.eq.s32.totalorder %v6009_v33, %v5912_v24  ;;  %v6908_v34 = vrot.slane %v6845_v13, %v117_v49  ;;  %v7129_v47 = vrot.slane %v6845_v13, %v125_v9 }
  0x78   :  { %vm4748_vm2 = vmpackc.low %vm136_vm12, %vm129_vm11  ;;  %vm148_vm11 = vcmp.eq.s32.totalorder %v6221_v50, %v5915_v25 }
  0x7c   :  { %4613 = vmatpush2.bf16.xpose.msk.msra.mxu0 %vm4612_vm10, %v8421_v15  ;;  %vm134_vm10 = vcmp.eq.s32.totalorder %v6221_v50, %v5938_v26 }
  0x7d   :  { %4741 = vmatpush2.bf16.xpose.msk.msra.mxu1 %vm4740_vm13, %v8421_v15  ;;  %4615 = vmatprep.subr.msk.bf16.mxu0 %vm4614_vm14, %v8421_v15  ;;  %vm1042_vm13 = vcmp.eq.s32.totalorder %v6235_v52, %v5746_v3  ;;  %vm1049_vm14 = vcmp.eq.s32.totalorder %v6235_v52, %v5749_v4 }
  0x7e   :  { %4743 = vmatprep.subr.msk.bf16.mxu1 %vm4742_vm15, %v8421_v15  ;;  %vm4620_vm15 = vmpackc.low %vm134_vm10, %vm127_vm9  ;;  %vm141_vm10 = vcmp.eq.s32.totalorder %v6221_v50, %v5912_v24 }
  0x7f   :  { %vm4812_vm5 = vmpackc.low %vm1049_vm14, %vm1042_vm13  ;;  %vm143_vm13 = vcmp.eq.s32.totalorder %v6230_v51, %v5912_v24  ;;  %vm150_vm14 = vcmp.eq.s32.totalorder %v6230_v51, %v5915_v25 }
  0x80   :  { %vm4750_vm9 = vmpackc.low %vm151_vm4, %vm144_vm3  ;;  %vm163_vm3 = vcmp.eq.s32.totalorder %v6000_v32, %v5889_v23 }
  0x81   :  { %vm4752_vm4 = vmpackc.low %vm150_vm14, %vm143_vm13  ;;  %vm162_vm13 = vcmp.eq.s32.totalorder %v6221_v50, %v5889_v23 }
  0x84   :  { %4617 = vmatpush2.bf16.xpose.msk.msra.mxu0 %vm4616_vm6, %v8421_v15  ;;  %vm1029_vm6 = vcmp.eq.s32.totalorder %v6203_v48, %v5766_v11 }
  0x85   :  { %4745 = vmatpush2.bf16.xpose.msk.msra.mxu1 %vm4744_vm7, %v8421_v15  ;;  %4811 = vmatprep.subr.msk.bf16.mxu0 %vm4810_vm8, %v8421_v15  ;;  %vm1036_vm7 = vcmp.eq.s32.totalorder %v6203_v48, %v5769_v12 }
  0x86   :  { %5612 = vmatprep.subr.msk.bf16.mxu1 %vm4810_vm8, %v8421_v15  ;;  %vm4622_vm8 = vmpackc.low %vm149_vm1, %vm142_vm0  ;;  %vm1035_vm0 = vcmp.eq.s32.totalorder %v6235_v52, %v5769_v12 }
  0x87   :  { %vm6270_vm12 = vmpackc.low %vm1036_vm7, %vm1029_vm6  ;;  %vm165_vm6 = vcmp.eq.s32.totalorder %v6009_v33, %v5889_v23 }
  0x88   :  { %vm4624_vm1 = vmpackc.low %vm148_vm11, %vm141_vm10 }
  0x8b   :  { %4621 = vmatmul.mubr.msk.bf16.vlgmr.msra.gmra.mxu0 %vm4620_vm15, %v8421_v15  ;;  %vm1028_vm15 = vcmp.eq.s32.totalorder %v6235_v52, %v5766_v11 }
  0x8c   :  { %4749 = vmatmul.mubr.msk.bf16.vlgmr.msra.gmra.mxu1 %vm4748_vm2, %v8421_v15  ;;  %4813 = vmatpush1.bf16.xpose.msk.msra.mxu0 %vm4812_vm5, %v8421_v15  ;;  %vm156_vm2 = vcmp.eq.s32.totalorder %v6000_v32, %v5886_v22  ;;  %vm4816_vm7 = vmpackc.low %vm1035_vm0, %vm1028_vm15  ;;  %vm157_vm15 = vcmp.eq.s32.totalorder %v6230_v51, %v5886_v22  ;;  %vm164_vm0 = vcmp.eq.s32.totalorder %v6230_v51, %v5889_v23 }
  0x8d   :  { %5628 = vmatpush1.bf16.xpose.msk.msra.mxu1 %vm4812_vm5, %v8421_v15  ;;  %4623 = vmatprep.mubr.msk.bf16.mxu0 %vm4622_vm8, %v8421_v15  ;;  %vm158_vm5 = vcmp.eq.s32.totalorder %v6009_v33, %v5886_v22  ;;  %vm1015_vm8 = vcmp.eq.s32.totalorder %v6203_v48, %v5808_v16  ;;  %vm4626_vm10 = vmpackc.low %vm163_vm3, %vm156_vm2  ;;  %vm1021_vm2 = vcmp.eq.s32.totalorder %v6235_v52, %v5811_v17 }
  0x8e   :  { %4751 = vmatprep.mubr.msk.bf16.mxu1 %vm4750_vm9, %v8421_v15  ;;  %4815 = vmatprep.subr.msk.bf16.mxu0 %vm6270_vm12, %v8421_v15  ;;  %vm1022_vm9 = vcmp.eq.s32.totalorder %v6203_v48, %v5811_v17  ;;  %vm4754_vm11 = vmpackc.low %vm165_vm6, %vm158_vm5  ;;  %vm177_vm5 = vcmp.eq.s32.totalorder %v6000_v32, %v5863_v21 }
  0x8f   :  { %5613 = vmatprep.subr.msk.bf16.mxu1 %vm6270_vm12, %v8421_v15  ;;  %vm155_vm12 = vcmp.eq.s32.totalorder %v6221_v50, %v5886_v22  ;;  %vm6310_vm14 = vmpackc.low %vm1022_vm9, %vm1015_vm8  ;;  %vm179_vm8 = vcmp.eq.s32.totalorder %v6009_v33, %v5863_v21 }
  0x90   :  { %vm4628_vm3 = vmpackc.low %vm162_vm13, %vm155_vm12 }
  0x91   :  { %vm4756_vm6 = vmpackc.low %vm164_vm0, %vm157_vm15  ;;  %vm176_vm15 = vcmp.eq.s32.totalorder %v6221_v50, %v5863_v21 }
  0x93   :  { %4625 = vmatmul.mubr.msk.bf16.gmra.mxu0 %vm4624_vm1, %v8421_v15  ;;  %vm1014_vm1 = vcmp.eq.s32.totalorder %v6235_v52, %v5808_v16 }
  0x94   :  { %4753 = vmatmul.mubr.msk.bf16.gmra.mxu1 %vm4752_vm4, %v8421_v15  ;;  %4817 = vmatpush1.bf16.xpose.msk.msra.mxu0 %vm4816_vm7, %v8421_v15  ;;  %vm170_vm4 = vcmp.eq.s32.totalorder %v6000_v32, %v5860_v20  ;;  %vm4820_vm9 = vmpackc.low %vm1021_vm2, %vm1014_vm1  ;;  %vm171_vm1 = vcmp.eq.s32.totalorder %v6230_v51, %v5860_v20  ;;  %vm178_vm2 = vcmp.eq.s32.totalorder %v6230_v51, %v5863_v21 }
  0x95   :  { %5629 = vmatpush1.bf16.xpose.msk.msra.mxu1 %vm4816_vm7, %v8421_v15  ;;  %4627 = vmatprep.mubr.msk.bf16.mxu0 %vm4626_vm10, %v8421_v15  ;;  %vm172_vm7 = vcmp.eq.s32.totalorder %v6009_v33, %v5860_v20  ;;  %vm1001_vm10 = vcmp.eq.s32.totalorder %v6203_v48, %v5834_v18  ;;  %vm4630_vm12 = vmpackc.low %vm177_vm5, %vm170_vm4  ;;  %vm1007_vm4 = vcmp.eq.s32.totalorder %v6235_v52, %v5837_v19 }
  0x96   :  { %4755 = vmatprep.mubr.msk.bf16.mxu1 %vm4754_vm11, %v8421_v15  ;;  %4819 = vmatprep.subr.msk.bf16.mxu0 %vm6310_vm14, %v8421_v15  ;;  %vm1008_vm11 = vcmp.eq.s32.totalorder %v6203_v48, %v5837_v19  ;;  %vm4758_vm13 = vmpackc.low %vm179_vm8, %vm172_vm7  ;;  %vm191_vm7 = vcmp.eq.s32.totalorder %v6000_v32, %v5837_v19 }
  0x97   :  { %5614 = vmatprep.subr.msk.bf16.mxu1 %vm6310_vm14, %v8421_v15  ;;  %vm169_vm14 = vcmp.eq.s32.totalorder %v6221_v50, %v5860_v20  ;;  %vm6350_vm0 = vmpackc.low %vm1008_vm11, %vm1001_vm10  ;;  %vm193_vm10 = vcmp.eq.s32.totalorder %v6009_v33, %v5837_v19 }
  0x98   :  { %vm4632_vm5 = vmpackc.low %vm176_vm15, %vm169_vm14 }
  0x99   :  { %vm4760_vm8 = vmpackc.low %vm178_vm2, %vm171_vm1  ;;  %vm190_vm1 = vcmp.eq.s32.totalorder %v6221_v50, %v5837_v19 }
  0x9b   :  { %4629 = vmatmul.mubr.msk.bf16.gmra.mxu0 %vm4628_vm3, %v8421_v15  ;;  %vm1000_vm3 = vcmp.eq.s32.totalorder %v6235_v52, %v5834_v18 }
  0x9c   :  { %4757 = vmatmul.mubr.msk.bf16.gmra.mxu1 %vm4756_vm6, %v8421_v15  ;;  %4821 = vmatpush1.bf16.xpose.msk.msra.mxu0 %vm4820_vm9, %v8421_v15  ;;  %vm184_vm6 = vcmp.eq.s32.totalorder %v6000_v32, %v5834_v18  ;;  %vm4824_vm11 = vmpackc.low %vm1007_vm4, %vm1000_vm3  ;;  %vm185_vm3 = vcmp.eq.s32.totalorder %v6230_v51, %v5834_v18  ;;  %vm192_vm4 = vcmp.eq.s32.totalorder %v6230_v51, %v5837_v19 }
  0x9d   :  { %5630 = vmatpush1.bf16.xpose.msk.msra.mxu1 %vm4820_vm9, %v8421_v15  ;;  %4631 = vmatprep.mubr.msk.bf16.mxu0 %vm4630_vm12, %v8421_v15  ;;  %vm186_vm9 = vcmp.eq.s32.totalorder %v6009_v33, %v5834_v18  ;;  %vm987_vm12 = vcmp.eq.s32.totalorder %v6203_v48, %v5860_v20  ;;  %vm4634_vm14 = vmpackc.low %vm191_vm7, %vm184_vm6  ;;  %vm993_vm6 = vcmp.eq.s32.totalorder %v6235_v52, %v5863_v21 }
  0x9e   :  { %4759 = vmatprep.mubr.msk.bf16.mxu1 %vm4758_vm13, %v8421_v15  ;;  %4823 = vmatprep.subr.msk.bf16.mxu0 %vm6350_vm0, %v8421_v15  ;;  %vm994_vm13 = vcmp.eq.s32.totalorder %v6203_v48, %v5863_v21  ;;  %vm4762_vm15 = vmpackc.low %vm193_vm10, %vm186_vm9  ;;  %vm205_vm9 = vcmp.eq.s32.totalorder %v6000_v32, %v5811_v17 }
  0x9f   :  { %5615 = vmatprep.subr.msk.bf16.mxu1 %vm6350_vm0, %v8421_v15  ;;  %vm183_vm0 = vcmp.eq.s32.totalorder %v6221_v50, %v5834_v18  ;;  %vm6390_vm2 = vmpackc.low %vm994_vm13, %vm987_vm12  ;;  %vm207_vm12 = vcmp.eq.s32.totalorder %v6009_v33, %v5811_v17 }
  0xa0   :  { %vm4636_vm7 = vmpackc.low %vm190_vm1, %vm183_vm0 }
  0xa1   :  { %vm4764_vm10 = vmpackc.low %vm192_vm4, %vm185_vm3  ;;  %vm204_vm3 = vcmp.eq.s32.totalorder %v6221_v50, %v5811_v17 }
  0xa3   :  { %4633 = vmatmul.mubr.msk.bf16.gmra.mxu0 %vm4632_vm5, %v8421_v15  ;;  %vm986_vm5 = vcmp.eq.s32.totalorder %v6235_v52, %v5860_v20 }
  0xa4   :  { %4761 = vmatmul.mubr.msk.bf16.gmra.mxu1 %vm4760_vm8, %v8421_v15  ;;  %4825 = vmatpush1.bf16.xpose.msk.msra.mxu0 %vm4824_vm11, %v8421_v15  ;;  %vm198_vm8 = vcmp.eq.s32.totalorder %v6000_v32, %v5808_v16  ;;  %vm4828_vm13 = vmpackc.low %vm993_vm6, %vm986_vm5  ;;  %vm199_vm5 = vcmp.eq.s32.totalorder %v6230_v51, %v5808_v16  ;;  %vm206_vm6 = vcmp.eq.s32.totalorder %v6230_v51, %v5811_v17 }
  0xa5   :  { %5631 = vmatpush1.bf16.xpose.msk.msra.mxu1 %vm4824_vm11, %v8421_v15  ;;  %4635 = vmatprep.mubr.msk.bf16.mxu0 %vm4634_vm14, %v8421_v15  ;;  %vm200_vm11 = vcmp.eq.s32.totalorder %v6009_v33, %v5808_v16  ;;  %vm973_vm14 = vcmp.eq.s32.totalorder %v6203_v48, %v5886_v22  ;;  %vm4638_vm0 = vmpackc.low %vm205_vm9, %vm198_vm8  ;;  %vm979_vm8 = vcmp.eq.s32.totalorder %v6235_v52, %v5889_v23 }
  0xa6   :  { %4763 = vmatprep.mubr.msk.bf16.mxu1 %vm4762_vm15, %v8421_v15  ;;  %4827 = vmatprep.subr.msk.bf16.mxu0 %vm6390_vm2, %v8421_v15  ;;  %vm980_vm15 = vcmp.eq.s32.totalorder %v6203_v48, %v5889_v23  ;;  %vm4766_vm1 = vmpackc.low %vm207_vm12, %vm200_vm11  ;;  %vm219_vm11 = vcmp.eq.s32.totalorder %v6000_v32, %v5769_v12 }
  0xa7   :  { %5616 = vmatprep.subr.msk.bf16.mxu1 %vm6390_vm2, %v8421_v15  ;;  %vm197_vm2 = vcmp.eq.s32.totalorder %v6221_v50, %v5808_v16  ;;  %vm6430_vm4 = vmpackc.low %vm980_vm15, %vm973_vm14  ;;  %vm221_vm14 = vcmp.eq.s32.totalorder %v6009_v33, %v5769_v12 }
  0xa8   :  { %vm4640_vm9 = vmpackc.low %vm204_vm3, %vm197_vm2 }
  0xa9   :  { %vm4768_vm12 = vmpackc.low %vm206_vm6, %vm199_vm5  ;;  %vm218_vm5 = vcmp.eq.s32.totalorder %v6221_v50, %v5769_v12 }
  0xab   :  { %4637 = vmatmul.mubr.msk.bf16.gmra.mxu0 %vm4636_vm7, %v8421_v15  ;;  %vm972_vm7 = vcmp.eq.s32.totalorder %v6235_v52, %v5886_v22 }
  0xac   :  { %4765 = vmatmul.mubr.msk.bf16.gmra.mxu1 %vm4764_vm10, %v8421_v15  ;;  %4829 = vmatpush1.bf16.xpose.msk.msra.mxu0 %vm4828_vm13, %v8421_v15  ;;  %vm212_vm10 = vcmp.eq.s32.totalorder %v6000_v32, %v5766_v11  ;;  %vm4832_vm15 = vmpackc.low %vm979_vm8, %vm972_vm7  ;;  %vm213_vm7 = vcmp.eq.s32.totalorder %v6230_v51, %v5766_v11  ;;  %vm220_vm8 = vcmp.eq.s32.totalorder %v6230_v51, %v5769_v12 }
  0xad   :  { %5632 = vmatpush1.bf16.xpose.msk.msra.mxu1 %vm4828_vm13, %v8421_v15  ;;  %4639 = vmatprep.mubr.msk.bf16.mxu0 %vm4638_vm0, %v8421_v15  ;;  %vm214_vm13 = vcmp.eq.s32.totalorder %v6009_v33, %v5766_v11  ;;  %vm959_vm0 = vcmp.eq.s32.totalorder %v6203_v48, %v5912_v24  ;;  %vm4642_vm2 = vmpackc.low %vm219_vm11, %vm212_vm10  ;;  %vm965_vm10 = vcmp.eq.s32.totalorder %v6235_v52, %v5915_v25 }
  0xae   :  { %4767 = vmatprep.mubr.msk.bf16.mxu1 %vm4766_vm1, %v8421_v15  ;;  %4831 = vmatprep.subr.msk.bf16.mxu0 %vm6430_vm4, %v8421_v15  ;;  %vm966_vm1 = vcmp.eq.s32.totalorder %v6203_v48, %v5915_v25  ;;  %vm4770_vm3 = vmpackc.low %vm221_vm14, %vm214_vm13  ;;  %vm233_vm13 = vcmp.eq.s32.totalorder %v6000_v32, %v5749_v4 }
  0xaf   :  { %5617 = vmatprep.subr.msk.bf16.mxu1 %vm6430_vm4, %v8421_v15  ;;  %vm211_vm4 = vcmp.eq.s32.totalorder %v6221_v50, %v5766_v11  ;;  %vm6470_vm6 = vmpackc.low %vm966_vm1, %vm959_vm0  ;;  %vm235_vm0 = vcmp.eq.s32.totalorder %v6009_v33, %v5749_v4 }
  0xb0   :  { %vm4644_vm11 = vmpackc.low %vm218_vm5, %vm211_vm4 }
  0xb1   :  { %vm4772_vm14 = vmpackc.low %vm220_vm8, %vm213_vm7  ;;  %vm232_vm7 = vcmp.eq.s32.totalorder %v6221_v50, %v5749_v4 }
  0xb3   :  { %4641 = vmatmul.mubr.msk.bf16.gmra.mxu0 %vm4640_vm9, %v8421_v15  ;;  %vm958_vm9 = vcmp.eq.s32.totalorder %v6235_v52, %v5912_v24 }
  0xb4   :  { %4769 = vmatmul.mubr.msk.bf16.gmra.mxu1 %vm4768_vm12, %v8421_v15  ;;  %4833 = vmatpush1.bf16.xpose.msk.msra.mxu0 %vm4832_vm15, %v8421_v15  ;;  %vm226_vm12 = vcmp.eq.s32.totalorder %v6000_v32, %v5746_v3  ;;  %vm4836_vm1 = vmpackc.low %vm965_vm10, %vm958_vm9  ;;  %vm227_vm9 = vcmp.eq.s32.totalorder %v6230_v51, %v5746_v3  ;;  %vm234_vm10 = vcmp.eq.s32.totalorder %v6230_v51, %v5749_v4 }
  0xb5   :  { %5633 = vmatpush1.bf16.xpose.msk.msra.mxu1 %vm4832_vm15, %v8421_v15  ;;  %4643 = vmatprep.mubr.msk.bf16.mxu0 %vm4642_vm2, %v8421_v15  ;;  %vm228_vm15 = vcmp.eq.s32.totalorder %v6009_v33, %v5746_v3  ;;  %vm945_vm2 = vcmp.eq.s32.totalorder %v6203_v48, %v5738_v1  ;;  %vm4646_vm4 = vmpackc.low %vm233_vm13, %vm226_vm12  ;;  %vm951_vm12 = vcmp.eq.s32.totalorder %v6235_v52, %v5938_v26 }
  0xb6   :  { %4771 = vmatprep.mubr.msk.bf16.mxu1 %vm4770_vm3, %v8421_v15  ;;  %4835 = vmatprep.subr.msk.bf16.mxu0 %vm6470_vm6, %v8421_v15  ;;  %vm952_vm3 = vcmp.eq.s32.totalorder %v6203_v48, %v5938_v26  ;;  %vm4774_vm5 = vmpackc.low %vm235_vm0, %vm228_vm15  ;;  %vm247_vm15 = vcmp.eq.s32.totalorder %v6000_v32, %v6177_v46 }
  0xb7   :  { %5618 = vmatprep.subr.msk.bf16.mxu1 %vm6470_vm6, %v8421_v15  ;;  %vm225_vm6 = vcmp.eq.s32.totalorder %v6221_v50, %v5746_v3  ;;  %vm6510_vm8 = vmpackc.low %vm952_vm3, %vm945_vm2  ;;  %vm249_vm2 = vcmp.eq.s32.totalorder %v6009_v33, %v6177_v46 }
  0xb8   :  { %vm4648_vm13 = vmpackc.low %vm232_vm7, %vm225_vm6 }
  0xb9   :  { %vm4776_vm0 = vmpackc.low %vm234_vm10, %vm227_vm9  ;;  %vm246_vm9 = vcmp.eq.s32.totalorder %v6221_v50, %v6177_v46 }
  0xbb   :  { %4645 = vmatmul.mubr.msk.bf16.gmra.mxu0 %vm4644_vm11, %v8421_v15  ;;  %vm944_vm11 = vcmp.eq.s32.totalorder %v6235_v52, %v5738_v1 }
  0xbc   :  { %4773 = vmatmul.mubr.msk.bf16.gmra.mxu1 %vm4772_vm14, %v8421_v15  ;;  %4837 = vmatpush1.bf16.xpose.msk.msra.mxu0 %vm4836_vm1, %v8421_v15  ;;  %vm240_vm14 = vcmp.eq.s32.totalorder %v6000_v32, %v6174_v45  ;;  %vm4840_vm3 = vmpackc.low %vm951_vm12, %vm944_vm11  ;;  %vm241_vm11 = vcmp.eq.s32.totalorder %v6230_v51, %v6174_v45  ;;  %vm248_vm12 = vcmp.eq.s32.totalorder %v6230_v51, %v6177_v46 }
  0xbd   :  { %5634 = vmatpush1.bf16.xpose.msk.msra.mxu1 %vm4836_vm1, %v8421_v15  ;;  %4647 = vmatprep.mubr.msk.bf16.mxu0 %vm4646_vm4, %v8421_v15  ;;  %vm242_vm1 = vcmp.eq.s32.totalorder %v6009_v33, %v6174_v45  ;;  %vm1155_vm4 = vcmp.eq.s32.totalorder %v6203_v48, %v5961_v27  ;;  %vm4650_vm6 = vmpackc.low %vm247_vm15, %vm240_vm14  ;;  %vm1161_vm14 = vcmp.eq.s32.totalorder %v6235_v52, %v5964_v28 }
  0xbe   :  { %4775 = vmatprep.mubr.msk.bf16.mxu1 %vm4774_vm5, %v8421_v15  ;;  %4839 = vmatprep.subr.msk.bf16.mxu0 %vm6510_vm8, %v8421_v15  ;;  %vm1162_vm5 = vcmp.eq.s32.totalorder %v6203_v48, %v5964_v28  ;;  %vm4778_vm7 = vmpackc.low %vm249_vm2, %vm242_vm1  ;;  %vm261_vm1 = vcmp.eq.s32.totalorder %v6000_v32, %v6151_v44 }
  0xbf   :  { %5619 = vmatprep.subr.msk.bf16.mxu1 %vm6510_vm8, %v8421_v15  ;;  %vm239_vm8 = vcmp.eq.s32.totalorder %v6221_v50, %v6174_v45  ;;  %vm6550_vm10 = vmpackc.low %vm1162_vm5, %vm1155_vm4  ;;  %vm263_vm4 = vcmp.eq.s32.totalorder %v6009_v33, %v6151_v44 }
  0xc0   :  { %vm4652_vm15 = vmpackc.low %vm246_vm9, %vm239_vm8 }
  0xc1   :  { %vm4780_vm2 = vmpackc.low %vm248_vm12, %vm241_vm11  ;;  %vm260_vm11 = vcmp.eq.s32.totalorder %v6221_v50, %v6151_v44 }
  0xc3   :  { %4649 = vmatmul.mubr.msk.bf16.gmra.mxu0 %vm4648_vm13, %v8421_v15  ;;  %vm1154_vm13 = vcmp.eq.s32.totalorder %v6235_v52, %v5961_v27 }
  0xc4   :  { %4777 = vmatmul.mubr.msk.bf16.gmra.mxu1 %vm4776_vm0, %v8421_v15  ;;  %4841 = vmatpush1.bf16.xpose.msk.msra.mxu0 %vm4840_vm3, %v8421_v15  ;;  %vm254_vm0 = vcmp.eq.s32.totalorder %v6000_v32, %v6148_v43  ;;  %vm4844_vm5 = vmpackc.low %vm1161_vm14, %vm1154_vm13  ;;  %vm255_vm13 = vcmp.eq.s32.totalorder %v6230_v51, %v6148_v43  ;;  %vm262_vm14 = vcmp.eq.s32.totalorder %v6230_v51, %v6151_v44 }
  0xc5   :  { %5635 = vmatpush1.bf16.xpose.msk.msra.mxu1 %vm4840_vm3, %v8421_v15  ;;  %4651 = vmatprep.mubr.msk.bf16.mxu0 %vm4650_vm6, %v8421_v15  ;;  %vm256_vm3 = vcmp.eq.s32.totalorder %v6009_v33, %v6148_v43  ;;  %vm1141_vm6 = vcmp.eq.s32.totalorder %v6203_v48, %v5992_v30  ;;  %vm4654_vm8 = vmpackc.low %vm261_vm1, %vm254_vm0  ;;  %vm1147_vm0 = vcmp.eq.s32.totalorder %v6235_v52, %v5995_v31 }
  0xc6   :  { %4779 = vmatprep.mubr.msk.bf16.mxu1 %vm4778_vm7, %v8421_v15  ;;  %4843 = vmatprep.subr.msk.bf16.mxu0 %vm6550_vm10, %v8421_v15  ;;  %vm1148_vm7 = vcmp.eq.s32.totalorder %v6203_v48, %v5995_v31  ;;  %vm4782_vm9 = vmpackc.low %vm263_vm4, %vm256_vm3  ;;  %vm275_vm3 = vcmp.eq.s32.totalorder %v6000_v32, %v6125_v42 }
  0xc7   :  { %5620 = vmatprep.subr.msk.bf16.mxu1 %vm6550_vm10, %v8421_v15  ;;  %vm253_vm10 = vcmp.eq.s32.totalorder %v6221_v50, %v6148_v43  ;;  %vm6590_vm12 = vmpackc.low %vm1148_vm7, %vm1141_vm6  ;;  %vm277_vm6 = vcmp.eq.s32.totalorder %v6009_v33, %v6125_v42 }
  0xc8   :  { %vm4656_vm1 = vmpackc.low %vm260_vm11, %vm253_vm10 }
  0xc9   :  { %vm4784_vm4 = vmpackc.low %vm262_vm14, %vm255_vm13  ;;  %vm274_vm13 = vcmp.eq.s32.totalorder %v6221_v50, %v6125_v42 }
  0xcb   :  { %4653 = vmatmul.mubr.msk.bf16.gmra.mxu0 %vm4652_vm15, %v8421_v15  ;;  %vm1140_vm15 = vcmp.eq.s32.totalorder %v6235_v52, %v5992_v30 }
  0xcc   :  { %4781 = vmatmul.mubr.msk.bf16.gmra.mxu1 %vm4780_vm2, %v8421_v15  ;;  %4845 = vmatpush2.bf16.xpose.msk.msra.mxu0 %vm4844_vm5, %v8421_v15  ;;  %vm268_vm2 = vcmp.eq.s32.totalorder %v6000_v32, %v6122_v41  ;;  %vm4848_vm7 = vmpackc.low %vm1147_vm0, %vm1140_vm15  ;;  %vm269_vm15 = vcmp.eq.s32.totalorder %v6230_v51, %v6122_v41  ;;  %vm276_vm0 = vcmp.eq.s32.totalorder %v6230_v51, %v6125_v42 }
  0xcd   :  { %5636 = vmatpush2.bf16.xpose.msk.msra.mxu1 %vm4844_vm5, %v8421_v15  ;;  %4655 = vmatprep.mubr.msk.bf16.mxu0 %vm4654_vm8, %v8421_v15  ;;  %vm270_vm5 = vcmp.eq.s32.totalorder %v6009_v33, %v6122_v41  ;;  %vm1127_vm8 = vcmp.eq.s32.totalorder %v6203_v48, %v6041_v35  ;;  %vm4658_vm10 = vmpackc.low %vm275_vm3, %vm268_vm2  ;;  %vm1133_vm2 = vcmp.eq.s32.totalorder %v6235_v52, %v6044_v36 }
  0xce   :  { %4783 = vmatprep.mubr.msk.bf16.mxu1 %vm4782_vm9, %v8421_v15  ;;  %4847 = vmatprep.subr.msk.bf16.mxu0 %vm6590_vm12, %v8421_v15  ;;  %vm1134_vm9 = vcmp.eq.s32.totalorder %v6203_v48, %v6044_v36  ;;  %vm4786_vm11 = vmpackc.low %vm277_vm6, %vm270_vm5  ;;  %vm289_vm5 = vcmp.eq.s32.totalorder %v6000_v32, %v6099_v40 }
  0xcf   :  { %5621 = vmatprep.subr.msk.bf16.mxu1 %vm6590_vm12, %v8421_v15  ;;  %vm267_vm12 = vcmp.eq.s32.totalorder %v6221_v50, %v6122_v41  ;;  %vm6630_vm14 = vmpackc.low %vm1134_vm9, %vm1127_vm8  ;;  %vm291_vm8 = vcmp.eq.s32.totalorder %v6009_v33, %v6099_v40 }
  0xd0   :  { %vm4660_vm3 = vmpackc.low %vm274_vm13, %vm267_vm12 }
  0xd1   :  { %vm4788_vm6 = vmpackc.low %vm276_vm0, %vm269_vm15  ;;  %vm288_vm15 = vcmp.eq.s32.totalorder %v6221_v50, %v6099_v40 }
  0xd3   :  { %4657 = vmatmul.mubr.msk.bf16.gmra.mxu0 %vm4656_vm1, %v8421_v15  ;;  %vm1126_vm1 = vcmp.eq.s32.totalorder %v6235_v52, %v6041_v35 }
  0xd4   :  { %4785 = vmatmul.mubr.msk.bf16.gmra.mxu1 %vm4784_vm4, %v8421_v15  ;;  %4849 = vmatpush2.bf16.xpose.msk.msra.mxu0 %vm4848_vm7, %v8421_v15  ;;  %vm282_vm4 = vcmp.eq.s32.totalorder %v6000_v32, %v6096_v39  ;;  %vm4852_vm9 = vmpackc.low %vm1133_vm2, %vm1126_vm1  ;;  %vm283_vm1 = vcmp.eq.s32.totalorder %v6230_v51, %v6096_v39  ;;  %vm290_vm2 = vcmp.eq.s32.totalorder %v6230_v51, %v6099_v40 }
  0xd5   :  { %5637 = vmatpush2.bf16.xpose.msk.msra.mxu1 %vm4848_vm7, %v8421_v15  ;;  %4659 = vmatprep.mubr.msk.bf16.mxu0 %vm4658_vm10, %v8421_v15  ;;  %vm284_vm7 = vcmp.eq.s32.totalorder %v6009_v33, %v6096_v39  ;;  %vm1113_vm10 = vcmp.eq.s32.totalorder %v6203_v48, %v6070_v37  ;;  %vm4662_vm12 = vmpackc.low %vm289_vm5, %vm282_vm4  ;;  %vm1119_vm4 = vcmp.eq.s32.totalorder %v6235_v52, %v6073_v38 }
  0xd6   :  { %4787 = vmatprep.mubr.msk.bf16.mxu1 %vm4786_vm11, %v8421_v15  ;;  %4851 = vmatprep.subr.msk.bf16.mxu0 %vm6630_vm14, %v8421_v15  ;;  %vm1120_vm11 = vcmp.eq.s32.totalorder %v6203_v48, %v6073_v38  ;;  %vm4790_vm13 = vmpackc.low %vm291_vm8, %vm284_vm7  ;;  %vm303_vm7 = vcmp.eq.s32.totalorder %v6000_v32, %v6073_v38 }
  0xd7   :  { %5622 = vmatprep.subr.msk.bf16.mxu1 %vm6630_vm14, %v8421_v15  ;;  %vm281_vm14 = vcmp.eq.s32.totalorder %v6221_v50, %v6096_v39  ;;  %vm6670_vm0 = vmpackc.low %vm1120_vm11, %vm1113_vm10  ;;  %vm305_vm10 = vcmp.eq.s32.totalorder %v6009_v33, %v6073_v38 }
  0xd8   :  { %vm4664_vm5 = vmpackc.low %vm288_vm15, %vm281_vm14 }
  0xd9   :  { %vm4792_vm8 = vmpackc.low %vm290_vm2, %vm283_vm1  ;;  %vm302_vm1 = vcmp.eq.s32.totalorder %v6221_v50, %v6073_v38 }
  0xdb   :  { %4661 = vmatmul.mubr.msk.bf16.gmra.mxu0 %vm4660_vm3, %v8421_v15  ;;  %vm1112_vm3 = vcmp.eq.s32.totalorder %v6235_v52, %v6070_v37 }
  0xdc   :  { %4789 = vmatmul.mubr.msk.bf16.gmra.mxu1 %vm4788_vm6, %v8421_v15  ;;  %4853 = vmatpush2.bf16.xpose.msk.msra.mxu0 %vm4852_vm9, %v8421_v15  ;;  %vm296_vm6 = vcmp.eq.s32.totalorder %v6000_v32, %v6070_v37  ;;  %vm4856_vm11 = vmpackc.low %vm1119_vm4, %vm1112_vm3  ;;  %vm297_vm3 = vcmp.eq.s32.totalorder %v6230_v51, %v6070_v37  ;;  %vm304_vm4 = vcmp.eq.s32.totalorder %v6230_v51, %v6073_v38 }
  0xdd   :  { %5638 = vmatpush2.bf16.xpose.msk.msra.mxu1 %vm4852_vm9, %v8421_v15  ;;  %4663 = vmatprep.mubr.msk.bf16.mxu0 %vm4662_vm12, %v8421_v15  ;;  %vm298_vm9 = vcmp.eq.s32.totalorder %v6009_v33, %v6070_v37  ;;  %vm1099_vm12 = vcmp.eq.s32.totalorder %v6203_v48, %v6096_v39  ;;  %vm4666_vm14 = vmpackc.low %vm303_vm7, %vm296_vm6  ;;  %vm1105_vm6 = vcmp.eq.s32.totalorder %v6235_v52, %v6099_v40 }
  0xde   :  { %4791 = vmatprep.mubr.msk.bf16.mxu1 %vm4790_vm13, %v8421_v15  ;;  %4855 = vmatprep.subr.msk.bf16.mxu0 %vm6670_vm0, %v8421_v15  ;;  %vm1106_vm13 = vcmp.eq.s32.totalorder %v6203_v48, %v6099_v40  ;;  %vm4794_vm15 = vmpackc.low %vm305_vm10, %vm298_vm9  ;;  %vm317_vm9 = vcmp.eq.s32.totalorder %v6000_v32, %v6044_v36 }
  0xdf   :  { %5623 = vmatprep.subr.msk.bf16.mxu1 %vm6670_vm0, %v8421_v15  ;;  %vm295_vm0 = vcmp.eq.s32.totalorder %v6221_v50, %v6070_v37  ;;  %vm6710_vm2 = vmpackc.low %vm1106_vm13, %vm1099_vm12  ;;  %vm319_vm12 = vcmp.eq.s32.totalorder %v6009_v33, %v6044_v36 }
  0xe0   :  { %vm4668_vm7 = vmpackc.low %vm302_vm1, %vm295_vm0 }
  0xe1   :  { %vm4796_vm10 = vmpackc.low %vm304_vm4, %vm297_vm3  ;;  %vm316_vm3 = vcmp.eq.s32.totalorder %v6221_v50, %v6044_v36 }
  0xe3   :  { %4665 = vmatmul.mubr.msk.bf16.gmra.mxu0 %vm4664_vm5, %v8421_v15  ;;  %vm1098_vm5 = vcmp.eq.s32.totalorder %v6235_v52, %v6096_v39 }
  0xe4   :  { %4793 = vmatmul.mubr.msk.bf16.gmra.mxu1 %vm4792_vm8, %v8421_v15  ;;  %4857 = vmatpush2.bf16.xpose.msk.msra.mxu0 %vm4856_vm11, %v8421_v15  ;;  %vm310_vm8 = vcmp.eq.s32.totalorder %v6000_v32, %v6041_v35  ;;  %vm4860_vm13 = vmpackc.low %vm1105_vm6, %vm1098_vm5  ;;  %vm311_vm5 = vcmp.eq.s32.totalorder %v6230_v51, %v6041_v35  ;;  %vm318_vm6 = vcmp.eq.s32.totalorder %v6230_v51, %v6044_v36 }
  0xe5   :  { %5639 = vmatpush2.bf16.xpose.msk.msra.mxu1 %vm4856_vm11, %v8421_v15  ;;  %4667 = vmatprep.mubr.msk.bf16.mxu0 %vm4666_vm14, %v8421_v15  ;;  %vm312_vm11 = vcmp.eq.s32.totalorder %v6009_v33, %v6041_v35  ;;  %vm1085_vm14 = vcmp.eq.s32.totalorder %v6203_v48, %v6122_v41  ;;  %vm4670_vm0 = vmpackc.low %vm317_vm9, %vm310_vm8  ;;  %vm1091_vm8 = vcmp.eq.s32.totalorder %v6235_v52, %v6125_v42 }
  0xe6   :  { %4795 = vmatprep.mubr.msk.bf16.mxu1 %vm4794_vm15, %v8421_v15  ;;  %4859 = vmatprep.subr.msk.bf16.mxu0 %vm6710_vm2, %v8421_v15  ;;  %vm1092_vm15 = vcmp.eq.s32.totalorder %v6203_v48, %v6125_v42  ;;  %vm4798_vm1 = vmpackc.low %vm319_vm12, %vm312_vm11  ;;  %vm331_vm11 = vcmp.eq.s32.totalorder %v6000_v32, %v5995_v31 }
  0xe7   :  { %5624 = vmatprep.subr.msk.bf16.mxu1 %vm6710_vm2, %v8421_v15  ;;  %vm309_vm2 = vcmp.eq.s32.totalorder %v6221_v50, %v6041_v35  ;;  %vm6750_vm4 = vmpackc.low %vm1092_vm15, %vm1085_vm14  ;;  %vm333_vm14 = vcmp.eq.s32.totalorder %v6009_v33, %v5995_v31 }
  0xe8   :  { %vm4672_vm9 = vmpackc.low %vm316_vm3, %vm309_vm2 }
  0xe9   :  { %vm4800_vm12 = vmpackc.low %vm318_vm6, %vm311_vm5  ;;  %vm330_vm5 = vcmp.eq.s32.totalorder %v6221_v50, %v5995_v31 }
  0xeb   :  { %4669 = vmatmul.mubr.msk.bf16.gmra.mxu0 %vm4668_vm7, %v8421_v15  ;;  %vm1084_vm7 = vcmp.eq.s32.totalorder %v6235_v52, %v6122_v41 }
  0xec   :  { %4797 = vmatmul.mubr.msk.bf16.gmra.mxu1 %vm4796_vm10, %v8421_v15  ;;  %4861 = vmatpush2.bf16.xpose.msk.msra.mxu0 %vm4860_vm13, %v8421_v15  ;;  %vm324_vm10 = vcmp.eq.s32.totalorder %v6000_v32, %v5992_v30  ;;  %vm4864_vm15 = vmpackc.low %vm1091_vm8, %vm1084_vm7  ;;  %vm325_vm7 = vcmp.eq.s32.totalorder %v6230_v51, %v5992_v30  ;;  %vm332_vm8 = vcmp.eq.s32.totalorder %v6230_v51, %v5995_v31 }
  0xed   :  { %5640 = vmatpush2.bf16.xpose.msk.msra.mxu1 %vm4860_vm13, %v8421_v15  ;;  %4671 = vmatprep.mubr.msk.bf16.mxu0 %vm4670_vm0, %v8421_v15  ;;  %vm326_vm13 = vcmp.eq.s32.totalorder %v6009_v33, %v5992_v30  ;;  %vm1071_vm0 = vcmp.eq.s32.totalorder %v6203_v48, %v6148_v43  ;;  %vm4674_vm2 = vmpackc.low %vm331_vm11, %vm324_vm10  ;;  %vm1077_vm10 = vcmp.eq.s32.totalorder %v6235_v52, %v6151_v44 }
  0xee   :  { %4799 = vmatprep.mubr.msk.bf16.mxu1 %vm4798_vm1, %v8421_v15  ;;  %4863 = vmatprep.subr.msk.bf16.mxu0 %vm6750_vm4, %v8421_v15  ;;  %vm1078_vm1 = vcmp.eq.s32.totalorder %v6203_v48, %v6151_v44  ;;  %vm4802_vm3 = vmpackc.low %vm333_vm14, %vm326_vm13  ;;  %vm345_vm13 = vcmp.eq.s32.totalorder %v6000_v32, %v5964_v28 }
  0xef   :  { %5625 = vmatprep.subr.msk.bf16.mxu1 %vm6750_vm4, %v8421_v15  ;;  %vm323_vm4 = vcmp.eq.s32.totalorder %v6221_v50, %v5992_v30  ;;  %vm6790_vm6 = vmpackc.low %vm1078_vm1, %vm1071_vm0  ;;  %vm347_vm0 = vcmp.eq.s32.totalorder %v6009_v33, %v5964_v28 }
  0xf0   :  { %vm6807_vm11 = vmpackc.low %vm330_vm5, %vm323_vm4 }
  0xf1   :  { %vm6818_vm14 = vmpackc.low %vm332_vm8, %vm325_vm7  ;;  %vm344_vm7 = vcmp.eq.s32.totalorder %v6221_v50, %v5964_v28 }
  0xf3   :  { %4673 = vmatmul.mubr.msk.bf16.gmra.mxu0 %vm4672_vm9, %v8421_v15  ;;  %vm1070_vm9 = vcmp.eq.s32.totalorder %v6235_v52, %v6148_v43 }
  0xf4   :  { %4801 = vmatmul.mubr.msk.bf16.gmra.mxu1 %vm4800_vm12, %v8421_v15  ;;  %4865 = vmatpush2.bf16.xpose.msk.msra.mxu0 %vm4864_vm15, %v8421_v15  ;;  %vm338_vm12 = vcmp.eq.s32.totalorder %v6000_v32, %v5961_v27  ;;  %vm6829_vm1 = vmpackc.low %vm1077_vm10, %vm1070_vm9  ;;  %vm339_vm9 = vcmp.eq.s32.totalorder %v6230_v51, %v5961_v27  ;;  %vm346_vm10 = vcmp.eq.s32.totalorder %v6230_v51, %v5964_v28  ;;  %v5686_v32 = vld [vmem:[%s8411_s1] sm:$0xff] }
  0xf5   :  { %5641 = vmatpush2.bf16.xpose.msk.msra.mxu1 %vm4864_vm15, %v8421_v15  ;;  %4675 = vmatprep.mubr.msk.bf16.mxu0 %vm4674_vm2, %v8421_v15  ;;  %vm340_vm15 = vcmp.eq.s32.totalorder %v6009_v33, %v5961_v27  ;;  %vm1057_vm2 = vcmp.eq.s32.totalorder %v6203_v48, %v6174_v45  ;;  %vm4678_vm4 = vmpackc.low %vm345_vm13, %vm338_vm12  ;;  %v6878_v33 = vrot.slane %v5686_v32, %v125_v9 }
  0xf6   :  { %4803 = vmatprep.mubr.msk.bf16.mxu1 %vm4802_vm3, %v8421_v15  ;;  %4867 = vmatprep.subr.msk.bf16.mxu0 %vm6790_vm6, %v8421_v15  ;;  %vm1064_vm3 = vcmp.eq.s32.totalorder %v6203_v48, %v6177_v46  ;;  %vm6838_vm5 = vmpackc.low %vm347_vm0, %vm340_vm15  ;;  %vm1063_vm12 = vcmp.eq.s32.totalorder %v6235_v52, %v6177_v46  ;;  %vm139_vm15 = vcmp.eq.s32.totalorder %v6850_v14, %v5938_v26 }
  0xf7   :  { %5626 = vmatprep.subr.msk.bf16.mxu1 %vm6790_vm6, %v8421_v15  ;;  %vm337_vm6 = vcmp.eq.s32.totalorder %v6221_v50, %v5961_v27  ;;  %vm6859_vm8 = vmpackc.low %vm1064_vm3, %vm1057_vm2  ;;  %vm251_vm2 = vcmp.eq.s32.totalorder %v6850_v14, %v6177_v46 }
  0xf8   :  { %vm4680_vm13 = vmpackc.low %vm344_vm7, %vm337_vm6 }
  0xf9   :  { %vm4808_vm0 = vmpackc.low %vm346_vm10, %vm339_vm9  ;;  %vm138_vm9 = vcmp.eq.s32.totalorder %v6908_v34, %v5938_v26 }
  0xfb   :  { %4677 = vmatmul.mubr.msk.bf16.gmra.mxu0 %vm6807_vm11, %v8421_v15  ;;  %vm1056_vm11 = vcmp.eq.s32.totalorder %v6235_v52, %v6174_v45 }
  0xfc   :  { %4805 = vmatmul.mubr.msk.bf16.gmra.mxu1 %vm6818_vm14, %v8421_v15  ;;  %4869 = vmatpush2.bf16.xpose.msk.msra.mxu0 %vm6829_vm1, %v8421_v15  ;;  %vm132_vm14 = vcmp.eq.s32.totalorder %v6850_v14, %v5738_v1  ;;  %vm4872_vm3 = vmpackc.low %vm1063_vm12, %vm1056_vm11  ;;  %vm243_vm11 = vcmp.eq.s32.totalorder %v6908_v34, %v6174_v45  ;;  %vm250_vm12 = vcmp.eq.s32.totalorder %v6908_v34, %v6177_v46 }
  0xfd   :  { %5642 = vmatpush2.bf16.xpose.msk.msra.mxu1 %vm6829_vm1, %v8421_v15  ;;  %4679 = vmatprep.mubr.msk.bf16.mxu0 %vm4678_vm4, %v8421_v15  ;;  %vm244_vm1 = vcmp.eq.s32.totalorder %v6850_v14, %v6174_v45  ;;  %vm1156_vm4 = vcmp.eq.s32.totalorder %v6878_v33, %v5961_v27  ;;  %vm4874_vm6 = vmpackc.low %vm139_vm15, %vm132_vm14  ;;  %vm1051_vm14 = vcmp.eq.s32.totalorder %v6878_v33, %v5749_v4 }
  0xfe   :  { %4807 = vmatprep.mubr.msk.bf16.mxu1 %vm6838_vm5, %v8421_v15  ;;  %4871 = vmatprep.subr.msk.bf16.mxu0 %vm6859_vm8, %v8421_v15  ;;  %vm1163_vm5 = vcmp.eq.s32.totalorder %v6878_v33, %v5964_v28  ;;  %vm4906_vm7 = vmpackc.low %vm251_vm2, %vm244_vm1  ;;  %vm153_vm1 = vcmp.eq.s32.totalorder %v6850_v14, %v5915_v25 }
  0xff   :  { %5627 = vmatprep.subr.msk.bf16.mxu1 %vm6859_vm8, %v8421_v15  ;;  %vm131_vm8 = vcmp.eq.s32.totalorder %v6908_v34, %v5738_v1  ;;  %vm4954_vm10 = vmpackc.low %vm1163_vm5, %vm1156_vm4  ;;  %vm265_vm4 = vcmp.eq.s32.totalorder %v6850_v14, %v6151_v44 }
 0x100   :  { %vm4876_vm15 = vmpackc.low %vm138_vm9, %vm131_vm8 }
 0x101   :  { %vm4908_vm2 = vmpackc.low %vm250_vm12, %vm243_vm11  ;;  %vm152_vm11 = vcmp.eq.s32.totalorder %v6908_v34, %v5915_v25 }
 0x103   :  { %4681 = vmatmul.mubr.msk.bf16.gmra.mxu0 %vm4680_vm13, %v8421_v15  ;;  %vm1044_vm13 = vcmp.eq.s32.totalorder %v6878_v33, %v5746_v3 }
 0x104   :  { %4809 = vmatmul.mubr.msk.bf16.gmra.mxu1 %vm4808_vm0, %v8421_v15  ;;  %4873 = vmatpush2.bf16.xpose.msk.msra.mxu0 %vm4872_vm3, %v8421_v15  ;;  %vm146_vm0 = vcmp.eq.s32.totalorder %v6850_v14, %v5912_v24  ;;  %vm4938_vm5 = vmpackc.low %vm1051_vm14, %vm1044_vm13  ;;  %vm257_vm13 = vcmp.eq.s32.totalorder %v6908_v34, %v6148_v43  ;;  %vm264_vm14 = vcmp.eq.s32.totalorder %v6908_v34, %v6151_v44 }
 0x105   :  { %5643 = vmatpush2.bf16.xpose.msk.msra.mxu1 %vm4872_vm3, %v8421_v15  ;;  %4875 = vmatprep.mubr.msk.bf16.mxu0 %vm4874_vm6, %v8421_v15  ;;  %vm258_vm3 = vcmp.eq.s32.totalorder %v6850_v14, %v6148_v43  ;;  %vm1142_vm6 = vcmp.eq.s32.totalorder %v6878_v33, %v5992_v30  ;;  %vm4878_vm8 = vmpackc.low %vm153_vm1, %vm146_vm0  ;;  %vm1037_vm0 = vcmp.eq.s32.totalorder %v6878_v33, %v5769_v12 }
 0x106   :  { %4907 = vmatprep.mubr.msk.bf16.mxu1 %vm4906_vm7, %v8421_v15  ;;  %5076 = vmatprep.subr.msk.bf16.mxu1 %vm4954_vm10, %v8421_v15  ;;  %vm1149_vm7 = vcmp.eq.s32.totalorder %v6878_v33, %v5995_v31  ;;  %vm4910_vm9 = vmpackc.low %vm265_vm4, %vm258_vm3  ;;  %vm145_vm10 = vcmp.eq.s32.totalorder %v6908_v34, %v5912_v24  ;;  %vm167_vm3 = vcmp.eq.s32.totalorder %v6850_v14, %v5889_v23 }
 0x107   :  { %vm4956_vm12 = vmpackc.low %vm1149_vm7, %vm1142_vm6  ;;  %vm279_vm6 = vcmp.eq.s32.totalorder %v6850_v14, %v6125_v42 }
 0x108   :  { %vm4880_vm1 = vmpackc.low %vm152_vm11, %vm145_vm10 }
 0x109   :  { %vm4912_vm4 = vmpackc.low %vm264_vm14, %vm257_vm13  ;;  %vm166_vm13 = vcmp.eq.s32.totalorder %v6908_v34, %v5889_v23 }
 0x10b   :  { %4877 = vmatmul.mubr.msk.bf16.vlgmr.msra.gmra.mxu0 %vm4876_vm15, %v8421_v15  ;;  %vm1030_vm15 = vcmp.eq.s32.totalorder %v6878_v33, %v5766_v11 }
 0x10c   :  { %4909 = vmatmul.mubr.msk.bf16.vlgmr.msra.gmra.mxu1 %vm4908_vm2, %v8421_v15  ;;  %4879 = vmatprep.mubr.msk.bf16.mxu0 %vm4878_vm8, %v8421_v15  ;;  %vm160_vm2 = vcmp.eq.s32.totalorder %v6850_v14, %v5886_v22  ;;  %vm4940_vm7 = vmpackc.low %vm1037_vm0, %vm1030_vm15  ;;  %vm1128_vm8 = vcmp.eq.s32.totalorder %v6878_v33, %v6041_v35  ;;  %vm271_vm15 = vcmp.eq.s32.totalorder %v6908_v34, %v6122_v41 }
 0x10d   :  { %5077 = vmatpush3.bf16.xpose.msk.msra.mxu1 %vm4938_vm5, %v8421_v15  ;;  %4911 = vmatprep.mubr.msk.bf16.mxu1 %vm4910_vm9, %v8421_v15  ;;  %vm272_vm5 = vcmp.eq.s32.totalorder %v6850_v14, %v6122_v41  ;;  %vm1135_vm9 = vcmp.eq.s32.totalorder %v6878_v33, %v6044_v36  ;;  %vm4882_vm10 = vmpackc.low %vm167_vm3, %vm160_vm2  ;;  %vm278_vm0 = vcmp.eq.s32.totalorder %v6908_v34, %v6125_v42 }
 0x10e   :  { %5078 = vmatprep.subr.msk.bf16.mxu1 %vm4956_vm12, %v8421_v15  ;;  %vm4914_vm11 = vmpackc.low %vm279_vm6, %vm272_vm5  ;;  %vm159_vm12 = vcmp.eq.s32.totalorder %v6908_v34, %v5886_v22  ;;  %vm1023_vm2 = vcmp.eq.s32.totalorder %v6878_v33, %v5811_v17  ;;  %vm181_vm5 = vcmp.eq.s32.totalorder %v6850_v14, %v5863_v21 }
 0x10f   :  { %vm4958_vm14 = vmpackc.low %vm1135_vm9, %vm1128_vm8  ;;  %vm293_vm8 = vcmp.eq.s32.totalorder %v6850_v14, %v6099_v40 }
 0x110   :  { %vm4884_vm3 = vmpackc.low %vm166_vm13, %vm159_vm12 }
 0x111   :  { %vm4916_vm6 = vmpackc.low %vm278_vm0, %vm271_vm15  ;;  %vm180_vm15 = vcmp.eq.s32.totalorder %v6908_v34, %v5863_v21 }
 0x113   :  { %4881 = vmatmul.mubr.msk.bf16.gmra.mxu0 %vm4880_vm1, %v8421_v15  ;;  %vm1016_vm1 = vcmp.eq.s32.totalorder %v6878_v33, %v5808_v16 }
 0x114   :  { %4913 = vmatmul.mubr.msk.bf16.gmra.mxu1 %vm4912_vm4, %v8421_v15  ;;  %4883 = vmatprep.mubr.msk.bf16.mxu0 %vm4882_vm10, %v8421_v15  ;;  %vm174_vm4 = vcmp.eq.s32.totalorder %v6850_v14, %v5860_v20  ;;  %vm4942_vm9 = vmpackc.low %vm1023_vm2, %vm1016_vm1  ;;  %vm1114_vm10 = vcmp.eq.s32.totalorder %v6878_v33, %v6070_v37  ;;  %vm285_vm1 = vcmp.eq.s32.totalorder %v6908_v34, %v6096_v39 }
 0x115   :  { %5079 = vmatpush3.bf16.xpose.msk.msra.mxu1 %vm4940_vm7, %v8421_v15  ;;  %4915 = vmatprep.mubr.msk.bf16.mxu1 %vm4914_vm11, %v8421_v15  ;;  %vm286_vm7 = vcmp.eq.s32.totalorder %v6850_v14, %v6096_v39  ;;  %vm1121_vm11 = vcmp.eq.s32.totalorder %v6878_v33, %v6073_v38  ;;  %vm4886_vm12 = vmpackc.low %vm181_vm5, %vm174_vm4  ;;  %vm292_vm2 = vcmp.eq.s32.totalorder %v6908_v34, %v6099_v40 }
 0x116   :  { %5080 = vmatprep.subr.msk.bf16.mxu1 %vm4958_vm14, %v8421_v15  ;;  %vm4918_vm13 = vmpackc.low %vm293_vm8, %vm286_vm7  ;;  %vm173_vm14 = vcmp.eq.s32.totalorder %v6908_v34, %v5860_v20  ;;  %vm1009_vm4 = vcmp.eq.s32.totalorder %v6878_v33, %v5837_v19  ;;  %vm195_vm7 = vcmp.eq.s32.totalorder %v6850_v14, %v5837_v19 }
 0x117   :  { %vm4960_vm0 = vmpackc.low %vm1121_vm11, %vm1114_vm10  ;;  %vm307_vm10 = vcmp.eq.s32.totalorder %v6850_v14, %v6073_v38 }
 0x118   :  { %vm4888_vm5 = vmpackc.low %vm180_vm15, %vm173_vm14 }
 0x119   :  { %vm4920_vm8 = vmpackc.low %vm292_vm2, %vm285_vm1  ;;  %vm194_vm1 = vcmp.eq.s32.totalorder %v6908_v34, %v5837_v19 }
 0x11b   :  { %4885 = vmatmul.mubr.msk.bf16.gmra.mxu0 %vm4884_vm3, %v8421_v15  ;;  %vm1002_vm3 = vcmp.eq.s32.totalorder %v6878_v33, %v5834_v18 }
 0x11c   :  { %4917 = vmatmul.mubr.msk.bf16.gmra.mxu1 %vm4916_vm6, %v8421_v15  ;;  %4887 = vmatprep.mubr.msk.bf16.mxu0 %vm4886_vm12, %v8421_v15  ;;  %vm188_vm6 = vcmp.eq.s32.totalorder %v6850_v14, %v5834_v18  ;;  %vm4944_vm11 = vmpackc.low %vm1009_vm4, %vm1002_vm3  ;;  %vm1100_vm12 = vcmp.eq.s32.totalorder %v6878_v33, %v6096_v39  ;;  %vm299_vm3 = vcmp.eq.s32.totalorder %v6908_v34, %v6070_v37 }
 0x11d   :  { %5081 = vmatpush3.bf16.xpose.msk.msra.mxu1 %vm4942_vm9, %v8421_v15  ;;  %4919 = vmatprep.mubr.msk.bf16.mxu1 %vm4918_vm13, %v8421_v15  ;;  %vm300_vm9 = vcmp.eq.s32.totalorder %v6850_v14, %v6070_v37  ;;  %vm1107_vm13 = vcmp.eq.s32.totalorder %v6878_v33, %v6099_v40  ;;  %vm4890_vm14 = vmpackc.low %vm195_vm7, %vm188_vm6  ;;  %vm306_vm4 = vcmp.eq.s32.totalorder %v6908_v34, %v6073_v38 }
 0x11e   :  { %5082 = vmatprep.subr.msk.bf16.mxu1 %vm4960_vm0, %v8421_v15  ;;  %vm4922_vm15 = vmpackc.low %vm307_vm10, %vm300_vm9  ;;  %vm187_vm0 = vcmp.eq.s32.totalorder %v6908_v34, %v5834_v18  ;;  %vm995_vm6 = vcmp.eq.s32.totalorder %v6878_v33, %v5863_v21  ;;  %vm209_vm9 = vcmp.eq.s32.totalorder %v6850_v14, %v5811_v17 }
 0x11f   :  { %vm4962_vm2 = vmpackc.low %vm1107_vm13, %vm1100_vm12  ;;  %vm321_vm12 = vcmp.eq.s32.totalorder %v6850_v14, %v6044_v36 }
 0x120   :  { %vm4892_vm7 = vmpackc.low %vm194_vm1, %vm187_vm0 }
 0x121   :  { %vm4924_vm10 = vmpackc.low %vm306_vm4, %vm299_vm3  ;;  %vm208_vm3 = vcmp.eq.s32.totalorder %v6908_v34, %v5811_v17 }
 0x123   :  { %4889 = vmatmul.mubr.msk.bf16.gmra.mxu0 %vm4888_vm5, %v8421_v15  ;;  %vm988_vm5 = vcmp.eq.s32.totalorder %v6878_v33, %v5860_v20 }
 0x124   :  { %4921 = vmatmul.mubr.msk.bf16.gmra.mxu1 %vm4920_vm8, %v8421_v15  ;;  %4891 = vmatprep.mubr.msk.bf16.mxu0 %vm4890_vm14, %v8421_v15  ;;  %vm202_vm8 = vcmp.eq.s32.totalorder %v6850_v14, %v5808_v16  ;;  %vm4946_vm13 = vmpackc.low %vm995_vm6, %vm988_vm5  ;;  %vm1086_vm14 = vcmp.eq.s32.totalorder %v6878_v33, %v6122_v41  ;;  %vm313_vm5 = vcmp.eq.s32.totalorder %v6908_v34, %v6041_v35 }
 0x125   :  { %5083 = vmatpush3.bf16.xpose.msk.msra.mxu1 %vm4944_vm11, %v8421_v15  ;;  %4923 = vmatprep.mubr.msk.bf16.mxu1 %vm4922_vm15, %v8421_v15  ;;  %vm314_vm11 = vcmp.eq.s32.totalorder %v6850_v14, %v6041_v35  ;;  %vm1093_vm15 = vcmp.eq.s32.totalorder %v6878_v33, %v6125_v42  ;;  %vm4894_vm0 = vmpackc.low %vm209_vm9, %vm202_vm8  ;;  %vm320_vm6 = vcmp.eq.s32.totalorder %v6908_v34, %v6044_v36 }
 0x126   :  { %5084 = vmatprep.subr.msk.bf16.mxu1 %vm4962_vm2, %v8421_v15  ;;  %vm4926_vm1 = vmpackc.low %vm321_vm12, %vm314_vm11  ;;  %vm201_vm2 = vcmp.eq.s32.totalorder %v6908_v34, %v5808_v16  ;;  %vm981_vm8 = vcmp.eq.s32.totalorder %v6878_v33, %v5889_v23  ;;  %vm223_vm11 = vcmp.eq.s32.totalorder %v6850_v14, %v5769_v12 }
 0x127   :  { %vm4964_vm4 = vmpackc.low %vm1093_vm15, %vm1086_vm14  ;;  %vm335_vm14 = vcmp.eq.s32.totalorder %v6850_v14, %v5995_v31 }
 0x128   :  { %vm4896_vm9 = vmpackc.low %vm208_vm3, %vm201_vm2 }
 0x129   :  { %vm4928_vm12 = vmpackc.low %vm320_vm6, %vm313_vm5  ;;  %vm222_vm5 = vcmp.eq.s32.totalorder %v6908_v34, %v5769_v12 }
 0x12b   :  { %4893 = vmatmul.mubr.msk.bf16.gmra.mxu0 %vm4892_vm7, %v8421_v15  ;;  %vm974_vm7 = vcmp.eq.s32.totalorder %v6878_v33, %v5886_v22 }
 0x12c   :  { %4925 = vmatmul.mubr.msk.bf16.gmra.mxu1 %vm4924_vm10, %v8421_v15  ;;  %4895 = vmatprep.mubr.msk.bf16.mxu0 %vm4894_vm0, %v8421_v15  ;;  %vm216_vm10 = vcmp.eq.s32.totalorder %v6850_v14, %v5766_v11  ;;  %vm4948_vm15 = vmpackc.low %vm981_vm8, %vm974_vm7  ;;  %vm1072_vm0 = vcmp.eq.s32.totalorder %v6878_v33, %v6148_v43  ;;  %vm327_vm7 = vcmp.eq.s32.totalorder %v6908_v34, %v5992_v30 }
 0x12d   :  { %5085 = vmatpush3.bf16.xpose.msk.msra.mxu1 %vm4946_vm13, %v8421_v15  ;;  %4927 = vmatprep.mubr.msk.bf16.mxu1 %vm4926_vm1, %v8421_v15  ;;  %vm328_vm13 = vcmp.eq.s32.totalorder %v6850_v14, %v5992_v30  ;;  %vm1079_vm1 = vcmp.eq.s32.totalorder %v6878_v33, %v6151_v44  ;;  %vm4898_vm2 = vmpackc.low %vm223_vm11, %vm216_vm10  ;;  %vm334_vm8 = vcmp.eq.s32.totalorder %v6908_v34, %v5995_v31 }
 0x12e   :  { %5086 = vmatprep.subr.msk.bf16.mxu1 %vm4964_vm4, %v8421_v15  ;;  %vm4930_vm3 = vmpackc.low %vm335_vm14, %vm328_vm13  ;;  %vm215_vm4 = vcmp.eq.s32.totalorder %v6908_v34, %v5766_v11  ;;  %vm967_vm10 = vcmp.eq.s32.totalorder %v6878_v33, %v5915_v25  ;;  %vm237_vm13 = vcmp.eq.s32.totalorder %v6850_v14, %v5749_v4 }
 0x12f   :  { %vm4966_vm6 = vmpackc.low %vm1079_vm1, %vm1072_vm0  ;;  %vm349_vm0 = vcmp.eq.s32.totalorder %v6850_v14, %v5964_v28 }
 0x130   :  { %vm4900_vm11 = vmpackc.low %vm222_vm5, %vm215_vm4 }
 0x131   :  { %vm4932_vm14 = vmpackc.low %vm334_vm8, %vm327_vm7  ;;  %vm229_vm7 = vcmp.eq.s32.totalorder %v6908_v34, %v5746_v3  ;;  %vm236_vm8 = vcmp.eq.s32.totalorder %v6908_v34, %v5749_v4 }
 0x133   :  { %4897 = vmatmul.mubr.msk.bf16.gmra.mxu0 %vm4896_vm9, %v8421_v15  ;;  %vm960_vm9 = vcmp.eq.s32.totalorder %v6878_v33, %v5912_v24 }
 0x134   :  { %4929 = vmatmul.mubr.msk.bf16.gmra.mxu1 %vm4928_vm12, %v8421_v15  ;;  %4899 = vmatprep.mubr.msk.bf16.mxu0 %vm4898_vm2, %v8421_v15  ;;  %vm230_vm12 = vcmp.eq.s32.totalorder %v6850_v14, %v5746_v3  ;;  %vm4950_vm1 = vmpackc.low %vm967_vm10, %vm960_vm9  ;;  %vm1058_vm2 = vcmp.eq.s32.totalorder %v6878_v33, %v6174_v45  ;;  %vm341_vm9 = vcmp.eq.s32.totalorder %v6908_v34, %v5961_v27 }
 0x135   :  { %5087 = vmatpush3.bf16.xpose.msk.msra.mxu1 %vm4948_vm15, %v8421_v15  ;;  %4931 = vmatprep.mubr.msk.bf16.mxu1 %vm4930_vm3, %v8421_v15  ;;  %vm342_vm15 = vcmp.eq.s32.totalorder %v6850_v14, %v5961_v27  ;;  %vm1065_vm3 = vcmp.eq.s32.totalorder %v6878_v33, %v6177_v46  ;;  %vm4902_vm4 = vmpackc.low %vm237_vm13, %vm230_vm12  ;;  %vm348_vm10 = vcmp.eq.s32.totalorder %v6908_v34, %v5964_v28 }
 0x136   :  { %5088 = vmatprep.subr.msk.bf16.mxu1 %vm4966_vm6, %v8421_v15  ;;  %vm4934_vm5 = vmpackc.low %vm349_vm0, %vm342_vm15  ;;  %vm953_vm12 = vcmp.eq.s32.totalorder %v6878_v33, %v5938_v26  ;;  %vm140_vm15 = vcmp.eq.s32.totalorder %v7129_v47, %v5938_v26 }
 0x137   :  { %vm4968_vm6 = vmpackc.low %vm1065_vm3, %vm1058_vm2  ;;  %vm147_vm3 = vcmp.eq.s32.totalorder %v7129_v47, %v5912_v24 }
 0x138   :  { %vm4904_vm13 = vmpackc.low %vm236_vm8, %vm229_vm7  ;;  %vm168_vm7 = vcmp.eq.s32.totalorder %v7129_v47, %v5889_v23 }
 0x139   :  { %vm4936_vm0 = vmpackc.low %vm348_vm10, %vm341_vm9  ;;  %vm175_vm9 = vcmp.eq.s32.totalorder %v7129_v47, %v5860_v20  ;;  %vm182_vm10 = vcmp.eq.s32.totalorder %v7129_v47, %v5863_v21 }
 0x13b   :  { %4901 = vmatmul.mubr.msk.bf16.gmra.mxu0 %vm4900_vm11, %v8421_v15  ;;  %vm946_vm11 = vcmp.eq.s32.totalorder %v6878_v33, %v5738_v1 }
 0x13c   :  { %4933 = vmatmul.mubr.msk.bf16.gmra.mxu1 %vm4932_vm14, %v8421_v15  ;;  %4903 = vmatprep.mubr.msk.bf16.mxu0 %vm4902_vm4, %v8421_v15  ;;  %vm133_vm14 = vcmp.eq.s32.totalorder %v7129_v47, %v5738_v1  ;;  %vm154_vm4 = vcmp.eq.s32.totalorder %v7129_v47, %v5915_v25 }
 0x13d   :  { %5089 = vmatpush3.bf16.xpose.msk.msra.mxu1 %vm4950_vm1, %v8421_v15  ;;  %4935 = vmatprep.mubr.msk.bf16.mxu1 %vm4934_vm5, %v8421_v15  ;;  %vm4952_vm1 = vmpackc.low %vm953_vm12, %vm946_vm11  ;;  %vm189_vm12 = vcmp.eq.s32.totalorder %v7129_v47, %v5834_v18 }
 0x13e   :  { %5090 = vmatprep.subr.msk.bf16.mxu1 %vm4968_vm6, %v8421_v15  ;;  %vm4970_vm2 = vmpackc.low %vm140_vm15, %vm133_vm14  ;;  %vm161_vm6 = vcmp.eq.s32.totalorder %v7129_v47, %v5886_v22  ;;  %vm203_vm15 = vcmp.eq.s32.totalorder %v7129_v47, %v5808_v16 }
 0x13f   :  { %vm7160_vm5 = vmpackc.low %vm154_vm4, %vm147_vm3  ;;  %vm224_vm3 = vcmp.eq.s32.totalorder %v7129_v47, %v5769_v12 }
 0x140   :  { %vm7182_vm8 = vmpackc.low %vm168_vm7, %vm161_vm6  ;;  %vm238_vm6 = vcmp.eq.s32.totalorder %v7129_v47, %v5749_v4  ;;  %v7301_v4 = vld [vmem:[%s8413_s0 + $0x78] sm:$0xff]  }
 0x141   :  { %vm7206_vm11 = vmpackc.low %vm182_vm10, %vm175_vm9  ;;  %8506 = vst [vmem:[#allocation6_spill] sm:$0xff] %v7301_v4  ;;  %vm252_vm9 = vcmp.eq.s32.totalorder %v7129_v47, %v6177_v46  ;;  %5124 = vmatprep.subr.bf16.mxu0 %v7301_v4  ;;  %v7329_v46 = vld [vmem:[%s8413_s0 + $0x70] sm:$0xff]  }
 0x142   :  { %8514 = vst [vmem:[#allocation12_spill] sm:$0xff] %v7329_v46 }
 0x143   :  { %4905 = vmatmul.mubr.msk.bf16.gmra.mxu0 %vm4904_vm13, %v8421_v15  ;;  %vm196_vm13 = vcmp.eq.s32.totalorder %v7129_v47, %v5837_v19 }
 0x144   :  { %4937 = vmatmul.mubr.msk.bf16.gmra.mxu1 %vm4936_vm0, %v8421_v15  ;;  %vm7230_vm14 = vmpackc.low %vm196_vm13, %vm189_vm12  ;;  %vm210_vm0 = vcmp.eq.s32.totalorder %v7129_v47, %v5811_v17  ;;  %vm266_vm12 = vcmp.eq.s32.totalorder %v7129_v47, %v6151_v44  ;;  %v7417_v44 = vld [vmem:[%s8413_s0 + $0x50] sm:$0xff]  }
 0x145   :  { %5091 = vmatpush3.bf16.xpose.msk.msra.mxu1 %vm4952_vm1, %v8421_v15  ;;  %5092 = vmatprep.mubr.msk.bf16.mxu1 %vm4970_vm2, %v8421_v15  ;;  %vm7254_vm1 = vmpackc.low %vm210_vm0, %vm203_vm15  ;;  %8532 = vst [vmem:[#allocation27_spill] sm:$0xff] %v7417_v44  ;;  %vm280_vm15 = vcmp.eq.s32.totalorder %v7129_v47, %v6125_v42  ;;  %v7465_v42 = vld [vmem:[%s8413_s0 + $0x40] sm:$0xff]  }
 0x146   :  { %8538 = vst [vmem:[#allocation31_spill] sm:$0xff] %v7465_v42 }
 0x14b   :  { %v1758_v26 = vpop.f32.mrf.mxu0 }
 0x14c   :  { %v1951_v48 = vpop.f32.mrf.mxu1  ;;  %5093 = vmatmul.mubr.msk.bf16.vlgmr.msra.gmra.mxu1 %vm4970_vm2, %v8421_v15  ;;  %vm217_vm2 = vcmp.eq.s32.totalorder %v7129_v47, %v5766_v11 }
 0x14d   :  { %v7165_v49 = vadd.f32 %v1951_v48, %v1758_v26  ;;  %v1760_v50 = vpop.f32.mrf.mxu0  ;;  %5094 = vmatprep.mubr.msk.bf16.mxu1 %vm7160_vm5, %v8421_v15  ;;  %vm7278_vm4 = vmpackc.low %vm224_vm3, %vm217_vm2  ;;  %vm294_vm2 = vcmp.eq.s32.totalorder %v7129_v47, %v6099_v40 }
 0x14e   :  { %v1953_v51 = vpop.f32.mrf.mxu1 }
 0x14f   :  { %v7170_v24 = vadd.f32 %v1953_v51, %v1760_v50  ;;  %v1762_v52 = vpop.f32.mrf.mxu0 }
 0x150   :  { %v1955_v25 = vpop.f32.mrf.mxu1 }
 0x151   :  { %v7176_v53 = vadd.f32 %v1955_v25, %v1762_v52  ;;  %v7178_v54 = vpop.f32.mrf.mxu0 }
 0x152   :  { %v7180_v55 = vpop.f32.mrf.mxu1 }
 0x153   :  { %v1768_v57 = vpop.f32.mrf.mxu0 }
 0x154   :  { %v1961_v58 = vpop.f32.mrf.mxu1  ;;  %5095 = vmatmul.mubr.msk.bf16.gmra.mxu1 %vm7160_vm5, %v8421_v15  ;;  %vm231_vm5 = vcmp.eq.s32.totalorder %v7129_v47, %v5746_v3 }
 0x155   :  { %v7189_v22 = vadd.f32 %v1961_v58, %v1768_v57  ;;  %v1770_v23 = vpop.f32.mrf.mxu0  ;;  %5096 = vmatprep.mubr.msk.bf16.mxu1 %vm7182_vm8, %v8421_v15  ;;  %vm7294_vm7 = vmpackc.low %vm238_vm6, %vm231_vm5  ;;  %vm308_vm5 = vcmp.eq.s32.totalorder %v7129_v47, %v6073_v38 }
 0x156   :  { %v1963_v59 = vpop.f32.mrf.mxu1 }
 0x157   :  { %v7194_v60 = vadd.f32 %v1963_v59, %v1770_v23  ;;  %v1772_v61 = vpop.f32.mrf.mxu0 }
 0x158   :  { %v1965_v62 = vpop.f32.mrf.mxu1 }
 0x159   :  { %v7200_v63 = vadd.f32 %v1965_v62, %v1772_v61  ;;  %v7202_v0 = vpop.f32.mrf.mxu0 }
 0x15a   :  { %v7204_v2 = vpop.f32.mrf.mxu1 }
 0x15b   :  { %v1778_v6 = vpop.f32.mrf.mxu0 }
 0x15c   :  { %v1971_v7 = vpop.f32.mrf.mxu1  ;;  %5097 = vmatmul.mubr.msk.bf16.gmra.mxu1 %vm7182_vm8, %v8421_v15  ;;  %vm245_vm8 = vcmp.eq.s32.totalorder %v7129_v47, %v6174_v45 }
 0x15d   :  { %v7213_v20 = vadd.f32 %v1971_v7, %v1778_v6  ;;  %v1780_v21 = vpop.f32.mrf.mxu0  ;;  %5098 = vmatprep.mubr.msk.bf16.mxu1 %vm7206_vm11, %v8421_v15  ;;  %vm7322_vm10 = vmpackc.low %vm252_vm9, %vm245_vm8  ;;  %vm322_vm8 = vcmp.eq.s32.totalorder %v7129_v47, %v6044_v36 }
 0x15e   :  { %v1973_v8 = vpop.f32.mrf.mxu1 }
 0x15f   :  { %v7218_v9 = vadd.f32 %v1973_v8, %v1780_v21  ;;  %v1782_v10 = vpop.f32.mrf.mxu0 }
 0x160   :  { %v1975_v13 = vpop.f32.mrf.mxu1 }
 0x161   :  { %v7224_v14 = vadd.f32 %v1975_v13, %v1782_v10  ;;  %v7226_v29 = vpop.f32.mrf.mxu0 }
 0x162   :  { %v7228_v32 = vpop.f32.mrf.mxu1 }
 0x163   :  { %v1788_v34 = vpop.f32.mrf.mxu0 }
 0x164   :  { %v1981_v1 = vpop.f32.mrf.mxu1  ;;  %5099 = vmatmul.mubr.msk.bf16.gmra.mxu1 %vm7206_vm11, %v8421_v15  ;;  %vm259_vm11 = vcmp.eq.s32.totalorder %v7129_v47, %v6148_v43 }
 0x165   :  { %v7237_v18 = vadd.f32 %v1981_v1, %v1788_v34  ;;  %v1790_v19 = vpop.f32.mrf.mxu0  ;;  %5100 = vmatprep.mubr.msk.bf16.mxu1 %vm7230_vm14, %v8421_v15  ;;  %vm7410_vm13 = vmpackc.low %vm266_vm12, %vm259_vm11  ;;  %vm336_vm11 = vcmp.eq.s32.totalorder %v7129_v47, %v5995_v31 }
 0x166   :  { %v1983_v26 = vpop.f32.mrf.mxu1 }
 0x167   :  { %v7242_v48 = vadd.f32 %v1983_v26, %v1790_v19  ;;  %v1792_v50 = vpop.f32.mrf.mxu0  ;;  %v7312_v19 = vld [vmem:[%s8413_s0 + $0x38] sm:$0xff]  }
 0x168   :  { %v1985_v51 = vpop.f32.mrf.mxu1  ;;  %8508 = vst [vmem:[#allocation8_spill] sm:$0xff] %v7312_v19  ;;  %5125 = vmatpush3.bf16.msra.mxu0 %v7312_v19 }
 0x169   :  { %v7248_v52 = vadd.f32 %v1985_v51, %v1792_v50  ;;  %v7250_v25 = vpop.f32.mrf.mxu0  ;;  %5126 = vmatprep.subr.bf16.mxu0 %v7329_v46 }
 0x16a   :  { %v7252_v56 = vpop.f32.mrf.mxu1 }
 0x16b   :  { %v1798_v58 = vpop.f32.mrf.mxu0 }
 0x16c   :  { %v1991_v23 = vpop.f32.mrf.mxu1  ;;  %5101 = vmatmul.mubr.msk.bf16.gmra.mxu1 %vm7230_vm14, %v8421_v15  ;;  %vm273_vm14 = vcmp.eq.s32.totalorder %v7129_v47, %v6122_v41 }
 0x16d   :  { %v7261_v16 = vadd.f32 %v1991_v23, %v1798_v58  ;;  %v1800_v17 = vpop.f32.mrf.mxu0  ;;  %5102 = vmatprep.mubr.msk.bf16.mxu1 %vm7254_vm1, %v8421_v15  ;;  %v7334_v23 = vld [vmem:[%s8413_s0 + $0x30] sm:$0xff]   ;;  %vm7458_vm0 = vmpackc.low %vm280_vm15, %vm273_vm14  ;;  %vm350_vm14 = vcmp.eq.s32.totalorder %v7129_v47, %v5964_v28 }
 0x16e   :  { %v1993_v59 = vpop.f32.mrf.mxu1  ;;  %8515 = vst [vmem:[#allocation13_spill] sm:$0xff] %v7334_v23  ;;  %5127 = vmatpush3.bf16.msra.mxu0 %v7334_v23 }
 0x16f   :  { %8498 = vst [vmem:[#allocation2_spill] sm:$0xff] %v7261_v16  ;;  %v7266_v61 = vadd.f32 %v1993_v59, %v1800_v17  ;;  %v1802_v62 = vpop.f32.mrf.mxu0 }
 0x170   :  { %v1995_v5 = vpop.f32.mrf.mxu1 }
 0x171   :  { %8499 = vst [vmem:[#allocation3_spill] sm:$0xff] %v7266_v61  ;;  %v7272_v6 = vadd.f32 %v1995_v5, %v1802_v62  ;;  %v7274_v7 = vpop.f32.mrf.mxu0 }
 0x172   :  { %v7276_v21 = vpop.f32.mrf.mxu1 }
 0x173   :  { %8500 = vst [vmem:[#allocation4_spill] sm:$0xff] %v7272_v6  ;;  %v1808_v11 = vpop.f32.mrf.mxu0 }
 0x174   :  { %v2001_v10 = vpop.f32.mrf.mxu1  ;;  %5103 = vmatmul.mubr.msk.bf16.gmra.mxu1 %vm7254_vm1, %v8421_v15  ;;  %vm287_vm1 = vcmp.eq.s32.totalorder %v7129_v47, %v6096_v39 }
 0x175   :  { %v7289_v12 = vadd.f32 %v2001_v10, %v1808_v11  ;;  %v1810_v13 = vpop.f32.mrf.mxu0  ;;  %5104 = vmatprep.mubr.msk.bf16.mxu1 %vm7278_vm4, %v8421_v15  ;;  %v7349_v11 = vld [vmem:[%s8413_s0 + $0x68] sm:$0xff]   ;;  %vm7494_vm3 = vmpackc.low %vm294_vm2, %vm287_vm1  ;;  %vm4069_vm1 = vcmask 261120  }
 0x176   :  { %v2003_v3 = vpop.f32.mrf.mxu1  ;;  %8517 = vst [vmem:[#allocation15_spill] sm:$0xff] %v7349_v11  ;;  %5128 = vmatprep.subr.bf16.mxu0 %v7349_v11  ;;  %v7389_v11 = vld [vmem:[%s8413_s0 + $0x58] sm:$0xff]  }
 0x177   :  { %8503 = vst [vmem:[#allocation5_spill] sm:$0xff] %v7289_v12  ;;  %v7303_v34 = vadd.f32 %v2003_v3, %v1810_v13  ;;  %v1812_v1 = vpop.f32.mrf.mxu0  ;;  %v7356_v13 = vld [vmem:[%s8413_s0 + $0x28] sm:$0xff]   ;;  %8525 = vst [vmem:[#allocation22_spill] sm:$0xff] %v7389_v11 }
 0x178   :  { %v2005_v26 = vpop.f32.mrf.mxu1  ;;  %5129 = vmatpush3.bf16.msra.mxu0 %v7356_v13 }
 0x179   :  { %8507 = vst [vmem:[#allocation7_spill] sm:$0xff] %v7303_v34  ;;  %v7315_v50 = vadd.f32 %v2005_v26, %v1812_v1  ;;  %v7317_v51 = vpop.f32.mrf.mxu0 }
 0x17a   :  { %8510 = vst [vmem:[#allocation10_spill] sm:$0xff] %v7317_v51  ;;  %v7320_v57 = vpop.f32.mrf.mxu1 }
 0x17b   :  { %8509 = vst [vmem:[#allocation9_spill] sm:$0xff] %v7315_v50  ;;  %8511 = vst [vmem:[#allocation11_spill] sm:$0xff] %v7320_v57  ;;  %v1818_v58 = vpop.f32.mrf.mxu0 }
 0x17c   :  { %v2011_v17 = vpop.f32.mrf.mxu1  ;;  %5105 = vmatmul.mubr.msk.bf16.gmra.mxu1 %vm7278_vm4, %v8421_v15  ;;  %vm301_vm4 = vcmp.eq.s32.totalorder %v7129_v47, %v6070_v37 }
 0x17d   :  { %v7340_v59 = vadd.f32 %v2011_v17, %v1818_v58  ;;  %v1820_v62 = vpop.f32.mrf.mxu0  ;;  %5106 = vmatprep.mubr.msk.bf16.mxu1 %vm7294_vm7, %v8421_v15  ;;  %v7369_v17 = vld [vmem:[%s8413_s0 + $0x60] sm:$0xff]   ;;  %vm7518_vm6 = vmpackc.low %vm308_vm5, %vm301_vm4 }
 0x17e   :  { %v2013_v5 = vpop.f32.mrf.mxu1  ;;  %8522 = vst [vmem:[#allocation20_spill] sm:$0xff] %v7369_v17  ;;  %5130 = vmatprep.subr.bf16.mxu0 %v7369_v17 }
 0x17f   :  { %8516 = vst [vmem:[#allocation14_spill] sm:$0xff] %v7340_v59  ;;  %v7351_v10 = vadd.f32 %v2013_v5, %v1820_v62  ;;  %v1822_v8 = vpop.f32.mrf.mxu0  ;;  %v7374_v5 = vld [vmem:[%s8413_s0 + $0x20] sm:$0xff]  }
 0x180   :  { %v2015_v3 = vpop.f32.mrf.mxu1  ;;  %5131 = vmatpush3.bf16.msra.mxu0 %v7374_v5 }
 0x181   :  { %8518 = vst [vmem:[#allocation16_spill] sm:$0xff] %v7351_v10  ;;  %v7359_v1 = vadd.f32 %v2015_v3, %v1822_v8  ;;  %v7361_v26 = vpop.f32.mrf.mxu0  ;;  %v8523_v8 = vmov 1.0|1.0   ;;  %5132 = vmatprep.subr.bf16.mxu0 %v7389_v11 }
 0x182   :  { %8520 = vst [vmem:[#allocation18_spill] sm:$0xff] %v7361_v26  ;;  %v7364_v58 = vpop.f32.mrf.mxu1 }
 0x183   :  { %8519 = vst [vmem:[#allocation17_spill] sm:$0xff] %v7359_v1  ;;  %8521 = vst [vmem:[#allocation19_spill] sm:$0xff] %v7364_v58  ;;  %v1828_v62 = vpop.f32.mrf.mxu0 }
 0x184   :  { %v2021_v15 = vpop.f32.mrf.mxu1  ;;  %5107 = vmatmul.mubr.msk.bf16.gmra.mxu1 %vm7294_vm7, %v8523_v8  ;;  %vm315_vm7 = vcmp.eq.s32.totalorder %v7129_v47, %v6041_v35 }
 0x185   :  { %v7380_v3 = vadd.f32 %v2021_v15, %v1828_v62  ;;  %v1830_v4 = vpop.f32.mrf.mxu0  ;;  %5108 = vmatprep.mubr.msk.bf16.mxu1 %vm7322_vm10, %v8523_v8  ;;  %v7400_v15 = vld [vmem:[%s8413_s0 + $0x18] sm:$0xff]   ;;  %vm7542_vm9 = vmpackc.low %vm322_vm8, %vm315_vm7 }
 0x186   :  { %v2023_v46 = vpop.f32.mrf.mxu1  ;;  %5133 = vmatpush3.bf16.msra.mxu0 %v7400_v15 }
 0x187   :  { %8524 = vst [vmem:[#allocation21_spill] sm:$0xff] %v7380_v3  ;;  %v7391_v10 = vadd.f32 %v2023_v46, %v1830_v4  ;;  %v1832_v33 = vpop.f32.mrf.mxu0  ;;  %5134 = vmatprep.subr.bf16.mxu0 %v7417_v44 }
 0x188   :  { %v2025_v62 = vpop.f32.mrf.mxu1 }
 0x189   :  { %8526 = vst [vmem:[#allocation23_spill] sm:$0xff] %v7391_v10  ;;  %v7403_v17 = vadd.f32 %v2025_v62, %v1832_v33  ;;  %v7405_v3 = vpop.f32.mrf.mxu0  ;;  %v7422_v33 = vld [vmem:[%s8413_s0 + $0x10] sm:$0xff]  }
 0x18a   :  { %8528 = vst [vmem:[#allocation25_spill] sm:$0xff] %v7405_v3  ;;  %v7408_v4 = vpop.f32.mrf.mxu1  ;;  %5135 = vmatpush3.bf16.msra.mxu0 %v7422_v33  ;;  %v7437_v3 = vld [vmem:[%s8413_s0 + $0x48] sm:$0xff]  }
 0x18b   :  { %8527 = vst [vmem:[#allocation24_spill] sm:$0xff] %v7403_v17  ;;  %8529 = vst [vmem:[#allocation26_spill] sm:$0xff] %v7408_v4  ;;  %v1838_v46 = vpop.f32.mrf.mxu0  ;;  %5136 = vmatprep.subr.bf16.mxu0 %v7437_v3 }
 0x18c   :  { %v2031_v62 = vpop.f32.mrf.mxu1  ;;  %5109 = vmatmul.mubr.msk.bf16.gmra.mxu1 %vm7322_vm10, %v8523_v8  ;;  %8533 = vst [vmem:[#allocation28_spill] sm:$0xff] %v7437_v3  ;;  %vm329_vm10 = vcmp.eq.s32.totalorder %v7129_v47, %v5992_v30 }
 0x18d   :  { %v7428_v10 = vadd.f32 %v2031_v62, %v1838_v46  ;;  %v1840_v17 = vpop.f32.mrf.mxu0  ;;  %5110 = vmatprep.mubr.msk.bf16.mxu1 %vm7410_vm13, %v8523_v8  ;;  %v7448_v46 = vld [vmem:[%s8413_s0 + $0x8] sm:$0xff]   ;;  %vm7566_vm12 = vmpackc.low %vm336_vm11, %vm329_vm10 }
 0x18e   :  { %v2033_v4 = vpop.f32.mrf.mxu1  ;;  %5137 = vmatpush3.bf16.msra.mxu0 %v7448_v46 }
 0x18f   :  { %v7439_v11 = vadd.f32 %v2033_v4, %v1840_v17  ;;  %v1842_v45 = vpop.f32.mrf.mxu0  ;;  %5138 = vmatprep.subr.bf16.mxu0 %v7465_v42 }
 0x190   :  { %v2035_v62 = vpop.f32.mrf.mxu1 }
 0x191   :  { %v7451_v44 = vadd.f32 %v2035_v62, %v1842_v45  ;;  %v7453_v1 = vpop.f32.mrf.mxu0  ;;  %v7470_v45 = vld [vmem:[%s8413_s0] sm:$0xff]  }
 0x192   :  { %8534 = vst [vmem:[#allocation29_spill] sm:$0xff] %v7453_v1  ;;  %v7456_v17 = vpop.f32.mrf.mxu1  ;;  %5139 = vmatpush3.bf16.msra.mxu0 %v7470_v45 }
 0x193   :  { %8535 = vst [vmem:[#allocation30_spill] sm:$0xff] %v7456_v17  ;;  %v1848_v4 = vpop.f32.mrf.mxu0 }
 0x194   :  { %v2041_v62 = vpop.f32.mrf.mxu1  ;;  %5111 = vmatmul.mubr.msk.bf16.gmra.mxu1 %vm7410_vm13, %v8523_v8  ;;  %vm343_vm13 = vcmp.eq.s32.totalorder %v7129_v47, %v5961_v27 }
 0x195   :  { %v7476_v17 = vadd.f32 %v2041_v62, %v1848_v4  ;;  %v1850_v1 = vpop.f32.mrf.mxu0  ;;  %5112 = vmatprep.mubr.msk.bf16.mxu1 %vm7458_vm0, %v8523_v8  ;;  %vm7590_vm15 = vmpackc.low %vm350_vm14, %vm343_vm13 }
 0x196   :  { %v2043_v59 = vpop.f32.mrf.mxu1 }
 0x197   :  { %v7482_v58 = vadd.f32 %v2043_v59, %v1850_v1  ;;  %v1852_v26 = vpop.f32.mrf.mxu0 }
 0x198   :  { %v2045_v43 = vpop.f32.mrf.mxu1 }
 0x199   :  { %v7488_v4 = vadd.f32 %v2045_v43, %v1852_v26  ;;  %v7490_v62 = vpop.f32.mrf.mxu0 }
 0x19a   :  { %8539 = vst [vmem:[#allocation32_spill] sm:$0xff] %v7490_v62  ;;  %v7492_v3 = vpop.f32.mrf.mxu1 }
 0x19b   :  { %8540 = vst [vmem:[#allocation33_spill] sm:$0xff] %v7492_v3  ;;  %v1858_v59 = vpop.f32.mrf.mxu0 }
 0x19c   :  { %v2051_v1 = vpop.f32.mrf.mxu1  ;;  %5113 = vmatmul.mubr.msk.bf16.gmra.mxu1 %vm7458_vm0, %v8523_v8  ;;  %vm2841_vm0 = vcmask 523264  }
 0x19d   :  { %v7501_v39 = vadd.f32 %v2051_v1, %v1858_v59  ;;  %v1860_v40 = vpop.f32.mrf.mxu0  ;;  %5114 = vmatprep.mubr.msk.bf16.mxu1 %vm7494_vm3, %v8523_v8 }
 0x19e   :  { %v2053_v26 = vpop.f32.mrf.mxu1 }
 0x19f   :  { %v7506_v43 = vadd.f32 %v2053_v26, %v1860_v40  ;;  %v1862_v3 = vpop.f32.mrf.mxu0 }
 0x1a0   :  { %v2055_v62 = vpop.f32.mrf.mxu1 }
 0x1a1   :  { %v7512_v41 = vadd.f32 %v2055_v62, %v1862_v3  ;;  %v7514_v59 = vpop.f32.mrf.mxu0 }
 0x1a2   :  { %8543 = vst [vmem:[#allocation34_spill] sm:$0xff] %v7514_v59  ;;  %v7516_v1 = vpop.f32.mrf.mxu1 }
 0x1a3   :  { %8544 = vst [vmem:[#allocation35_spill] sm:$0xff] %v7516_v1  ;;  %v1868_v40 = vpop.f32.mrf.mxu0 }
 0x1a4   :  { %v2061_v26 = vpop.f32.mrf.mxu1  ;;  %5115 = vmatmul.mubr.msk.bf16.gmra.mxu1 %vm7494_vm3, %v8523_v8 }
 0x1a5   :  { %v7525_v37 = vadd.f32 %v2061_v26, %v1868_v40  ;;  %v1870_v38 = vpop.f32.mrf.mxu0  ;;  %5116 = vmatprep.mubr.msk.bf16.mxu1 %vm7518_vm6, %v8523_v8 }
 0x1a6   :  { %v2063_v3 = vpop.f32.mrf.mxu1 }
 0x1a7   :  { %v7530_v62 = vadd.f32 %v2063_v3, %v1870_v38  ;;  %v1872_v1 = vpop.f32.mrf.mxu0 }
 0x1a8   :  { %v2065_v59 = vpop.f32.mrf.mxu1 }
 0x1a9   :  { %v7536_v34 = vadd.f32 %v2065_v59, %v1872_v1  ;;  %v7538_v40 = vpop.f32.mrf.mxu0 }
 0x1aa   :  { %8547 = vst [vmem:[#allocation36_spill] sm:$0xff] %v7538_v40  ;;  %v7540_v26 = vpop.f32.mrf.mxu1 }
 0x1ab   :  { %8548 = vst [vmem:[#allocation37_spill] sm:$0xff] %v7540_v26  ;;  %v1878_v38 = vpop.f32.mrf.mxu0 }
 0x1ac   :  { %v2071_v3 = vpop.f32.mrf.mxu1  ;;  %5117 = vmatmul.mubr.msk.bf16.gmra.mxu1 %vm7518_vm6, %v8523_v8 }
 0x1ad   :  { %v7549_v35 = vadd.f32 %v2071_v3, %v1878_v38  ;;  %v1880_v36 = vpop.f32.mrf.mxu0  ;;  %5118 = vmatprep.mubr.msk.bf16.mxu1 %vm7542_vm9, %v8523_v8 }
 0x1ae   :  { %v2073_v59 = vpop.f32.mrf.mxu1 }
 0x1af   :  { %v7554_v1 = vadd.f32 %v2073_v59, %v1880_v36  ;;  %v1882_v26 = vpop.f32.mrf.mxu0 }
 0x1b0   :  { %v2075_v40 = vpop.f32.mrf.mxu1 }
 0x1b1   :  { %v7560_v42 = vadd.f32 %v2075_v40, %v1882_v26  ;;  %v7562_v38 = vpop.f32.mrf.mxu0 }
 0x1b2   :  { %8551 = vst [vmem:[#allocation38_spill] sm:$0xff] %v7562_v38  ;;  %v7564_v3 = vpop.f32.mrf.mxu1 }
 0x1b3   :  { %8552 = vst [vmem:[#allocation39_spill] sm:$0xff] %v7564_v3  ;;  %v1888_v36 = vpop.f32.mrf.mxu0 }
 0x1b4   :  { %v2081_v59 = vpop.f32.mrf.mxu1  ;;  %5119 = vmatmul.mubr.msk.bf16.gmra.mxu1 %vm7542_vm9, %v8523_v8 }
 0x1b5   :  { %v7573_v30 = vadd.f32 %v2081_v59, %v1888_v36  ;;  %v1890_v31 = vpop.f32.mrf.mxu0  ;;  %5120 = vmatprep.mubr.msk.bf16.mxu1 %vm7566_vm12, %v8523_v8 }
 0x1b6   :  { %v2083_v40 = vpop.f32.mrf.mxu1 }
 0x1b7   :  { %v7578_v26 = vadd.f32 %v2083_v40, %v1890_v31  ;;  %v1892_v3 = vpop.f32.mrf.mxu0 }
 0x1b8   :  { %v2085_v38 = vpop.f32.mrf.mxu1 }
 0x1b9   :  { %v7584_v50 = vadd.f32 %v2085_v38, %v1892_v3  ;;  %v7586_v36 = vpop.f32.mrf.mxu0 }
 0x1ba   :  { %8555 = vst [vmem:[#allocation40_spill] sm:$0xff] %v7586_v36  ;;  %v7588_v59 = vpop.f32.mrf.mxu1 }
 0x1bb   :  { %8556 = vst [vmem:[#allocation41_spill] sm:$0xff] %v7588_v59  ;;  %v1898_v31 = vpop.f32.mrf.mxu0 }
 0x1bc   :  { %v2091_v40 = vpop.f32.mrf.mxu1  ;;  %5121 = vmatmul.mubr.msk.bf16.gmra.mxu1 %vm7566_vm12, %v8523_v8 }
 0x1bd   :  { %v7597_v27 = vadd.f32 %v2091_v40, %v1898_v31  ;;  %v1900_v28 = vpop.f32.mrf.mxu0  ;;  %5122 = vmatprep.mubr.msk.bf16.mxu1 %vm7590_vm15, %v8523_v8 }
 0x1be   :  { %v2093_v47 = vpop.f32.mrf.mxu1 }
 0x1bf   :  { %v7602_v38 = vadd.f32 %v2093_v47, %v1900_v28  ;;  %v1902_v3 = vpop.f32.mrf.mxu0 }
 0x1c0   :  { %v2095_v59 = vpop.f32.mrf.mxu1 }
 0x1c1   :  { %v7604_v36 = vadd.f32 %v2095_v59, %v1902_v3  ;;  %v7606_v51 = vpop.f32.mrf.mxu0 }
 0x1c2   :  { %8559 = vst [vmem:[#allocation42_spill] sm:$0xff] %v7606_v51  ;;  %v7608_v19 = vpop.f32.mrf.mxu1 }
 0x1c3   :  { %8560 = vst [vmem:[#allocation43_spill] sm:$0xff] %v7608_v19  ;;  %v1908_v12 = vpop.f32.mrf.mxu0 }
 0x1c4   :  { %v2101_v61 = vpop.f32.mrf.mxu1  ;;  %5123 = vmatmul.mubr.msk.bf16.gmra.mxu1 %vm7590_vm15, %v8523_v8 }
 0x1c5   :  { %v7613_v31 = vadd.f32 %v2101_v61, %v1908_v12  ;;  %v1910_v40 = vpop.f32.mrf.mxu0  ;;  %5444 = vmatprep.mubr.msk.bf16.mxu1 %vm2841_vm0, %v7470_v45 }
 0x1c6   :  { %v2103_v23 = vpop.f32.mrf.mxu1 }
 0x1c7   :  { %v7615_v28 = vadd.f32 %v2103_v23, %v1910_v40  ;;  %v1912_v47 = vpop.f32.mrf.mxu0 }
 0x1c8   :  { %v2105_v6 = vpop.f32.mrf.mxu1 }
 0x1c9   :  { %v7617_v59 = vadd.f32 %v2105_v6, %v1912_v47  ;;  %v7619_v3 = vpop.f32.mrf.mxu0 }
 0x1ca   :  { %8561 = vst [vmem:[#allocation44_spill] sm:$0xff] %v7619_v3  ;;  %v7621_v51 = vpop.f32.mrf.mxu1 }
 0x1cb   :  { %8562 = vst [vmem:[#allocation45_spill] sm:$0xff] %v7621_v51  ;;  %v7623_v19 = vpop.f32.mrf.mxu0 }
 0x1cc   :  { %v2224_v16 = vpop.f32.mrf.mxu1 }
 0x1cd   :  { %v7626_v57 = vadd.f32 %v2224_v16, %v7428_v10  ;;  %v7628_v61 = vpop.f32.mrf.mxu0 }
 0x1ce   :  { %v2226_v8 = vpop.f32.mrf.mxu1 }
 0x1cf   :  { %8563 = vst [vmem:[#allocation46_spill] sm:$0xff] %v7626_v57  ;;  %v7631_v23 = vadd.f32 %v2226_v8, %v7439_v11  ;;  %v7636_v40 = vpop.f32.mrf.mxu0 }
 0x1d0   :  { %v2228_v12 = vpop.f32.mrf.mxu1 }
 0x1d1   :  { %8564 = vst [vmem:[#allocation47_spill] sm:$0xff] %v7631_v23  ;;  %v7634_v6 = vadd.f32 %v2228_v12, %v7451_v44  ;;  %v7643_v16 = vpop.f32.mrf.mxu0 }
 0x1d2   :  { %v7638_v47 = vpop.f32.mrf.mxu1 }
 0x1d3   :  { %8565 = vst [vmem:[#allocation48_spill] sm:$0xff] %v7634_v6  ;;  %v7651_v44 = vpop.f32.mrf.mxu0 }
 0x1d4   :  { %v2234_v51 = vpop.f32.mrf.mxu1 }
 0x1d5   :  { %v7641_v3 = vadd.f32 %v2234_v51, %v7476_v17  ;;  %v7658_v51 = vpop.f32.mrf.mxu0 }
 0x1d6   :  { %v2236_v10 = vpop.f32.mrf.mxu1 }
 0x1d7   :  { %8566 = vst [vmem:[#allocation49_spill] sm:$0xff] %v7641_v3  ;;  %v7646_v57 = vadd.f32 %v2236_v10, %v7482_v58 }
 0x1d8   :  { %v2238_v11 = vpop.f32.mrf.mxu1 }
 0x1d9   :  { %8567 = vst [vmem:[#allocation50_spill] sm:$0xff] %v7646_v57  ;;  %v7649_v8 = vadd.f32 %v2238_v11, %v7488_v4  ;;  %v7666_v4 = vpop.f32.mrf.mxu0 }
 0x1da   :  { %v7653_v12 = vpop.f32.mrf.mxu1 }
 0x1db   :  { %8568 = vst [vmem:[#allocation51_spill] sm:$0xff] %v7649_v8 }
 0x1dc   :  { %v2244_v23 = vpop.f32.mrf.mxu1 }
 0x1dd   :  { %v7656_v6 = vadd.f32 %v2244_v23, %v7501_v39  ;;  %v7673_v39 = vpop.f32.mrf.mxu0 }
 0x1de   :  { %v2246_v17 = vpop.f32.mrf.mxu1 }
 0x1df   :  { %8569 = vst [vmem:[#allocation52_spill] sm:$0xff] %v7656_v6  ;;  %v7661_v3 = vadd.f32 %v2246_v17, %v7506_v43 }
 0x1e0   :  { %v2248_v58 = vpop.f32.mrf.mxu1 }
 0x1e1   :  { %8570 = vst [vmem:[#allocation53_spill] sm:$0xff] %v7661_v3  ;;  %v7664_v10 = vadd.f32 %v2248_v58, %v7512_v41  ;;  %v7681_v41 = vpop.f32.mrf.mxu0 }
 0x1e2   :  { %v7668_v11 = vpop.f32.mrf.mxu1 }
 0x1e3   :  { %8571 = vst [vmem:[#allocation54_spill] sm:$0xff] %v7664_v10 }
 0x1e4   :  { %v2254_v57 = vpop.f32.mrf.mxu1 }
 0x1e5   :  { %v7671_v8 = vadd.f32 %v2254_v57, %v7525_v37  ;;  %v7688_v37 = vpop.f32.mrf.mxu0 }
 0x1e6   :  { %v2256_v23 = vpop.f32.mrf.mxu1 }
 0x1e7   :  { %8572 = vst [vmem:[#allocation55_spill] sm:$0xff] %v7671_v8  ;;  %v7676_v6 = vadd.f32 %v2256_v23, %v7530_v62 }
 0x1e8   :  { %v2258_v43 = vpop.f32.mrf.mxu1 }
 0x1e9   :  { %8573 = vst [vmem:[#allocation56_spill] sm:$0xff] %v7676_v6  ;;  %v7679_v17 = vadd.f32 %v2258_v43, %v7536_v34  ;;  %v7696_v34 = vpop.f32.mrf.mxu0 }
 0x1ea   :  { %v7683_v58 = vpop.f32.mrf.mxu1 }
 0x1eb   :  { %8574 = vst [vmem:[#allocation57_spill] sm:$0xff] %v7679_v17 }
 0x1ec   :  { %v2264_v3 = vpop.f32.mrf.mxu1 }
 0x1ed   :  { %v7686_v10 = vadd.f32 %v2264_v3, %v7549_v35  ;;  %v7703_v35 = vpop.f32.mrf.mxu0 }
 0x1ee   :  { %v2266_v57 = vpop.f32.mrf.mxu1 }
 0x1ef   :  { %8575 = vst [vmem:[#allocation58_spill] sm:$0xff] %v7686_v10  ;;  %v7691_v8 = vadd.f32 %v2266_v57, %v7554_v1 }
 0x1f0   :  { %v2268_v62 = vpop.f32.mrf.mxu1 }
 0x1f1   :  { %8576 = vst [vmem:[#allocation59_spill] sm:$0xff] %v7691_v8  ;;  %v7694_v23 = vadd.f32 %v2268_v62, %v7560_v42  ;;  %v7711_v42 = vpop.f32.mrf.mxu0 }
 0x1f2   :  { %v7698_v43 = vpop.f32.mrf.mxu1 }
 0x1f3   :  { %8577 = vst [vmem:[#allocation60_spill] sm:$0xff] %v7694_v23 }
 0x1f4   :  { %v2274_v6 = vpop.f32.mrf.mxu1 }
 0x1f5   :  { %v7701_v17 = vadd.f32 %v2274_v6, %v7573_v30  ;;  %v7718_v30 = vpop.f32.mrf.mxu0 }
 0x1f6   :  { %v2276_v3 = vpop.f32.mrf.mxu1 }
 0x1f7   :  { %8578 = vst [vmem:[#allocation61_spill] sm:$0xff] %v7701_v17  ;;  %v7706_v10 = vadd.f32 %v2276_v3, %v7578_v26 }
 0x1f8   :  { %v2278_v1 = vpop.f32.mrf.mxu1 }
 0x1f9   :  { %8579 = vst [vmem:[#allocation62_spill] sm:$0xff] %v7706_v10  ;;  %v7709_v57 = vadd.f32 %v2278_v1, %v7584_v50  ;;  %v7726_v50 = vpop.f32.mrf.mxu0 }
 0x1fa   :  { %v7713_v62 = vpop.f32.mrf.mxu1 }
 0x1fb   :  { %8580 = vst [vmem:[#allocation63_spill] sm:$0xff] %v7709_v57 }
 0x1fc   :  { %v2284_v8 = vpop.f32.mrf.mxu1 }
 0x1fd   :  { %v7716_v23 = vadd.f32 %v2284_v8, %v7597_v27  ;;  %v7733_v27 = vpop.f32.mrf.mxu0 }
 0x1fe   :  { %v2286_v6 = vpop.f32.mrf.mxu1 }
 0x1ff   :  { %8581 = vst [vmem:[#allocation64_spill] sm:$0xff] %v7716_v23  ;;  %v7721_v17 = vadd.f32 %v2286_v6, %v7602_v38  ;;  %v5661_v38 = vld [vmem:[%s8414_s4 + $0x18] sm:$0xff]   ;;  %v1958_v23 = vadd.f32 %v7180_v55, %v7178_v54 }
 0x200   :  { %v2288_v26 = vpop.f32.mrf.mxu1  ;;  %5436 = vmatprep.subr.bf16.mxu1 %v5661_v38 }
 0x201   :  { %8582 = vst [vmem:[#allocation65_spill] sm:$0xff] %v7721_v17  ;;  %v7724_v3 = vadd.f32 %v2288_v26, %v7604_v36  ;;  %5437 = vmatpush3.bf16.msra.mxu1 %v5661_v38  ;;  %v7744_v17 = vpop.f32.mrf.mxu0  ;;  %v5662_v38 = vld [vmem:[%s8414_s4 + $0x10] sm:$0xff]   ;;  %v2151_v54 = vadd.f32 %v7643_v16, %v1958_v23  ;;  %v1968_v23 = vadd.f32 %v7204_v2, %v7202_v0 }
 0x202   :  { %v7728_v1 = vpop.f32.mrf.mxu1  ;;  %5438 = vmatprep.subr.bf16.mxu1 %v5662_v38 }
 0x203   :  { %8583 = vst [vmem:[#allocation66_spill] sm:$0xff] %v7724_v3  ;;  %8584 = vst [vmem:[#allocation67_spill] sm:$0xff] %v7728_v1 }
 0x204   :  { %v2294_v10 = vpop.f32.mrf.mxu1 }
 0x205   :  { %v7731_v57 = vadd.f32 %v2294_v10, %v7613_v31  ;;  %5439 = vmatpush3.bf16.msra.mxu1 %v5662_v38 }
 0x206   :  { %v2296_v8 = vpop.f32.mrf.mxu1 }
 0x207   :  { %8585 = vst [vmem:[#allocation68_spill] sm:$0xff] %v7731_v57  ;;  %v7739_v6 = vadd.f32 %v2296_v8, %v7615_v28  ;;  %v7748_v57 = vpop.f32.mrf.mxu0  ;;  %v2145_v28 = vadd.f32 %v7623_v19, %v7165_v49  ;;  %v2149_v8 = vadd.f32 %v7636_v40, %v7176_v53 }
 0x208   :  { %v2298_v36 = vpop.f32.mrf.mxu1 }
 0x209   :  { %8586 = vst [vmem:[#allocation69_spill] sm:$0xff] %v7739_v6  ;;  %v7742_v26 = vadd.f32 %v2298_v36, %v7617_v59  ;;  %v5663_v36 = vld [vmem:[%s8414_s4 + $0x8] sm:$0xff]   ;;  %v2147_v6 = vadd.f32 %v7628_v61, %v7170_v24  ;;  %v7767_v53 = vpop.f32.mrf.mxu0  ;;  %v5664_v24 = vld [vmem:[%s8414_s4] sm:$0xff]  }
 0x20a   :  { %v7746_v31 = vpop.f32.mrf.mxu1  ;;  %5440 = vmatprep.subr.bf16.mxu1 %v5663_v36 }
 0x20b   :  { %8587 = vst [vmem:[#allocation70_spill] sm:$0xff] %v7742_v26  ;;  %8588 = vst [vmem:[#allocation71_spill] sm:$0xff] %v7746_v31  ;;  %v7776_v16 = vpop.f32.mrf.mxu0  ;;  %5441 = vmatpush3.bf16.msra.mxu1 %v5663_v36 }
 0x20c   :  { %v2337_v10 = vpop.f32.mrf.mxu1  ;;  %5442 = vmatprep.subr.bf16.mxu1 %v5664_v24 }
 0x20d   :  { %v2338_v55 = vadd.f32 %v2337_v10, %v2145_v28  ;;  %v2161_v28 = vadd.f32 %v7673_v39, %v1968_v23  ;;  %v7789_v2 = vpop.f32.mrf.mxu0  ;;  %v2169_v39 = vadd.f32 %v7696_v34, %v7224_v14 }
 0x20e   :  { %v2339_v3 = vpop.f32.mrf.mxu1 }
 0x20f   :  { %v2340_v40 = vadd.f32 %v2339_v3, %v2147_v6  ;;  %v2155_v3 = vadd.f32 %v7651_v44, %v7189_v22  ;;  %v2159_v6 = vadd.f32 %v7666_v4, %v7200_v63  ;;  %5443 = vmatpush3.bf16.msra.mxu1 %v5664_v24  ;;  %v7795_v36 = vpop.f32.mrf.mxu0 }
 0x210   :  { %v2341_v59 = vpop.f32.mrf.mxu1 }
 0x211   :  { %v2342_v49 = vadd.f32 %v2341_v59, %v2149_v8 }
 0x212   :  { %v2343_v19 = vpop.f32.mrf.mxu1  ;;  %5445 = vmatmul.mubr.msk.bf16.vlgmr.msra.gmra.mxu1 %vm2841_vm0, %v7448_v46  ;;  %v2167_v46 = vadd.f32 %v7688_v37, %v7218_v9  ;;  %v1988_v9 = vadd.f32 %v7252_v56, %v7250_v25  ;;  %v2175_v37 = vadd.f32 %v7711_v42, %v7237_v18 }
 0x213   :  { %v7769_v26 = vpack.c.bf16 %v2342_v49, %v2338_v55  ;;  %v2344_v31 = vadd.f32 %v2343_v19, %v2151_v54  ;;  %5448 = vmatprep.mubr.msk.bf16.mxu1 %vm2841_vm0, %v7422_v33  ;;  %v2198_v49 = vpop.f32.mrf.mxu0 }
 0x214   :  { %v2347_v1 = vpop.f32.mrf.mxu1  ;;  %v2181_v23 = vadd.f32 %v7733_v27, %v1988_v9  ;;  %v8599_v9 = vld [vmem:[#allocation7_spill] sm:$0xff] }
 0x215   :  { %v7774_v61 = vpack.c.bf16 %v2344_v31, %v2340_v40  ;;  %v2157_v31 = vadd.f32 %v7658_v51, %v7194_v60  ;;  %v2348_v8 = vadd.f32 %v2347_v1, %v2155_v3  ;;  %v1978_v60 = vadd.f32 %v7228_v32, %v7226_v29  ;;  %v2200_v33 = vpop.f32.mrf.mxu0 }
 0x216   :  { %v2349_v45 = vpop.f32.mrf.mxu1  ;;  %v2165_v51 = vadd.f32 %v7681_v41, %v7213_v20 }
 0x217   :  { %2656 = vmatprep.mubr.bf16.mxu0 %v7774_v61  ;;  %v2350_v44 = vadd.f32 %v2349_v45, %v2157_v31  ;;  %v2171_v55 = vadd.f32 %v7703_v35, %v1978_v60  ;;  %v2179_v35 = vadd.f32 %v7726_v50, %v7248_v52  ;;  %v2204_v3 = vpop.f32.mrf.mxu0 }
 0x218   :  { %v2351_v10 = vpop.f32.mrf.mxu1  ;;  %2657 = vmatmul.mubr.bf16.vlgmr.msra.gmra.mxu0 %v7769_v26 }
 0x219   :  { %v2352_v0 = vadd.f32 %v2351_v10, %v2159_v6 }
 0x21a   :  { %v2353_v22 = vpop.f32.mrf.mxu1  ;;  %5449 = vmatmul.mubr.msk.bf16.gmra.mxu1 %vm2841_vm0, %v7400_v15  ;;  %v2177_v15 = vadd.f32 %v7718_v30, %v7242_v48  ;;  %v1998_v48 = vadd.f32 %v7276_v21, %v7274_v7  ;;  %v8589_v30 = vld [vmem:[#allocation2_spill] sm:$0xff] }
 0x21b   :  { %v7791_v59 = vpack.c.bf16 %v2352_v0, %v2348_v8  ;;  %v2354_v63 = vadd.f32 %v2353_v22, %v2161_v28  ;;  %5452 = vmatprep.mubr.msk.bf16.mxu1 %vm2841_vm0, %v7374_v5  ;;  %v2206_v5 = vpop.f32.mrf.mxu0  ;;  %v2185_v27 = vadd.f32 %v7744_v17, %v8589_v30  ;;  %v8590_v28 = vld [vmem:[#allocation4_spill] sm:$0xff]  ;;  %v8591_v0 = vld [vmem:[#allocation13_spill] sm:$0xff]  ;;  %v8602_v30 = vld [vmem:[#allocation19_spill] sm:$0xff] }
 0x21c   :  { %v2357_v4 = vpop.f32.mrf.mxu1  ;;  %v2189_v8 = vadd.f32 %v7767_v53, %v8590_v28  ;;  %v8604_v28 = vld [vmem:[#allocation17_spill] sm:$0xff] }
 0x21d   :  { %v7793_v38 = vpack.c.bf16 %v2354_v63, %v2350_v44  ;;  %v2358_v29 = vadd.f32 %v2357_v4, %v2165_v51  ;;  %v8592_v44 = vld [vmem:[#allocation3_spill] sm:$0xff]  ;;  %v2191_v63 = vadd.f32 %v7776_v16, %v1998_v48  ;;  %v2208_v4 = vpop.f32.mrf.mxu0  ;;  %v8596_v16 = vld [vmem:[#allocation5_spill] sm:$0xff]  ;;  %v8601_v48 = vld [vmem:[#allocation18_spill] sm:$0xff] }
 0x21e   :  { %v2359_v54 = vpop.f32.mrf.mxu1 }
 0x21f   :  { %2664 = vmatprep.mubr.bf16.mxu0 %v7793_v38  ;;  %v2360_v41 = vadd.f32 %v2359_v54, %v2167_v46 }
 0x220   :  { %v2361_v1 = vpop.f32.mrf.mxu1  ;;  %2665 = vmatmul.mubr.bf16.gmra.mxu0 %v7791_v59 }
 0x221   :  { %v2362_v32 = vadd.f32 %v2361_v1, %v2169_v39  ;;  %v2210_v1 = vpop.f32.mrf.mxu0 }
 0x222   :  { %v2363_v20 = vpop.f32.mrf.mxu1  ;;  %5453 = vmatmul.mubr.msk.bf16.gmra.mxu1 %vm2841_vm0, %v7356_v13  ;;  %v2187_v13 = vadd.f32 %v7748_v57, %v8592_v44  ;;  %v8595_v57 = vld [vmem:[#allocation11_spill] sm:$0xff]  ;;  %v8606_v44 = vld [vmem:[#allocation16_spill] sm:$0xff] }
 0x223   :  { %v7812_v19 = vpack.c.bf16 %v2362_v32, %v2358_v29  ;;  %v2364_v14 = vadd.f32 %v2363_v20, %v2171_v55  ;;  %5456 = vmatprep.mubr.msk.bf16.mxu1 %vm2841_vm0, %v8591_v0  ;;  %v8593_v55 = vld [vmem:[#allocation8_spill] sm:$0xff]  ;;  %v8594_v29 = vld [vmem:[#allocation10_spill] sm:$0xff]  ;;  %v2195_v20 = vadd.f32 %v7789_v2, %v8596_v16  ;;  %v8605_v0 = vld [vmem:[#allocation27_spill] sm:$0xff] }
 0x224   :  { %v2367_v34 = vpop.f32.mrf.mxu1  ;;  %v2008_v32 = vadd.f32 %v8595_v57, %v8594_v29  ;;  %v8607_v57 = vld [vmem:[#allocation22_spill] sm:$0xff] }
 0x225   :  { %v7814_v40 = vpack.c.bf16 %v2364_v14, %v2360_v41  ;;  %v2368_v25 = vadd.f32 %v2367_v34, %v2175_v37  ;;  %v8597_v41 = vld [vmem:[#allocation9_spill] sm:$0xff]  ;;  %v8598_v34 = vld [vmem:[#allocation31_spill] sm:$0xff]  ;;  %v2197_v37 = vadd.f32 %v7795_v36, %v8599_v9  ;;  %v2018_v36 = vadd.f32 %v8602_v30, %v8601_v48  ;;  %v8609_v16 = vld [vmem:[#allocation26_spill] sm:$0xff] }
 0x226   :  { %v2369_v24 = vpop.f32.mrf.mxu1  ;;  %v2199_v14 = vadd.f32 %v2198_v49, %v8597_v41  ;;  %v8611_v41 = vld [vmem:[#allocation24_spill] sm:$0xff]  ;;  %v8613_v9 = vld [vmem:[#allocation23_spill] sm:$0xff]  ;;  %v8615_v30 = vld [vmem:[#allocation29_spill] sm:$0xff] }
 0x227   :  { %2672 = vmatprep.mubr.bf16.mxu0 %v7814_v40  ;;  %v2370_v42 = vadd.f32 %v2369_v24, %v2177_v15  ;;  %v8614_v48 = vld [vmem:[#allocation15_spill] sm:$0xff] }
 0x228   :  { %v2371_v45 = vpop.f32.mrf.mxu1  ;;  %2673 = vmatmul.mubr.bf16.gmra.mxu0 %v7812_v19 }
 0x229   :  { %v2372_v56 = vadd.f32 %v2371_v45, %v2179_v35  ;;  %v2201_v35 = vadd.f32 %v2200_v33, %v2008_v32  ;;  %v8603_v33 = vld [vmem:[#allocation14_spill] sm:$0xff]  ;;  %v8608_v32 = vld [vmem:[#allocation25_spill] sm:$0xff] }
 0x22a   :  { %v2373_v18 = vpop.f32.mrf.mxu1  ;;  %5457 = vmatmul.mubr.msk.bf16.gmra.mxu1 %vm2841_vm0, %v8593_v55 }
 0x22b   :  { %v7831_v6 = vpack.c.bf16 %v2372_v56, %v2368_v25  ;;  %v2374_v52 = vadd.f32 %v2373_v18, %v2181_v23  ;;  %5460 = vmatprep.mubr.msk.bf16.mxu1 %vm2841_vm0, %v8598_v34  ;;  %v2214_v23 = vpop.f32.mrf.mxu0  ;;  %v8612_v34 = vld [vmem:[#allocation20_spill] sm:$0xff] }
 0x22c   :  { %v2377_v50 = vpop.f32.mrf.mxu1 }
 0x22d   :  { %v7833_v10 = vpack.c.bf16 %v2374_v52, %v2370_v42  ;;  %v2378_v7 = vadd.f32 %v2377_v50, %v2185_v27  ;;  %v2216_v52 = vpop.f32.mrf.mxu0  ;;  %v2205_v27 = vadd.f32 %v2204_v3, %v8603_v33 }
 0x22e   :  { %v2379_v31 = vpop.f32.mrf.mxu1 }
 0x22f   :  { %2680 = vmatprep.mubr.bf16.mxu0 %v7833_v10  ;;  %v2380_v54 = vadd.f32 %v2379_v31, %v2187_v13  ;;  %v8600_v31 = vld [vmem:[#allocation28_spill] sm:$0xff]  ;;  %v2207_v13 = vadd.f32 %v2206_v5, %v8606_v44  ;;  %v2028_v5 = vadd.f32 %v8609_v16, %v8608_v32  ;;  %v8625_v16 = vld [vmem:[#allocation49_spill] sm:$0xff] }
 0x230   :  { %v2381_v22 = vpop.f32.mrf.mxu1  ;;  %2681 = vmatmul.mubr.bf16.gmra.mxu0 %v7831_v6 }
 0x231   :  { %v2382_v21 = vadd.f32 %v2381_v22, %v2189_v8  ;;  %v2209_v8 = vadd.f32 %v2208_v4, %v8604_v28 }
 0x232   :  { %v2383_v17 = vpop.f32.mrf.mxu1  ;;  %5461 = vmatmul.mubr.msk.bf16.gmra.mxu1 %vm2841_vm0, %v8600_v31 }
 0x233   :  { %v7850_v60 = vpack.c.bf16 %v2382_v21, %v2378_v7  ;;  %v2384_v53 = vadd.f32 %v2383_v17, %v2191_v63  ;;  %5464 = vmatprep.mubr.msk.bf16.mxu1 %vm2841_vm0, %v8605_v0  ;;  %v2211_v63 = vadd.f32 %v2210_v1, %v2018_v36  ;;  %v2218_v17 = vpop.f32.mrf.mxu0  ;;  %v8610_v1 = vld [vmem:[#allocation21_spill] sm:$0xff]  ;;  %v8616_v36 = vld [vmem:[#allocation30_spill] sm:$0xff] }
 0x234   :  { %v2387_v51 = vpop.f32.mrf.mxu1  ;;  %v2038_v33 = vadd.f32 %v8616_v36, %v8615_v30  ;;  %v8633_v36 = vld [vmem:[#allocation54_spill] sm:$0xff] }
 0x235   :  { %v7852_v39 = vpack.c.bf16 %v2384_v53, %v2380_v54  ;;  %v2388_v45 = vadd.f32 %v2387_v51, %v2195_v20  ;;  %v2220_v55 = vpop.f32.mrf.mxu0  ;;  %v2215_v20 = vadd.f32 %v2214_v23, %v8610_v1  ;;  %v8626_v1 = vld [vmem:[#allocation51_spill] sm:$0xff] }
 0x236   :  { %v2389_v46 = vpop.f32.mrf.mxu1  ;;  %v2231_v28 = vadd.f32 %v7638_v47, %v2038_v33 }
 0x237   :  { %2688 = vmatprep.mubr.bf16.mxu0 %v7852_v39  ;;  %v2390_v56 = vadd.f32 %v2389_v46, %v2197_v37  ;;  %v2217_v37 = vadd.f32 %v2216_v52, %v8613_v9  ;;  %v8617_v52 = vld [vmem:[#allocation12_spill] sm:$0xff] }
 0x238   :  { %v2391_v24 = vpop.f32.mrf.mxu1  ;;  %2689 = vmatmul.mubr.bf16.gmra.mxu0 %v7850_v60 }
 0x239   :  { %v2392_v15 = vadd.f32 %v2391_v24, %v2199_v14  ;;  %v2219_v14 = vadd.f32 %v2218_v17, %v8611_v41  ;;  %v5665_v41 = vld [vmem:[%s8415_s3 + $0x18] sm:$0xff]  }
 0x23a   :  { %v2393_v25 = vpop.f32.mrf.mxu1  ;;  %5465 = vmatmul.mubr.msk.bf16.gmra.mxu1 %vm2841_vm0, %v8607_v57  ;;  %5476 = vmatprep.subr.bf16.mxu1 %v5665_v41 }
 0x23b   :  { %v7867_v2 = vpack.c.bf16 %v2392_v15, %v2388_v45  ;;  %v2394_v49 = vadd.f32 %v2393_v25, %v2201_v35  ;;  %5468 = vmatprep.mubr.msk.bf16.mxu1 %vm2841_vm0, %v8612_v34  ;;  %v2221_v35 = vadd.f32 %v2220_v55, %v2028_v5  ;;  %v8623_v55 = vld [vmem:[#allocation32_spill] sm:$0xff]  ;;  %v8627_v34 = vld [vmem:[#allocation50_spill] sm:$0xff]  ;;  %5477 = vmatpush3.bf16.msra.mxu1 %v5665_v41 }
 0x23c   :  { %v2397_v18 = vpop.f32.mrf.mxu1 }
 0x23d   :  { %v7869_v42 = vpack.c.bf16 %v2394_v49, %v2390_v56  ;;  %v2398_v7 = vadd.f32 %v2397_v18, %v2205_v27 }
 0x23e   :  { %v2399_v50 = vpop.f32.mrf.mxu1 }
 0x23f   :  { %2696 = vmatprep.mubr.bf16.mxu0 %v7869_v42  ;;  %v2400_v53 = vadd.f32 %v2399_v50, %v2207_v13 }
 0x240   :  { %v2401_v22 = vpop.f32.mrf.mxu1  ;;  %2697 = vmatmul.mubr.bf16.gmra.mxu0 %v7867_v2 }
 0x241   :  { %v2402_v21 = vadd.f32 %v2401_v22, %v2209_v8  ;;  %v8618_v8 = vld [vmem:[#allocation46_spill] sm:$0xff]  ;;  %v8619_v22 = vld [vmem:[#allocation48_spill] sm:$0xff] }
 0x242   :  { %v2403_v54 = vpop.f32.mrf.mxu1  ;;  %5469 = vmatmul.mubr.msk.bf16.gmra.mxu1 %vm2841_vm0, %v8614_v48  ;;  %v8632_v48 = vld [vmem:[#allocation52_spill] sm:$0xff] }
 0x243   :  { %v7882_v51 = vpack.c.bf16 %v2402_v21, %v2398_v7  ;;  %v2404_v3 = vadd.f32 %v2403_v54, %v2211_v63  ;;  %5472 = vmatprep.mubr.msk.bf16.mxu1 %vm2841_vm0, %v8617_v52  ;;  %v8620_v63 = vld [vmem:[#allocation47_spill] sm:$0xff] }
 0x244   :  { %v2407_v4 = vpop.f32.mrf.mxu1  ;;  %v5667_v52 = vld [vmem:[%s8415_s3 + $0x8] sm:$0xff]  }
 0x245   :  { %v7884_v46 = vpack.c.bf16 %v2404_v3, %v2400_v53  ;;  %v2408_v45 = vadd.f32 %v2407_v4, %v2215_v20  ;;  %v8622_v4 = vld [vmem:[#allocation6_spill] sm:$0xff] }
 0x246   :  { %v2409_v29 = vpop.f32.mrf.mxu1 }
 0x247   :  { %2704 = vmatprep.mubr.bf16.mxu0 %v7884_v46  ;;  %v2410_v56 = vadd.f32 %v2409_v29, %v2217_v37  ;;  %v8624_v29 = vld [vmem:[#allocation33_spill] sm:$0xff] }
 0x248   :  { %v2411_v24 = vpop.f32.mrf.mxu1  ;;  %2705 = vmatmul.mubr.bf16.gmra.mxu0 %v7882_v51  ;;  %v2048_v47 = vadd.f32 %v8624_v29, %v8623_v55  ;;  %v8639_v55 = vld [vmem:[#allocation55_spill] sm:$0xff] }
 0x249   :  { %v2412_v15 = vadd.f32 %v2411_v24, %v2219_v14 }
 0x24a   :  { %v2413_v25 = vpop.f32.mrf.mxu1  ;;  %5473 = vmatmul.mubr.msk.bf16.gmra.mxu1 %vm2841_vm0, %v8622_v4  ;;  %v2241_v32 = vadd.f32 %v7653_v12, %v2048_v47  ;;  %v5666_v12 = vld [vmem:[%s8415_s3 + $0x10] sm:$0xff]   ;;  %v8640_v47 = vld [vmem:[#allocation57_spill] sm:$0xff] }
 0x24b   :  { %v7897_v49 = vpack.c.bf16 %v2412_v15, %v2408_v45  ;;  %v2414_v23 = vadd.f32 %v2413_v25, %v2221_v35  ;;  %v8630_v25 = vld [vmem:[#allocation34_spill] sm:$0xff]  ;;  %5478 = vmatprep.subr.bf16.mxu1 %v5666_v12 }
 0x24c   :  { %v2417_v18 = vpop.f32.mrf.mxu1  ;;  %5479 = vmatpush3.bf16.msra.mxu1 %v5666_v12 }
 0x24d   :  { %v7899_v50 = vpack.c.bf16 %v2414_v23, %v2410_v56  ;;  %v2418_v0 = vadd.f32 %v2417_v18, %v8618_v8  ;;  %v8631_v56 = vld [vmem:[#allocation35_spill] sm:$0xff]  ;;  %5480 = vmatprep.subr.bf16.mxu1 %v5667_v52 }
 0x24e   :  { %v2419_v31 = vpop.f32.mrf.mxu1  ;;  %v2058_v23 = vadd.f32 %v8631_v56, %v8630_v25  ;;  %v8647_v56 = vld [vmem:[#allocation60_spill] sm:$0xff] }
 0x24f   :  { %2712 = vmatprep.mubr.bf16.mxu0 %v7899_v50  ;;  %v2420_v7 = vadd.f32 %v2419_v31, %v8620_v63 }
 0x250   :  { %v2421_v27 = vpop.f32.mrf.mxu1  ;;  %2713 = vmatmul.mubr.bf16.gmra.mxu0 %v7897_v49  ;;  %v2251_v31 = vadd.f32 %v7668_v11, %v2058_v23  ;;  %5481 = vmatpush3.bf16.msra.mxu1 %v5667_v52  ;;  %v5668_v11 = vld [vmem:[%s8415_s3] sm:$0xff]  }
 0x251   :  { %v2422_v44 = vadd.f32 %v2421_v27, %v8619_v22  ;;  %5482 = vmatprep.subr.bf16.mxu1 %v5668_v11 }
 0x252   :  { %v2423_v13 = vpop.f32.mrf.mxu1 }
 0x253   :  { %v7913_v21 = vpack.c.bf16 %v2422_v44, %v2418_v0  ;;  %v2424_v17 = vadd.f32 %v2423_v13, %v2231_v28  ;;  %v8634_v28 = vld [vmem:[#allocation53_spill] sm:$0xff] }
 0x254   :  { %v2427_v54 = vpop.f32.mrf.mxu1  ;;  %5483 = vmatpush3.bf16.msra.mxu1 %v5668_v11  ;;  %v8653_v11 = vld [vmem:[#allocation61_spill] sm:$0xff] }
 0x255   :  { %8621 = vst [vmem:[#allocation2_spill] sm:$0xff] %v7913_v21  ;;  %v7915_v53 = vpack.c.bf16 %v2424_v17, %v2420_v7  ;;  %v2428_v5 = vadd.f32 %v2427_v54, %v8625_v16  ;;  %v8637_v7 = vld [vmem:[#allocation36_spill] sm:$0xff]  ;;  %v8638_v17 = vld [vmem:[#allocation37_spill] sm:$0xff] }
 0x256   :  { %v2429_v3 = vpop.f32.mrf.mxu1  ;;  %v2068_v54 = vadd.f32 %v8638_v17, %v8637_v7  ;;  %v8641_v16 = vld [vmem:[#allocation56_spill] sm:$0xff]  ;;  %v8654_v7 = vld [vmem:[#allocation63_spill] sm:$0xff] }
 0x257   :  { %2720 = vmatprep.mubr.bf16.mxu0 %v7915_v53  ;;  %v2430_v24 = vadd.f32 %v2429_v3, %v8627_v34 }
 0x258   :  { %v2431_v57 = vpop.f32.mrf.mxu1  ;;  %2721 = vmatmul.mubr.bf16.gmra.mxu0 %v7913_v21  ;;  %v2261_v4 = vadd.f32 %v7683_v58, %v2068_v54 }
 0x259   :  { %v2432_v20 = vadd.f32 %v2431_v57, %v8626_v1 }
 0x25a   :  { %v2433_v14 = vpop.f32.mrf.mxu1 }
 0x25b   :  { %v7930_v9 = vpack.c.bf16 %v2432_v20, %v2428_v5  ;;  %v2434_v37 = vadd.f32 %v2433_v14, %v2241_v32 }
 0x25c   :  { %v2437_v35 = vpop.f32.mrf.mxu1 }
 0x25d   :  { %8628 = vst [vmem:[#allocation4_spill] sm:$0xff] %v7930_v9  ;;  %v7932_v45 = vpack.c.bf16 %v2434_v37, %v2430_v24  ;;  %v2438_v30 = vadd.f32 %v2437_v35, %v8632_v48  ;;  %v8644_v24 = vld [vmem:[#allocation38_spill] sm:$0xff]  ;;  %v8645_v37 = vld [vmem:[#allocation39_spill] sm:$0xff] }
 0x25e   :  { %v2439_v15 = vpop.f32.mrf.mxu1  ;;  %v2078_v35 = vadd.f32 %v8645_v37, %v8644_v24  ;;  %v8661_v24 = vld [vmem:[#allocation64_spill] sm:$0xff] }
 0x25f   :  { %8629 = vst [vmem:[#allocation13_spill] sm:$0xff] %v7932_v45  ;;  %2728 = vmatprep.mubr.bf16.mxu0 %v7932_v45  ;;  %v2440_v8 = vadd.f32 %v2439_v15, %v8634_v28  ;;  %v8646_v15 = vld [vmem:[#allocation58_spill] sm:$0xff]  ;;  %v8651_v28 = vld [vmem:[#allocation40_spill] sm:$0xff] }
 0x260   :  { %v2441_v18 = vpop.f32.mrf.mxu1  ;;  %2729 = vmatmul.mubr.bf16.gmra.mxu0 %v7930_v9  ;;  %v2271_v12 = vadd.f32 %v7698_v43, %v2078_v35  ;;  %v8662_v35 = vld [vmem:[#allocation66_spill] sm:$0xff] }
 0x261   :  { %v2442_v33 = vadd.f32 %v2441_v18, %v8633_v36 }
 0x262   :  { %v2443_v27 = vpop.f32.mrf.mxu1 }
 0x263   :  { %v7948_v0 = vpack.c.bf16 %v2442_v33, %v2438_v30  ;;  %v2444_v22 = vadd.f32 %v2443_v27, %v2251_v31  ;;  %v8648_v31 = vld [vmem:[#allocation59_spill] sm:$0xff] }
 0x264   :  { %v2447_v44 = vpop.f32.mrf.mxu1 }
 0x265   :  { %8635 = vst [vmem:[#allocation3_spill] sm:$0xff] %v7948_v0  ;;  %v7950_v13 = vpack.c.bf16 %v2444_v22, %v2440_v8  ;;  %v2448_v29 = vadd.f32 %v2447_v44, %v8639_v55  ;;  %v8652_v8 = vld [vmem:[#allocation41_spill] sm:$0xff] }
 0x266   :  { %v2449_v63 = vpop.f32.mrf.mxu1  ;;  %v2088_v22 = vadd.f32 %v8652_v8, %v8651_v28  ;;  %v8668_v8 = vld [vmem:[#allocation71_spill] sm:$0xff] }
 0x267   :  { %8636 = vst [vmem:[#allocation8_spill] sm:$0xff] %v7950_v13  ;;  %2736 = vmatprep.mubr.bf16.mxu0 %v7950_v13  ;;  %v2450_v5 = vadd.f32 %v2449_v63, %v8641_v16  ;;  %v8658_v16 = vld [vmem:[#allocation42_spill] sm:$0xff] }
 0x268   :  { %v2451_v3 = vpop.f32.mrf.mxu1  ;;  %2737 = vmatmul.mubr.bf16.gmra.mxu0 %v7948_v0  ;;  %v2281_v44 = vadd.f32 %v7713_v62, %v2088_v22 }
 0x269   :  { %v2452_v57 = vadd.f32 %v2451_v3, %v8640_v47  ;;  %v8655_v3 = vld [vmem:[#allocation62_spill] sm:$0xff] }
 0x26a   :  { %v2453_v32 = vpop.f32.mrf.mxu1 }
 0x26b   :  { %v7963_v1 = vpack.c.bf16 %v2452_v57, %v2448_v29  ;;  %v2454_v20 = vadd.f32 %v2453_v32, %v2261_v4 }
 0x26c   :  { %v2457_v41 = vpop.f32.mrf.mxu1 }
 0x26d   :  { %8642 = vst [vmem:[#allocation10_spill] sm:$0xff] %v7963_v1  ;;  %v7965_v14 = vpack.c.bf16 %v2454_v20, %v2450_v5  ;;  %v2458_v25 = vadd.f32 %v2457_v41, %v8646_v15  ;;  %v8659_v5 = vld [vmem:[#allocation43_spill] sm:$0xff]  ;;  %v8663_v15 = vld [vmem:[#allocation65_spill] sm:$0xff] }
 0x26e   :  { %v2459_v34 = vpop.f32.mrf.mxu1  ;;  %v2098_v20 = vadd.f32 %v8659_v5, %v8658_v16  ;;  %v8660_v41 = vld [vmem:[#allocation67_spill] sm:$0xff]  ;;  %v5669_v5 = vld [vmem:[%s8416_s6 + $0x38] sm:$0xff]  }
 0x26f   :  { %8643 = vst [vmem:[#allocation11_spill] sm:$0xff] %v7965_v14  ;;  %2744 = vmatprep.mubr.bf16.mxu0 %v7965_v14  ;;  %v2460_v48 = vadd.f32 %v2459_v34, %v8648_v31  ;;  %5516 = vmatprep.subr.bf16.mxu0 %v5669_v5 }
 0x270   :  { %v2461_v58 = vpop.f32.mrf.mxu1  ;;  %2745 = vmatmul.mubr.bf16.gmra.mxu0 %v7963_v1  ;;  %v2291_v34 = vadd.f32 %v8660_v41, %v2098_v20  ;;  %v5670_v20 = vld [vmem:[%s8417_s7 + $0x38] sm:$0xff]   ;;  %v5671_v41 = vld [vmem:[%s8416_s6 + $0x30] sm:$0xff]  }
 0x271   :  { %v2462_v23 = vadd.f32 %v2461_v58, %v8647_v56  ;;  %5517 = vmatpush3.bf16.msra.mxu0 %v5669_v5  ;;  %5564 = vmatprep.subr.bf16.mxu1 %v5670_v20 }
 0x272   :  { %v2463_v18 = vpop.f32.mrf.mxu1  ;;  %5518 = vmatprep.subr.bf16.mxu0 %v5671_v41 }
 0x273   :  { %v7975_v30 = vpack.c.bf16 %v2462_v23, %v2458_v25  ;;  %v2464_v36 = vadd.f32 %v2463_v18, %v2271_v12 }
 0x274   :  { %v2467_v33 = vpop.f32.mrf.mxu1 }
 0x275   :  { %8649 = vst [vmem:[#allocation5_spill] sm:$0xff] %v7975_v30  ;;  %v7977_v52 = vpack.c.bf16 %v2464_v36, %v2460_v48  ;;  %v2468_v63 = vadd.f32 %v2467_v33, %v8653_v11  ;;  %v8666_v36 = vld [vmem:[#allocation44_spill] sm:$0xff]  ;;  %v8667_v33 = vld [vmem:[#allocation45_spill] sm:$0xff]  ;;  %v8670_v11 = vld [vmem:[#allocation70_spill] sm:$0xff]  ;;  %5519 = vmatpush3.bf16.msra.mxu0 %v5671_v41 }
 0x276   :  { %v2469_v27 = vpop.f32.mrf.mxu1 }
 0x277   :  { %8650 = vst [vmem:[#allocation9_spill] sm:$0xff] %v7977_v52  ;;  %2752 = vmatprep.mubr.bf16.mxu0 %v7977_v52  ;;  %v2470_v4 = vadd.f32 %v2469_v27, %v8655_v3  ;;  %v2108_v27 = vadd.f32 %v8667_v33, %v8666_v36 }
 0x278   :  { %v2471_v43 = vpop.f32.mrf.mxu1  ;;  %2753 = vmatmul.mubr.bf16.gmra.mxu0 %v7975_v30 }
 0x279   :  { %v2472_v17 = vadd.f32 %v2471_v43, %v8654_v7  ;;  %v2301_v22 = vadd.f32 %v8668_v8, %v2108_v27  ;;  %v8669_v43 = vld [vmem:[#allocation68_spill] sm:$0xff] }
 0x27a   :  { %v2473_v54 = vpop.f32.mrf.mxu1  ;;  %v5672_v27 = vld [vmem:[%s8417_s7 + $0x30] sm:$0xff]  }
 0x27b   :  { %v7987_v55 = vpack.c.bf16 %v2472_v17, %v2468_v63  ;;  %v2474_v29 = vadd.f32 %v2473_v54, %v2281_v44  ;;  %v8671_v17 = vld [vmem:[#allocation69_spill] sm:$0xff] }
 0x27c   :  { %v2477_v47 = vpop.f32.mrf.mxu1 }
 0x27d   :  { %8656 = vst [vmem:[#allocation31_spill] sm:$0xff] %v7987_v55  ;;  %v7989_v57 = vpack.c.bf16 %v2474_v29, %v2470_v4  ;;  %v2478_v37 = vadd.f32 %v2477_v47, %v8661_v24 }
 0x27e   :  { %v2479_v32 = vpop.f32.mrf.mxu1 }
 0x27f   :  { %8657 = vst [vmem:[#allocation7_spill] sm:$0xff] %v7989_v57  ;;  %2760 = vmatprep.mubr.bf16.mxu0 %v7989_v57  ;;  %v2480_v25 = vadd.f32 %v2479_v32, %v8663_v15  ;;  %v5675_v15 = vld [vmem:[%s8416_s6 + $0x20] sm:$0xff]  }
 0x280   :  { %v2481_v62 = vpop.f32.mrf.mxu1  ;;  %2761 = vmatmul.mubr.bf16.gmra.mxu0 %v7987_v55  ;;  %v8150_v57 = vld [vmem:[%s8418_s5] ss:$0 sm:$0xff] }
 0x281   :  { %v2482_v58 = vadd.f32 %v2481_v62, %v8662_v35  ;;  %v5673_v35 = vld [vmem:[%s8416_s6 + $0x28] sm:$0xff]  }
 0x282   :  { %v2483_v12 = vpop.f32.mrf.mxu1  ;;  %5520 = vmatprep.subr.bf16.mxu0 %v5673_v35 }
 0x283   :  { %v7999_v56 = vpack.c.bf16 %v2482_v58, %v2478_v37  ;;  %v2484_v23 = vadd.f32 %v2483_v12, %v2291_v34  ;;  %5521 = vmatpush3.bf16.msra.mxu0 %v5673_v35 }
 0x284   :  { %v2487_v18 = vpop.f32.mrf.mxu1  ;;  %5522 = vmatprep.subr.bf16.mxu0 %v5675_v15 }
 0x285   :  { %8664 = vst [vmem:[#allocation28_spill] sm:$0xff] %v7999_v56  ;;  %v8001_v31 = vpack.c.bf16 %v2484_v23, %v2480_v25  ;;  %v2488_v44 = vadd.f32 %v2487_v18, %v8669_v43 }
 0x286   :  { %v2489_v48 = vpop.f32.mrf.mxu1 }
 0x287   :  { %8665 = vst [vmem:[#allocation18_spill] sm:$0xff] %v8001_v31  ;;  %2768 = vmatprep.mubr.bf16.mxu0 %v8001_v31  ;;  %v2490_v54 = vadd.f32 %v2489_v48, %v8671_v17  ;;  %5523 = vmatpush3.bf16.msra.mxu0 %v5675_v15  ;;  %v5676_v17 = vld [vmem:[%s8417_s7 + $0x20] sm:$0xff]  }
 0x288   :  { %v2491_v28 = vpop.f32.mrf.mxu1  ;;  %2769 = vmatmul.mubr.bf16.gmra.mxu0 %v7999_v56 }
 0x289   :  { %v2492_v63 = vadd.f32 %v2491_v28, %v8670_v11 }
 0x28a   :  { %v2493_v7 = vpop.f32.mrf.mxu1 }
 0x28b   :  { %v8011_v3 = vpack.c.bf16 %v2492_v63, %v2488_v44  ;;  %v2494_v4 = vadd.f32 %v2493_v7, %v2301_v22  ;;  %v5674_v22 = vld [vmem:[%s8417_s7 + $0x28] sm:$0xff]  }
 0x28d   :  { %8672 = vst [vmem:[#allocation19_spill] sm:$0xff] %v8011_v3  ;;  %v8013_v29 = vpack.c.bf16 %v2494_v4, %v2490_v54 }
 0x28f   :  { %8673 = vst [vmem:[#allocation14_spill] sm:$0xff] %v8013_v29  ;;  %2776 = vmatprep.mubr.bf16.mxu0 %v8013_v29 }
 0x290   :  { %2777 = vmatmul.mubr.bf16.gmra.mxu0 %v8011_v3 }
 0x2d8   :  { %v5140_v47 = vpop.f32.mrf.mxu0 }
 0x2da   :  { %v5141_v32 = vpop.f32.mrf.mxu0 }
 0x2db   :  { %v5142_v34 = vadd.f32 %v5141_v32, %v5140_v47 }
 0x2dc   :  { %v5143_v16 = vpop.f32.mrf.mxu0 }
 0x2de   :  { %v5144_v62 = vpop.f32.mrf.mxu0 }
 0x2df   :  { %v5145_v24 = vadd.f32 %v5144_v62, %v5143_v16 }
 0x2e0   :  { %v5146_v37 = vpop.f32.mrf.mxu0 }
 0x2e1   :  { %v2785_v58 = vpack.c.bf16 %v5145_v24, %v5142_v34 }
 0x2e2   :  { %v5147_v12 = vpop.f32.mrf.mxu0 }
 0x2e3   :  { %5484 = vmatprep.mubr.msk.bf16.mxu1 %vm2841_vm0, %v2785_v58  ;;  %v5148_v18 = vadd.f32 %v5147_v12, %v5146_v37 }
 0x2e4   :  { %v5149_v25 = vpop.f32.mrf.mxu0 }
 0x2e6   :  { %v5150_v23 = vpop.f32.mrf.mxu0 }
 0x2e7   :  { %v5151_v48 = vadd.f32 %v5150_v23, %v5149_v25 }
 0x2e8   :  { %v5152_v36 = vpop.f32.mrf.mxu0 }
 0x2e9   :  { %v2786_v33 = vpack.c.bf16 %v5151_v48, %v5148_v18 }
 0x2ea   :  { %v5153_v28 = vpop.f32.mrf.mxu0 }
 0x2eb   :  { %5485 = vmatmul.mubr.msk.bf16.vlgmr.msra.gmra.mxu1 %vm2841_vm0, %v2786_v33  ;;  %v5154_v44 = vadd.f32 %v5153_v28, %v5152_v36 }
 0x2ec   :  { %v5155_v8 = vpop.f32.mrf.mxu0  ;;  %5565 = vmatpush3.bf16.msra.mxu1 %v5670_v20 }
 0x2ed   :  { %5566 = vmatprep.subr.bf16.mxu1 %v5672_v27 }
 0x2ee   :  { %v5156_v43 = vpop.f32.mrf.mxu0 }
 0x2ef   :  { %v5157_v11 = vadd.f32 %v5156_v43, %v5155_v8 }
 0x2f0   :  { %v5158_v63 = vpop.f32.mrf.mxu0  ;;  %5567 = vmatpush3.bf16.msra.mxu1 %v5672_v27 }
 0x2f1   :  { %v2787_v7 = vpack.c.bf16 %v5157_v11, %v5154_v44  ;;  %5568 = vmatprep.subr.bf16.mxu1 %v5674_v22 }
 0x2f2   :  { %v5159_v54 = vpop.f32.mrf.mxu0 }
 0x2f3   :  { %5488 = vmatprep.mubr.msk.bf16.mxu1 %vm2841_vm0, %v2787_v7  ;;  %v5160_v32 = vadd.f32 %v5159_v54, %v5158_v63 }
 0x2f4   :  { %v5161_v4 = vpop.f32.mrf.mxu0  ;;  %5569 = vmatpush3.bf16.msra.mxu1 %v5674_v22 }
 0x2f5   :  { %5570 = vmatprep.subr.bf16.mxu1 %v5676_v17 }
 0x2f6   :  { %v5162_v47 = vpop.f32.mrf.mxu0 }
 0x2f7   :  { %v5163_v16 = vadd.f32 %v5162_v47, %v5161_v4 }
 0x2f8   :  { %v5164_v5 = vpop.f32.mrf.mxu0  ;;  %5571 = vmatpush3.bf16.msra.mxu1 %v5676_v17 }
 0x2f9   :  { %v2788_v20 = vpack.c.bf16 %v5163_v16, %v5160_v32 }
 0x2fa   :  { %v5165_v62 = vpop.f32.mrf.mxu0 }
 0x2fb   :  { %5489 = vmatmul.mubr.msk.bf16.gmra.mxu1 %vm2841_vm0, %v2788_v20  ;;  %v5166_v24 = vadd.f32 %v5165_v62, %v5164_v5 }
 0x2fc   :  { %v5167_v41 = vpop.f32.mrf.mxu0 }
 0x2fe   :  { %v5168_v34 = vpop.f32.mrf.mxu0 }
 0x2ff   :  { %v5169_v37 = vadd.f32 %v5168_v34, %v5167_v41 }
 0x300   :  { %v5170_v35 = vpop.f32.mrf.mxu0 }
 0x301   :  { %v2789_v58 = vpack.c.bf16 %v5169_v37, %v5166_v24 }
 0x302   :  { %v5171_v12 = vpop.f32.mrf.mxu0 }
 0x303   :  { %5492 = vmatprep.mubr.msk.bf16.mxu1 %vm2841_vm0, %v2789_v58  ;;  %v5172_v23 = vadd.f32 %v5171_v12, %v5170_v35 }
 0x304   :  { %v5173_v15 = vpop.f32.mrf.mxu0 }
 0x306   :  { %v5174_v25 = vpop.f32.mrf.mxu0 }
 0x307   :  { %v5175_v18 = vadd.f32 %v5174_v25, %v5173_v15 }
 0x308   :  { %v5176_v48 = vpop.f32.mrf.mxu0 }
 0x309   :  { %v2790_v36 = vpack.c.bf16 %v5175_v18, %v5172_v23  ;;  %v5677_v23 = vld [vmem:[%s8416_s6 + $0x18] sm:$0xff]  }
 0x30a   :  { %v5177_v33 = vpop.f32.mrf.mxu0  ;;  %v5678_v18 = vld [vmem:[%s8417_s7 + $0x18] sm:$0xff]   ;;  %5524 = vmatprep.subr.bf16.mxu0 %v5677_v23 }
 0x30b   :  { %5493 = vmatmul.mubr.msk.bf16.gmra.mxu1 %vm2841_vm0, %v2790_v36  ;;  %v5178_v8 = vadd.f32 %v5177_v33, %v5176_v48  ;;  %v8057_v36 = vpop.f32.mrf.mxu1  ;;  %5572 = vmatprep.subr.bf16.mxu1 %v5678_v18 }
 0x30c   :  { %v5179_v27 = vpop.f32.mrf.mxu0  ;;  %5525 = vmatpush3.bf16.msra.mxu0 %v5677_v23  ;;  %5573 = vmatpush3.bf16.msra.mxu1 %v5678_v18 }
 0x30e   :  { %v5180_v28 = vpop.f32.mrf.mxu0 }
 0x30f   :  { %v5181_v22 = vadd.f32 %v5180_v28, %v5179_v27  ;;  %v5679_v27 = vld [vmem:[%s8416_s6 + $0x10] sm:$0xff]  }
 0x310   :  { %v5182_v43 = vpop.f32.mrf.mxu0  ;;  %v5680_v28 = vld [vmem:[%s8417_s7 + $0x10] sm:$0xff]   ;;  %5526 = vmatprep.subr.bf16.mxu0 %v5679_v27 }
 0x311   :  { %v2791_v44 = vpack.c.bf16 %v5181_v22, %v5178_v8  ;;  %5574 = vmatprep.subr.bf16.mxu1 %v5680_v28  ;;  %5527 = vmatpush3.bf16.msra.mxu0 %v5679_v27 }
 0x312   :  { %v5183_v11 = vpop.f32.mrf.mxu0  ;;  %5575 = vmatpush3.bf16.msra.mxu1 %v5680_v28 }
 0x313   :  { %5496 = vmatprep.mubr.msk.bf16.mxu1 %vm2841_vm0, %v2791_v44  ;;  %v5184_v17 = vadd.f32 %v5183_v11, %v5182_v43  ;;  %v8065_v44 = vpop.f32.mrf.mxu1 }
 0x314   :  { %v5185_v63 = vpop.f32.mrf.mxu0 }
 0x316   :  { %v5186_v7 = vpop.f32.mrf.mxu0 }
 0x317   :  { %v5187_v54 = vadd.f32 %v5186_v7, %v5185_v63  ;;  %v5681_v7 = vld [vmem:[%s8416_s6 + $0x8] sm:$0xff]  }
 0x318   :  { %v5188_v4 = vpop.f32.mrf.mxu0  ;;  %5528 = vmatprep.subr.bf16.mxu0 %v5681_v7 }
 0x319   :  { %v2792_v47 = vpack.c.bf16 %v5187_v54, %v5184_v17  ;;  %v5682_v17 = vld [vmem:[%s8417_s7 + $0x8] sm:$0xff]   ;;  %5529 = vmatpush3.bf16.msra.mxu0 %v5681_v7 }
 0x31a   :  { %v5189_v32 = vpop.f32.mrf.mxu0  ;;  %5576 = vmatprep.subr.bf16.mxu1 %v5682_v17 }
 0x31b   :  { %5497 = vmatmul.mubr.msk.bf16.gmra.mxu1 %vm2841_vm0, %v2792_v47  ;;  %v5190_v20 = vadd.f32 %v5189_v32, %v5188_v4  ;;  %v8074_v4 = vpop.f32.mrf.mxu1  ;;  %v5683_v32 = vld [vmem:[%s8416_s6] sm:$0xff]  }
 0x31c   :  { %v5191_v16 = vpop.f32.mrf.mxu0  ;;  %5577 = vmatpush3.bf16.msra.mxu1 %v5682_v17  ;;  %5530 = vmatprep.subr.bf16.mxu0 %v5683_v32 }
 0x31d   :  { %5531 = vmatpush3.bf16.msra.mxu0 %v5683_v32 }
 0x31e   :  { %v5192_v5 = vpop.f32.mrf.mxu0 }
 0x31f   :  { %v5193_v62 = vadd.f32 %v5192_v5, %v5191_v16  ;;  %v5684_v16 = vld [vmem:[%s8417_s7] sm:$0xff]  }
 0x320   :  { %v5194_v41 = vpop.f32.mrf.mxu0  ;;  %5578 = vmatprep.subr.bf16.mxu1 %v5684_v16 }
 0x321   :  { %v2793_v34 = vpack.c.bf16 %v5193_v62, %v5190_v20  ;;  %5579 = vmatpush3.bf16.msra.mxu1 %v5684_v16 }
 0x322   :  { %v5195_v24 = vpop.f32.mrf.mxu0 }
 0x323   :  { %5500 = vmatprep.mubr.msk.bf16.mxu1 %vm2841_vm0, %v2793_v34  ;;  %v5196_v58 = vadd.f32 %v5195_v24, %v5194_v41  ;;  %v8082_v41 = vpop.f32.mrf.mxu1 }
 0x324   :  { %v5197_v37 = vpop.f32.mrf.mxu0 }
 0x326   :  { %v5198_v35 = vpop.f32.mrf.mxu0 }
 0x327   :  { %v5199_v12 = vadd.f32 %v5198_v35, %v5197_v37  ;;  %v8085_v35 = vpop.f32.mrf.mxu1 }
 0x328   :  { %v5200_v15 = vpop.f32.mrf.mxu0 }
 0x329   :  { %v2794_v25 = vpack.c.bf16 %v5199_v12, %v5196_v58  ;;  %v8087_v23 = vpop.f32.mrf.mxu1 }
 0x32a   :  { %v5201_v48 = vpop.f32.mrf.mxu0 }
 0x32b   :  { %5501 = vmatmul.mubr.msk.bf16.gmra.mxu1 %vm2841_vm0, %v2794_v25  ;;  %v5202_v22 = vadd.f32 %v5201_v48, %v5200_v15  ;;  %v8090_v27 = vpop.f32.mrf.mxu1 }
 0x32c   :  { %v5203_v33 = vpop.f32.mrf.mxu0 }
 0x32e   :  { %v5204_v8 = vpop.f32.mrf.mxu0 }
 0x32f   :  { %v5205_v43 = vadd.f32 %v5204_v8, %v5203_v33 }
 0x330   :  { %v5206_v11 = vpop.f32.mrf.mxu0 }
 0x331   :  { %v2795_v63 = vpack.c.bf16 %v5205_v43, %v5202_v22 }
 0x332   :  { %v5207_v54 = vpop.f32.mrf.mxu0 }
 0x333   :  { %5504 = vmatprep.mubr.msk.bf16.mxu1 %vm2841_vm0, %v2795_v63  ;;  %v5208_v20 = vadd.f32 %v5207_v54, %v5206_v11  ;;  %v8092_v11 = vpop.f32.mrf.mxu1 }
 0x334   :  { %v5209_v47 = vpop.f32.mrf.mxu0 }
 0x335   :  { %v8095_v54 = vpop.f32.mrf.mxu1 }
 0x336   :  { %v5210_v5 = vpop.f32.mrf.mxu0 }
 0x337   :  { %v5211_v62 = vadd.f32 %v5210_v5, %v5209_v47 }
 0x338   :  { %v5212_v34 = vpop.f32.mrf.mxu0 }
 0x339   :  { %v2796_v24 = vpack.c.bf16 %v5211_v62, %v5208_v20  ;;  %v8097_v20 = vpop.f32.mrf.mxu1 }
 0x33a   :  { %v5213_v37 = vpop.f32.mrf.mxu0 }
 0x33b   :  { %5505 = vmatmul.mubr.msk.bf16.gmra.mxu1 %vm2841_vm0, %v2796_v24  ;;  %v5214_v15 = vadd.f32 %v5213_v37, %v5212_v34  ;;  %v8100_v37 = vpop.f32.mrf.mxu1 }
 0x33c   :  { %v5215_v58 = vpop.f32.mrf.mxu0 }
 0x33e   :  { %v5216_v12 = vpop.f32.mrf.mxu0 }
 0x33f   :  { %v5217_v25 = vadd.f32 %v5216_v12, %v5215_v58 }
 0x340   :  { %v5218_v18 = vpop.f32.mrf.mxu0 }
 0x341   :  { %v2797_v48 = vpack.c.bf16 %v5217_v25, %v5214_v15 }
 0x342   :  { %v5219_v33 = vpop.f32.mrf.mxu0 }
 0x343   :  { %5508 = vmatprep.mubr.msk.bf16.mxu1 %vm2841_vm0, %v2797_v48  ;;  %v5220_v22 = vadd.f32 %v5219_v33, %v5218_v18  ;;  %v8102_v18 = vpop.f32.mrf.mxu1 }
 0x344   :  { %v5221_v28 = vpop.f32.mrf.mxu0 }
 0x345   :  { %v8105_v33 = vpop.f32.mrf.mxu1 }
 0x346   :  { %v5222_v8 = vpop.f32.mrf.mxu0 }
 0x347   :  { %v5223_v43 = vadd.f32 %v5222_v8, %v5221_v28  ;;  %v8107_v28 = vpop.f32.mrf.mxu1 }
 0x348   :  { %v5224_v63 = vpop.f32.mrf.mxu0 }
 0x349   :  { %v2798_v7 = vpack.c.bf16 %v5223_v43, %v5220_v22  ;;  %v8109_v8 = vpop.f32.mrf.mxu1 }
 0x34a   :  { %v5225_v17 = vpop.f32.mrf.mxu0 }
 0x34b   :  { %5509 = vmatmul.mubr.msk.bf16.gmra.mxu1 %vm2841_vm0, %v2798_v7  ;;  %v5226_v16 = vadd.f32 %v5225_v17, %v5224_v63  ;;  %v8111_v22 = vpop.f32.mrf.mxu1 }
 0x34c   :  { %v5227_v47 = vpop.f32.mrf.mxu0 }
 0x34d   :  { %v8113_v43 = vpop.f32.mrf.mxu1 }
 0x34e   :  { %v5228_v32 = vpop.f32.mrf.mxu0 }
 0x34f   :  { %v5229_v5 = vadd.f32 %v5228_v32, %v5227_v47  ;;  %v8115_v63 = vpop.f32.mrf.mxu1 }
 0x350   :  { %v5230_v62 = vpop.f32.mrf.mxu0 }
 0x351   :  { %v2799_v34 = vpack.c.bf16 %v5229_v5, %v5226_v16  ;;  %v8117_v7 = vpop.f32.mrf.mxu1 }
 0x352   :  { %v5231_v24 = vpop.f32.mrf.mxu0 }
 0x353   :  { %5512 = vmatprep.mubr.msk.bf16.mxu1 %vm2841_vm0, %v2799_v34  ;;  %v5232_v15 = vadd.f32 %v5231_v24, %v5230_v62  ;;  %v8119_v17 = vpop.f32.mrf.mxu1 }
 0x354   :  { %v5233_v58 = vpop.f32.mrf.mxu0 }
 0x355   :  { %v8121_v47 = vpop.f32.mrf.mxu1 }
 0x356   :  { %v5234_v12 = vpop.f32.mrf.mxu0 }
 0x357   :  { %v5235_v25 = vadd.f32 %v5234_v12, %v5233_v58  ;;  %v8123_v32 = vpop.f32.mrf.mxu1 }
 0x359   :  { %v2800_v48 = vpack.c.bf16 %v5235_v25, %v5232_v15  ;;  %v8125_v16 = vpop.f32.mrf.mxu1 }
 0x35b   :  { %5513 = vmatmul.mubr.msk.bf16.gmra.mxu1 %vm2841_vm0, %v2800_v48  ;;  %v8127_v5 = vpop.f32.mrf.mxu1 }
 0x35d   :  { %v8129_v62 = vpop.f32.mrf.mxu1 }
 0x35f   :  { %v8131_v34 = vpop.f32.mrf.mxu1 }
 0x361   :  { %v8133_v24 = vpop.f32.mrf.mxu1 }
 0x363   :  { %v8135_v58 = vpop.f32.mrf.mxu1 }
 0x365   :  { %v8137_v12 = vpop.f32.mrf.mxu1 }
 0x367   :  { %v8139_v15 = vpop.f32.mrf.mxu1 }
 0x369   :  { %v8141_v25 = vpop.f32.mrf.mxu1 }
 0x36b   :  { %v8143_v48 = vpop.f32.mrf.mxu1 }
 0x3ab   :  { %v5486_v3 = vpop.f32.mrf.mxu1 }
 0x3ac   :  { %v3166_v31 = vadd.f32 %v5486_v3, %v8057_v36 }
 0x3ad   :  { %v3157_v29 = vpop.f32.mrf.mxu1 }
 0x3ae   :  { %v3158_v56 = vadd.f32 %v3157_v29, %v8065_v44  ;;  %v3293_v13 = vadd.f32 %v8150_v57, %v3166_v31 }
 0x3af   :  { %v5487_v55 = vpop.f32.mrf.mxu1 }
 0x3b0   :  { %v3169_v30 = vadd.f32 %v5487_v55, %v8074_v4  ;;  %v3291_v1 = vadd.f32 %v8150_v57, %v3158_v56  ;;  %v3325_v9 = vmax.f32 %v3293_v13, 0.0 }
 0x3b1   :  { %v3160_v52 = vpop.f32.mrf.mxu1 }
 0x3b2   :  { %v3294_v14 = vadd.f32 %v8150_v57, %v3169_v30  ;;  %v3161_v0 = vadd.f32 %v3160_v52, %v8082_v41  ;;  %v3323_v36 = vmax.f32 %v3291_v1, 0.0 }
 0x3b4   :  { %v3292_v29 = vadd.f32 %v8150_v57, %v3161_v0  ;;  %v3326_v3 = vmax.f32 %v3294_v14, 0.0 }
 0x3b6   :  { %v3324_v44 = vmax.f32 %v3292_v29, 0.0  ;;  %v3356_v21 = vpack.c.bf16 %v3326_v3, %v3325_v9 }
 0x3b8   :  { %v3355_v45 = vpack.c.bf16 %v3324_v44, %v3323_v36 }
 0x3ba   :  { %5532 = vmatprep.mubr.bf16.mxu0 %v3355_v45  ;;  %5580 = vmatprep.mubr.bf16.mxu1 %v3355_v45 }
 0x3bb   :  { %v5490_v55 = vpop.f32.mrf.mxu1  ;;  %5533 = vmatmul.mubr.bf16.vlgmr.msra.gmra.mxu0 %v3356_v21  ;;  %5581 = vmatmul.mubr.bf16.vlgmr.msra.gmra.mxu1 %v3356_v21 }
 0x3bc   :  { %v3182_v52 = vadd.f32 %v5490_v55, %v8085_v35 }
 0x3bd   :  { %v3173_v56 = vpop.f32.mrf.mxu1 }
 0x3be   :  { %v3174_v30 = vadd.f32 %v3173_v56, %v8087_v23  ;;  %v3297_v45 = vadd.f32 %v8150_v57, %v3182_v52 }
 0x3bf   :  { %v5491_v4 = vpop.f32.mrf.mxu1 }
 0x3c0   :  { %v3185_v31 = vadd.f32 %v5491_v4, %v8090_v27  ;;  %v3295_v1 = vadd.f32 %v8150_v57, %v3174_v30  ;;  %v3329_v23 = vmax.f32 %v3297_v45, 0.0 }
 0x3c1   :  { %v3176_v0 = vpop.f32.mrf.mxu1 }
 0x3c2   :  { %v3298_v13 = vadd.f32 %v8150_v57, %v3185_v31  ;;  %v3177_v9 = vadd.f32 %v3176_v0, %v8092_v11  ;;  %v3327_v41 = vmax.f32 %v3295_v1, 0.0 }
 0x3c4   :  { %v3296_v14 = vadd.f32 %v8150_v57, %v3177_v9  ;;  %v3330_v21 = vmax.f32 %v3298_v13, 0.0 }
 0x3c6   :  { %v3328_v29 = vmax.f32 %v3296_v14, 0.0  ;;  %v3358_v35 = vpack.c.bf16 %v3330_v21, %v3329_v23 }
 0x3c8   :  { %v3357_v3 = vpack.c.bf16 %v3328_v29, %v3327_v41 }
 0x3ca   :  { %5536 = vmatprep.mubr.bf16.mxu0 %v3357_v3  ;;  %5584 = vmatprep.mubr.bf16.mxu1 %v3357_v3 }
 0x3cb   :  { %v5494_v27 = vpop.f32.mrf.mxu1  ;;  %5537 = vmatmul.mubr.bf16.gmra.mxu0 %v3358_v35  ;;  %5585 = vmatmul.mubr.bf16.gmra.mxu1 %v3358_v35 }
 0x3cc   :  { %v3198_v11 = vadd.f32 %v5494_v27, %v8095_v54 }
 0x3cd   :  { %v3189_v36 = vpop.f32.mrf.mxu1 }
 0x3ce   :  { %v3190_v44 = vadd.f32 %v3189_v36, %v8097_v20  ;;  %v3301_v0 = vadd.f32 %v8150_v57, %v3198_v11 }
 0x3cf   :  { %v5495_v55 = vpop.f32.mrf.mxu1 }
 0x3d0   :  { %v3201_v56 = vadd.f32 %v5495_v55, %v8100_v37  ;;  %v3299_v52 = vadd.f32 %v8150_v57, %v3190_v44  ;;  %v3333_v20 = vmax.f32 %v3301_v0, 0.0 }
 0x3d1   :  { %v3192_v30 = vpop.f32.mrf.mxu1 }
 0x3d2   :  { %v3302_v4 = vadd.f32 %v8150_v57, %v3201_v56  ;;  %v3193_v31 = vadd.f32 %v3192_v30, %v8102_v18  ;;  %v3331_v9 = vmax.f32 %v3299_v52, 0.0 }
 0x3d4   :  { %v3300_v1 = vadd.f32 %v8150_v57, %v3193_v31  ;;  %v3334_v13 = vmax.f32 %v3302_v4, 0.0 }
 0x3d6   :  { %v3332_v45 = vmax.f32 %v3300_v1, 0.0  ;;  %v3360_v54 = vpack.c.bf16 %v3334_v13, %v3333_v20 }
 0x3d8   :  { %v3359_v14 = vpack.c.bf16 %v3332_v45, %v3331_v9 }
 0x3da   :  { %5540 = vmatprep.mubr.bf16.mxu0 %v3359_v14  ;;  %5588 = vmatprep.mubr.bf16.mxu1 %v3359_v14 }
 0x3db   :  { %v5498_v37 = vpop.f32.mrf.mxu1  ;;  %5541 = vmatmul.mubr.bf16.gmra.mxu0 %v3360_v54  ;;  %5589 = vmatmul.mubr.bf16.gmra.mxu1 %v3360_v54 }
 0x3dc   :  { %v3214_v18 = vadd.f32 %v5498_v37, %v8105_v33 }
 0x3dd   :  { %v3205_v21 = vpop.f32.mrf.mxu1 }
 0x3de   :  { %v3206_v41 = vadd.f32 %v3205_v21, %v8107_v28  ;;  %v3305_v44 = vadd.f32 %v8150_v57, %v3214_v18 }
 0x3df   :  { %v5499_v29 = vpop.f32.mrf.mxu1 }
 0x3e0   :  { %v3217_v23 = vadd.f32 %v5499_v29, %v8109_v8  ;;  %v3303_v35 = vadd.f32 %v8150_v57, %v3206_v41  ;;  %v3337_v28 = vmax.f32 %v3305_v44, 0.0 }
 0x3e1   :  { %v3208_v3 = vpop.f32.mrf.mxu1 }
 0x3e2   :  { %v3306_v27 = vadd.f32 %v8150_v57, %v3217_v23  ;;  %v3209_v36 = vadd.f32 %v3208_v3, %v8111_v22  ;;  %v3335_v56 = vmax.f32 %v3303_v35, 0.0 }
 0x3e4   :  { %v3304_v11 = vadd.f32 %v8150_v57, %v3209_v36  ;;  %v3338_v55 = vmax.f32 %v3306_v27, 0.0 }
 0x3e6   :  { %v3336_v30 = vmax.f32 %v3304_v11, 0.0  ;;  %v3362_v33 = vpack.c.bf16 %v3338_v55, %v3337_v28 }
 0x3e8   :  { %v3361_v52 = vpack.c.bf16 %v3336_v30, %v3335_v56 }
 0x3ea   :  { %5544 = vmatprep.mubr.bf16.mxu0 %v3361_v52  ;;  %5592 = vmatprep.mubr.bf16.mxu1 %v3361_v52 }
 0x3eb   :  { %v5502_v8 = vpop.f32.mrf.mxu1  ;;  %5545 = vmatmul.mubr.bf16.gmra.mxu0 %v3362_v33  ;;  %5593 = vmatmul.mubr.bf16.gmra.mxu1 %v3362_v33 }
 0x3ec   :  { %v3230_v22 = vadd.f32 %v5502_v8, %v8113_v43 }
 0x3ed   :  { %v3221_v4 = vpop.f32.mrf.mxu1 }
 0x3ee   :  { %v3222_v31 = vadd.f32 %v3221_v4, %v8115_v63  ;;  %v3309_v14 = vadd.f32 %v8150_v57, %v3230_v22 }
 0x3ef   :  { %v5503_v0 = vpop.f32.mrf.mxu1 }
 0x3f0   :  { %v3233_v1 = vadd.f32 %v5503_v0, %v8117_v7  ;;  %v3307_v9 = vadd.f32 %v8150_v57, %v3222_v31  ;;  %v3341_v63 = vmax.f32 %v3309_v14, 0.0 }
 0x3f1   :  { %v3224_v13 = vpop.f32.mrf.mxu1 }
 0x3f2   :  { %v3310_v45 = vadd.f32 %v8150_v57, %v3233_v1  ;;  %v3225_v20 = vadd.f32 %v3224_v13, %v8119_v17  ;;  %v3339_v21 = vmax.f32 %v3307_v9, 0.0 }
 0x3f4   :  { %v3308_v54 = vadd.f32 %v8150_v57, %v3225_v20  ;;  %v3342_v37 = vmax.f32 %v3310_v45, 0.0 }
 0x3f6   :  { %v3340_v41 = vmax.f32 %v3308_v54, 0.0  ;;  %v3364_v43 = vpack.c.bf16 %v3342_v37, %v3341_v63 }
 0x3f8   :  { %v3363_v18 = vpack.c.bf16 %v3340_v41, %v3339_v21 }
 0x3fa   :  { %5548 = vmatprep.mubr.bf16.mxu0 %v3363_v18  ;;  %5596 = vmatprep.mubr.bf16.mxu1 %v3363_v18 }
 0x3fb   :  { %v5506_v7 = vpop.f32.mrf.mxu1  ;;  %5549 = vmatmul.mubr.bf16.gmra.mxu0 %v3364_v43  ;;  %5597 = vmatmul.mubr.bf16.gmra.mxu1 %v3364_v43 }
 0x3fc   :  { %v3246_v17 = vadd.f32 %v5506_v7, %v8121_v47 }
 0x3fd   :  { %v3237_v29 = vpop.f32.mrf.mxu1 }
 0x3fe   :  { %v3238_v23 = vadd.f32 %v3237_v29, %v8123_v32  ;;  %v3313_v55 = vadd.f32 %v8150_v57, %v3246_v17 }
 0x3ff   :  { %v5507_v3 = vpop.f32.mrf.mxu1 }
 0x400   :  { %v3249_v35 = vadd.f32 %v5507_v3, %v8125_v16  ;;  %v3311_v36 = vadd.f32 %v8150_v57, %v3238_v23  ;;  %v3345_v32 = vmax.f32 %v3313_v55, 0.0 }
 0x401   :  { %v3240_v27 = vpop.f32.mrf.mxu1 }
 0x402   :  { %v3314_v44 = vadd.f32 %v8150_v57, %v3249_v35  ;;  %v3241_v11 = vadd.f32 %v3240_v27, %v8127_v5  ;;  %v3343_v28 = vmax.f32 %v3311_v36, 0.0 }
 0x404   :  { %v3312_v56 = vadd.f32 %v8150_v57, %v3241_v11  ;;  %v3346_v30 = vmax.f32 %v3314_v44, 0.0 }
 0x406   :  { %v3344_v52 = vmax.f32 %v3312_v56, 0.0  ;;  %v3366_v47 = vpack.c.bf16 %v3346_v30, %v3345_v32 }
 0x408   :  { %v3365_v33 = vpack.c.bf16 %v3344_v52, %v3343_v28 }
 0x40a   :  { %5552 = vmatprep.mubr.bf16.mxu0 %v3365_v33  ;;  %5600 = vmatprep.mubr.bf16.mxu1 %v3365_v33 }
 0x40b   :  { %v5510_v16 = vpop.f32.mrf.mxu1  ;;  %5553 = vmatmul.mubr.bf16.gmra.mxu0 %v3366_v47  ;;  %5601 = vmatmul.mubr.bf16.gmra.mxu1 %v3366_v47 }
 0x40c   :  { %v3262_v5 = vadd.f32 %v5510_v16, %v8129_v62 }
 0x40d   :  { %v3253_v8 = vpop.f32.mrf.mxu1 }
 0x40e   :  { %v3254_v4 = vadd.f32 %v3253_v8, %v8131_v34  ;;  %v3317_v45 = vadd.f32 %v8150_v57, %v3262_v5 }
 0x40f   :  { %v5511_v31 = vpop.f32.mrf.mxu1 }
 0x410   :  { %v3265_v22 = vadd.f32 %v5511_v31, %v8133_v24  ;;  %v3315_v1 = vadd.f32 %v8150_v57, %v3254_v4  ;;  %v3349_v34 = vmax.f32 %v3317_v45, 0.0 }
 0x411   :  { %v3256_v0 = vpop.f32.mrf.mxu1 }
 0x412   :  { %v3318_v13 = vadd.f32 %v8150_v57, %v3265_v22  ;;  %v3257_v9 = vadd.f32 %v3256_v0, %v8135_v58  ;;  %v3347_v54 = vmax.f32 %v3315_v1, 0.0 }
 0x414   :  { %v3316_v20 = vadd.f32 %v8150_v57, %v3257_v9  ;;  %v3350_v14 = vmax.f32 %v3318_v13, 0.0 }
 0x416   :  { %v3348_v37 = vmax.f32 %v3316_v20, 0.0  ;;  %v3368_v62 = vpack.c.bf16 %v3350_v14, %v3349_v34 }
 0x418   :  { %v3367_v21 = vpack.c.bf16 %v3348_v37, %v3347_v54 }
 0x41a   :  { %5556 = vmatprep.mubr.bf16.mxu0 %v3367_v21  ;;  %5604 = vmatprep.mubr.bf16.mxu1 %v3367_v21 }
 0x41b   :  { %v5514_v24 = vpop.f32.mrf.mxu1  ;;  %5557 = vmatmul.mubr.bf16.gmra.mxu0 %v3368_v62  ;;  %5605 = vmatmul.mubr.bf16.gmra.mxu1 %v3368_v62 }
 0x41c   :  { %v3278_v58 = vadd.f32 %v5514_v24, %v8137_v12 }
 0x41d   :  { %v3269_v41 = vpop.f32.mrf.mxu1 }
 0x41e   :  { %v3270_v63 = vadd.f32 %v3269_v41, %v8139_v15  ;;  %v3321_v3 = vadd.f32 %v8150_v57, %v3278_v58 }
 0x41f   :  { %v5515_v18 = vpop.f32.mrf.mxu1 }
 0x420   :  { %v3281_v43 = vadd.f32 %v5515_v18, %v8141_v25  ;;  %v3319_v29 = vadd.f32 %v8150_v57, %v3270_v63  ;;  %v3353_v15 = vmax.f32 %v3321_v3, 0.0 }
 0x421   :  { %v3272_v7 = vpop.f32.mrf.mxu1 }
 0x422   :  { %v3322_v23 = vadd.f32 %v8150_v57, %v3281_v43  ;;  %v3273_v17 = vadd.f32 %v3272_v7, %v8143_v48  ;;  %v3351_v36 = vmax.f32 %v3319_v29, 0.0 }
 0x424   :  { %v3320_v35 = vadd.f32 %v8150_v57, %v3273_v17  ;;  %v3354_v27 = vmax.f32 %v3322_v23, 0.0 }
 0x426   :  { %v3352_v44 = vmax.f32 %v3320_v35, 0.0  ;;  %v3370_v12 = vpack.c.bf16 %v3354_v27, %v3353_v15 }
 0x428   :  { %v3369_v11 = vpack.c.bf16 %v3352_v44, %v3351_v36 }
 0x42a   :  { %5560 = vmatprep.mubr.bf16.mxu0 %v3369_v11  ;;  %5608 = vmatprep.mubr.bf16.mxu1 %v3369_v11 }
 0x42b   :  { %5561 = vmatmul.mubr.bf16.gmra.mxu0 %v3370_v12  ;;  %5609 = vmatmul.mubr.bf16.gmra.mxu1 %v3370_v12 }
 0x42c   :  { %3869 = vmatprep.mubr.bf16.mxu0 %v7774_v61 }
 0x47b   :  { %v5534_v25 = vpop.f32.mrf.mxu0 }
 0x47d   :  { %v3469_v55 = vpop.f32.mrf.mxu0 }
 0x47f   :  { %v5535_v56 = vpop.f32.mrf.mxu0 }
 0x480   :  { %v3597_v48 = vpack.c.bf16 %v5535_v56, %v5534_v25 }
 0x481   :  { %v3472_v30 = vpop.f32.mrf.mxu0 }
 0x482   :  { %v3596_v28 = vpack.c.bf16 %v3472_v30, %v3469_v55 }
 0x48b   :  { %v5538_v52 = vpop.f32.mrf.mxu0 }
 0x48d   :  { %v3485_v57 = vpop.f32.mrf.mxu0 }
 0x48f   :  { %v5539_v32 = vpop.f32.mrf.mxu0 }
 0x490   :  { %v3599_v33 = vpack.c.bf16 %v5539_v32, %v5538_v52 }
 0x491   :  { %v3488_v47 = vpop.f32.mrf.mxu0 }
 0x492   :  { %v3598_v16 = vpack.c.bf16 %v3488_v47, %v3485_v57 }
 0x49b   :  { %v5542_v8 = vpop.f32.mrf.mxu0 }
 0x49d   :  { %v3501_v4 = vpop.f32.mrf.mxu0 }
 0x49f   :  { %v5543_v5 = vpop.f32.mrf.mxu0 }
 0x4a0   :  { %v3601_v35 = vpack.c.bf16 %v5543_v5, %v5542_v8 }
 0x4a1   :  { %v3504_v31 = vpop.f32.mrf.mxu0 }
 0x4a2   :  { %v3600_v36 = vpack.c.bf16 %v3504_v31, %v3501_v4 }
 0x4ab   :  { %v5546_v22 = vpop.f32.mrf.mxu0 }
 0x4ad   :  { %v3517_v0 = vpop.f32.mrf.mxu0 }
 0x4af   :  { %v5547_v1 = vpop.f32.mrf.mxu0 }
 0x4b0   :  { %v3603_v7 = vpack.c.bf16 %v5547_v1, %v5546_v22 }
 0x4b1   :  { %v3520_v61 = vpop.f32.mrf.mxu0 }
 0x4b2   :  { %v3602_v17 = vpack.c.bf16 %v3520_v61, %v3517_v0 }
 0x4bb   :  { %v5550_v13 = vpop.f32.mrf.mxu0 }
 0x4bd   :  { %v3533_v9 = vpop.f32.mrf.mxu0 }
 0x4bf   :  { %v5551_v45 = vpop.f32.mrf.mxu0 }
 0x4c0   :  { %v3605_v11 = vpack.c.bf16 %v5551_v45, %v5550_v13 }
 0x4c1   :  { %v3536_v20 = vpop.f32.mrf.mxu0 }
 0x4c2   :  { %v3604_v12 = vpack.c.bf16 %v3536_v20, %v3533_v9 }
 0x4cb   :  { %v5554_v14 = vpop.f32.mrf.mxu0 }
 0x4cd   :  { %v3549_v54 = vpop.f32.mrf.mxu0 }
 0x4cf   :  { %v5555_v37 = vpop.f32.mrf.mxu0 }
 0x4d0   :  { %v3607_v44 = vpack.c.bf16 %v5555_v37, %v5554_v14 }
 0x4d1   :  { %v3552_v34 = vpop.f32.mrf.mxu0 }
 0x4d2   :  { %v3606_v15 = vpack.c.bf16 %v3552_v34, %v3549_v54 }
 0x4db   :  { %v5558_v21 = vpop.f32.mrf.mxu0 }
 0x4dd   :  { %v3565_v62 = vpop.f32.mrf.mxu0 }
 0x4df   :  { %v5559_v24 = vpop.f32.mrf.mxu0 }
 0x4e0   :  { %v3609_v3 = vpack.c.bf16 %v5559_v24, %v5558_v21 }
 0x4e1   :  { %v3568_v41 = vpop.f32.mrf.mxu0 }
 0x4e2   :  { %v3608_v27 = vpack.c.bf16 %v3568_v41, %v3565_v62 }
 0x4eb   :  { %v5562_v63 = vpop.f32.mrf.mxu0 }
 0x4ed   :  { %v3581_v58 = vpop.f32.mrf.mxu0 }
 0x4ef   :  { %v5563_v18 = vpop.f32.mrf.mxu0 }
 0x4f0   :  { %v3611_v43 = vpack.c.bf16 %v5563_v18, %v5562_v63 }
 0x4f1   :  { %v3584_v29 = vpop.f32.mrf.mxu0 }
 0x4f2   :  { %v3610_v23 = vpack.c.bf16 %v3584_v29, %v3581_v58  ;;  %5324 = vmatprep.subr.bf16.mxu0 %v3611_v43 }
 0x4f3   :  { %5325 = vmatpush3.bf16.msra.mxu0 %v3603_v7 }
 0x4f4   :  { %5326 = vmatprep.subr.bf16.mxu0 %v3610_v23 }
 0x4f7   :  { %5327 = vmatpush3.bf16.msra.mxu0 %v3602_v17 }
 0x4f8   :  { %5328 = vmatprep.subr.bf16.mxu0 %v3609_v3 }
 0x4fb   :  { %5329 = vmatpush3.bf16.msra.mxu0 %v3601_v35 }
 0x4fc   :  { %5330 = vmatprep.subr.bf16.mxu0 %v3608_v27 }
 0x4ff   :  { %5331 = vmatpush3.bf16.msra.mxu0 %v3600_v36 }
 0x500   :  { %5332 = vmatprep.subr.bf16.mxu0 %v3607_v44 }
 0x503   :  { %5333 = vmatpush3.bf16.msra.mxu0 %v3599_v33 }
 0x504   :  { %5334 = vmatprep.subr.bf16.mxu0 %v3606_v15 }
 0x507   :  { %5335 = vmatpush3.bf16.msra.mxu0 %v3598_v16 }
 0x508   :  { %5336 = vmatprep.subr.bf16.mxu0 %v3605_v11 }
 0x50b   :  { %5337 = vmatpush3.bf16.msra.mxu0 %v3597_v48 }
 0x50c   :  { %5338 = vmatprep.subr.bf16.mxu0 %v3604_v12 }
 0x50f   :  { %5339 = vmatpush3.bf16.msra.mxu0 %v3596_v28  ;;  %v8249_v28 = vld [vmem:[%s8419_s8] ss:$0 sm:$0xff] }
 0x512   :  { %3870 = vmatmul.mubr.bf16.vlgmr.msra.gmra.mxu0 %v7769_v26  ;;  %v8674_v26 = vld [vmem:[#allocation2_spill] sm:$0xff] }
 0x513   :  { %3877 = vmatprep.mubr.bf16.mxu0 %v7793_v38  ;;  %v8676_v38 = vld [vmem:[#allocation4_spill] sm:$0xff] }
 0x51a   :  { %3878 = vmatmul.mubr.bf16.gmra.mxu0 %v7791_v59  ;;  %v8675_v59 = vld [vmem:[#allocation13_spill] sm:$0xff] }
 0x51b   :  { %3885 = vmatprep.mubr.bf16.mxu0 %v7814_v40  ;;  %v8678_v40 = vld [vmem:[#allocation3_spill] sm:$0xff] }
 0x522   :  { %3886 = vmatmul.mubr.bf16.gmra.mxu0 %v7812_v19  ;;  %v8677_v19 = vld [vmem:[#allocation8_spill] sm:$0xff] }
 0x523   :  { %3893 = vmatprep.mubr.bf16.mxu0 %v7833_v10  ;;  %v8680_v10 = vld [vmem:[#allocation10_spill] sm:$0xff] }
 0x52a   :  { %3894 = vmatmul.mubr.bf16.gmra.mxu0 %v7831_v6  ;;  %v8679_v6 = vld [vmem:[#allocation11_spill] sm:$0xff] }
 0x52b   :  { %3901 = vmatprep.mubr.bf16.mxu0 %v7852_v39  ;;  %v8682_v39 = vld [vmem:[#allocation5_spill] sm:$0xff] }
 0x532   :  { %3902 = vmatmul.mubr.bf16.gmra.mxu0 %v7850_v60  ;;  %v8681_v60 = vld [vmem:[#allocation9_spill] sm:$0xff] }
 0x533   :  { %3909 = vmatprep.mubr.bf16.mxu0 %v7869_v42  ;;  %v8684_v42 = vld [vmem:[#allocation31_spill] sm:$0xff] }
 0x53a   :  { %3910 = vmatmul.mubr.bf16.gmra.mxu0 %v7867_v2  ;;  %v8683_v2 = vld [vmem:[#allocation7_spill] sm:$0xff] }
 0x53b   :  { %3917 = vmatprep.mubr.bf16.mxu0 %v7884_v46  ;;  %v8686_v46 = vld [vmem:[#allocation28_spill] sm:$0xff] }
 0x542   :  { %3918 = vmatmul.mubr.bf16.gmra.mxu0 %v7882_v51  ;;  %v8685_v51 = vld [vmem:[#allocation18_spill] sm:$0xff] }
 0x543   :  { %3925 = vmatprep.mubr.bf16.mxu0 %v7899_v50  ;;  %v8688_v50 = vld [vmem:[#allocation19_spill] sm:$0xff] }
 0x54a   :  { %3926 = vmatmul.mubr.bf16.gmra.mxu0 %v7897_v49  ;;  %v8687_v49 = vld [vmem:[#allocation14_spill] sm:$0xff] }
 0x54b   :  { %3933 = vmatprep.mubr.bf16.mxu0 %v7915_v53  ;;  %v5582_v53 = vpop.f32.mrf.mxu1 }
 0x54d   :  { %v3710_v25 = vpop.f32.mrf.mxu1 }
 0x54f   :  { %v5583_v30 = vpop.f32.mrf.mxu1 }
 0x551   :  { %v3713_v16 = vpop.f32.mrf.mxu1 }
 0x552   :  { %3934 = vmatmul.mubr.bf16.gmra.mxu0 %v8674_v26 }
 0x553   :  { %3941 = vmatprep.mubr.bf16.mxu0 %v8675_v59  ;;  %v5586_v1 = vpop.f32.mrf.mxu1 }
 0x555   :  { %v3726_v54 = vpop.f32.mrf.mxu1 }
 0x557   :  { %v5587_v63 = vpop.f32.mrf.mxu1 }
 0x559   :  { %v3729_v17 = vpop.f32.mrf.mxu1 }
 0x55a   :  { %3942 = vmatmul.mubr.bf16.gmra.mxu0 %v8676_v38 }
 0x55b   :  { %3949 = vmatprep.mubr.bf16.mxu0 %v8677_v19  ;;  %v5590_v11 = vpop.f32.mrf.mxu1 }
 0x562   :  { %3950 = vmatmul.mubr.bf16.gmra.mxu0 %v8678_v40 }
 0x563   :  { %3957 = vmatprep.mubr.bf16.mxu0 %v8679_v6  ;;  %v3742_v6 = vpop.f32.mrf.mxu1 }
 0x56a   :  { %3958 = vmatmul.mubr.bf16.gmra.mxu0 %v8680_v10 }
 0x56b   :  { %3965 = vmatprep.mubr.bf16.mxu0 %v8681_v60 }
 0x572   :  { %3966 = vmatmul.mubr.bf16.gmra.mxu0 %v8682_v39 }
 0x573   :  { %3973 = vmatprep.mubr.bf16.mxu0 %v8683_v2 }
 0x57a   :  { %3974 = vmatmul.mubr.bf16.gmra.mxu0 %v8684_v42 }
 0x57b   :  { %3981 = vmatprep.mubr.bf16.mxu0 %v8685_v51 }
 0x582   :  { %3982 = vmatmul.mubr.bf16.gmra.mxu0 %v8686_v46  ;;  %v5591_v46 = vpop.f32.mrf.mxu1 }
 0x583   :  { %3989 = vmatprep.mubr.bf16.mxu0 %v8687_v49 }
 0x58a   :  { %3990 = vmatmul.mubr.bf16.gmra.mxu0 %v8688_v50 }
 0x5d2   :  { %v5340_v55 = vpop.f32.mrf.mxu0 }
 0x5d4   :  { %v5341_v56 = vpop.f32.mrf.mxu0 }
 0x5d5   :  { %v5342_v48 = vadd.f32 %v5341_v56, %v5340_v55 }
 0x5d6   :  { %v5343_v52 = vpop.f32.mrf.mxu0 }
 0x5d7   :  { %v3872_v57 = vadd.f32 %v5342_v48, %v3710_v25  ;;  %v3745_v48 = vpop.f32.mrf.mxu1 }
 0x5d8   :  { %v5344_v32 = vpop.f32.mrf.mxu0 }
 0x5d9   :  { %v4005_v33 = vadd.f32 %v8249_v28, %v3872_v57  ;;  %v5345_v47 = vadd.f32 %v5344_v32, %v5343_v52 }
 0x5da   :  { %v5346_v8 = vpop.f32.mrf.mxu0 }
 0x5db   :  { %v4037_v4 = vmax.f32 %v4005_v33, 0.0  ;;  %v3875_v5 = vadd.f32 %v5345_v47, %v3713_v16  ;;  %v5594_v16 = vpop.f32.mrf.mxu1 }
 0x5dc   :  { %v5347_v31 = vpop.f32.mrf.mxu0 }
 0x5dd   :  { %4070 = vst.msk [vmem:[%s8420_s9] sm:$0xff] %vm4069_vm1, %v4037_v4  ;;  %v4006_v22 = vadd.f32 %v8249_v28, %v3875_v5  ;;  %v5348_v0 = vadd.f32 %v5347_v31, %v5346_v8 }
 0x5de   :  { %v5349_v61 = vpop.f32.mrf.mxu0 }
 0x5df   :  { %v4038_v13 = vmax.f32 %v4006_v22, 0.0  ;;  %v3880_v9 = vadd.f32 %v5582_v53, %v5348_v0 }
 0x5e0   :  { %v5350_v45 = vpop.f32.mrf.mxu0 }
 0x5e1   :  { %4071 = vst.msk [vmem:[%s8420_s9 + $0x8] sm:$0xff] %vm4069_vm1, %v4038_v13  ;;  %v4007_v20 = vadd.f32 %v8249_v28, %v3880_v9  ;;  %v5351_v14 = vadd.f32 %v5350_v45, %v5349_v61 }
 0x5e2   :  { %v5352_v37 = vpop.f32.mrf.mxu0 }
 0x5e3   :  { %v4039_v34 = vmax.f32 %v4007_v20, 0.0  ;;  %v3883_v21 = vadd.f32 %v5583_v30, %v5351_v14 }
 0x5e4   :  { %v5353_v62 = vpop.f32.mrf.mxu0 }
 0x5e5   :  { %4072 = vst.msk [vmem:[%s8420_s9 + $0x10] sm:$0xff] %vm4069_vm1, %v4039_v34  ;;  %v4008_v24 = vadd.f32 %v8249_v28, %v3883_v21  ;;  %v5354_v41 = vadd.f32 %v5353_v62, %v5352_v37 }
 0x5e6   :  { %v5355_v58 = vpop.f32.mrf.mxu0 }
 0x5e7   :  { %v4040_v18 = vmax.f32 %v4008_v24, 0.0  ;;  %v3888_v43 = vadd.f32 %v5354_v41, %v3726_v54 }
 0x5e8   :  { %v5356_v7 = vpop.f32.mrf.mxu0 }
 0x5e9   :  { %4073 = vst.msk [vmem:[%s8420_s9 + $0x18] sm:$0xff] %vm4069_vm1, %v4040_v18  ;;  %v4009_v29 = vadd.f32 %v8249_v28, %v3888_v43  ;;  %v5357_v23 = vadd.f32 %v5356_v7, %v5355_v58 }
 0x5ea   :  { %v5358_v3 = vpop.f32.mrf.mxu0 }
 0x5eb   :  { %v4041_v35 = vmax.f32 %v4009_v29, 0.0  ;;  %v3891_v27 = vadd.f32 %v5357_v23, %v3729_v17 }
 0x5ec   :  { %v5359_v36 = vpop.f32.mrf.mxu0 }
 0x5ed   :  { %4074 = vst.msk [vmem:[%s8420_s9 + $0x20] sm:$0xff] %vm4069_vm1, %v4041_v35  ;;  %v4010_v44 = vadd.f32 %v8249_v28, %v3891_v27  ;;  %v5360_v15 = vadd.f32 %v5359_v36, %v5358_v3 }
 0x5ee   :  { %v5361_v12 = vpop.f32.mrf.mxu0 }
 0x5ef   :  { %v4042_v26 = vmax.f32 %v4010_v44, 0.0  ;;  %v3896_v59 = vadd.f32 %v5586_v1, %v5360_v15  ;;  %v3758_v1 = vpop.f32.mrf.mxu1 }
 0x5f0   :  { %v5362_v38 = vpop.f32.mrf.mxu0 }
 0x5f1   :  { %4075 = vst.msk [vmem:[%s8420_s9 + $0x28] sm:$0xff] %vm4069_vm1, %v4042_v26  ;;  %v4011_v19 = vadd.f32 %v8249_v28, %v3896_v59  ;;  %v5363_v40 = vadd.f32 %v5362_v38, %v5361_v12  ;;  %v5595_v54 = vpop.f32.mrf.mxu1 }
 0x5f2   :  { %v5364_v10 = vpop.f32.mrf.mxu0 }
 0x5f3   :  { %v4043_v60 = vmax.f32 %v4011_v19, 0.0  ;;  %v3899_v39 = vadd.f32 %v5587_v63, %v5363_v40  ;;  %v3761_v63 = vpop.f32.mrf.mxu1 }
 0x5f4   :  { %v5365_v2 = vpop.f32.mrf.mxu0 }
 0x5f5   :  { %4076 = vst.msk [vmem:[%s8420_s9 + $0x30] sm:$0xff] %vm4069_vm1, %v4043_v60  ;;  %v4012_v42 = vadd.f32 %v8249_v28, %v3899_v39  ;;  %v5366_v51 = vadd.f32 %v5365_v2, %v5364_v10  ;;  %v5598_v17 = vpop.f32.mrf.mxu1 }
 0x5f6   :  { %v5367_v49 = vpop.f32.mrf.mxu0 }
 0x5f7   :  { %v4044_v50 = vmax.f32 %v4012_v42, 0.0  ;;  %v3904_v53 = vadd.f32 %v5366_v51, %v3742_v6 }
 0x5f8   :  { %v5368_v25 = vpop.f32.mrf.mxu0 }
 0x5f9   :  { %4077 = vst.msk [vmem:[%s8420_s9 + $0x38] sm:$0xff] %vm4069_vm1, %v4044_v50  ;;  %v4013_v55 = vadd.f32 %v8249_v28, %v3904_v53  ;;  %v5369_v56 = vadd.f32 %v5368_v25, %v5367_v49 }
 0x5fa   :  { %v5370_v30 = vpop.f32.mrf.mxu0 }
 0x5fb   :  { %v4045_v52 = vmax.f32 %v4013_v55, 0.0  ;;  %v3907_v57 = vadd.f32 %v5369_v56, %v3745_v48 }
 0x5fc   :  { %v5371_v32 = vpop.f32.mrf.mxu0 }
 0x5fd   :  { %4078 = vst.msk [vmem:[%s8420_s9 + $0x40] sm:$0xff] %vm4069_vm1, %v4045_v52  ;;  %v4014_v33 = vadd.f32 %v8249_v28, %v3907_v57  ;;  %v5372_v47 = vadd.f32 %v5371_v32, %v5370_v30 }
 0x5fe   :  { %v5373_v8 = vpop.f32.mrf.mxu0 }
 0x5ff   :  { %v4046_v4 = vmax.f32 %v4014_v33, 0.0  ;;  %v3912_v5 = vadd.f32 %v5590_v11, %v5372_v47  ;;  %v3774_v11 = vpop.f32.mrf.mxu1 }
 0x600   :  { %v5374_v31 = vpop.f32.mrf.mxu0 }
 0x601   :  { %4079 = vst.msk [vmem:[%s8420_s9 + $0x48] sm:$0xff] %vm4069_vm1, %v4046_v4  ;;  %v4015_v22 = vadd.f32 %v8249_v28, %v3912_v5  ;;  %v5375_v0 = vadd.f32 %v5374_v31, %v5373_v8  ;;  %v5599_v6 = vpop.f32.mrf.mxu1 }
 0x602   :  { %v5376_v61 = vpop.f32.mrf.mxu0 }
 0x603   :  { %v4047_v13 = vmax.f32 %v4015_v22, 0.0  ;;  %v3915_v9 = vadd.f32 %v5591_v46, %v5375_v0  ;;  %v3777_v46 = vpop.f32.mrf.mxu1 }
 0x604   :  { %v5377_v45 = vpop.f32.mrf.mxu0 }
 0x605   :  { %4080 = vst.msk [vmem:[%s8420_s9 + $0x50] sm:$0xff] %vm4069_vm1, %v4047_v13  ;;  %v4016_v20 = vadd.f32 %v8249_v28, %v3915_v9  ;;  %v5378_v14 = vadd.f32 %v5377_v45, %v5376_v61  ;;  %v5602_v48 = vpop.f32.mrf.mxu1 }
 0x606   :  { %v5379_v37 = vpop.f32.mrf.mxu0 }
 0x607   :  { %v4048_v34 = vmax.f32 %v4016_v20, 0.0  ;;  %v3920_v21 = vadd.f32 %v5378_v14, %v3758_v1 }
 0x608   :  { %v5380_v62 = vpop.f32.mrf.mxu0 }
 0x609   :  { %4081 = vst.msk [vmem:[%s8420_s9 + $0x58] sm:$0xff] %vm4069_vm1, %v4048_v34  ;;  %v4017_v24 = vadd.f32 %v8249_v28, %v3920_v21  ;;  %v5381_v41 = vadd.f32 %v5380_v62, %v5379_v37 }
 0x60a   :  { %v5382_v58 = vpop.f32.mrf.mxu0 }
 0x60b   :  { %v4049_v18 = vmax.f32 %v4017_v24, 0.0  ;;  %v3923_v43 = vadd.f32 %v5381_v41, %v3761_v63 }
 0x60c   :  { %v5383_v7 = vpop.f32.mrf.mxu0 }
 0x60d   :  { %4082 = vst.msk [vmem:[%s8420_s9 + $0x60] sm:$0xff] %vm4069_vm1, %v4049_v18  ;;  %v4018_v29 = vadd.f32 %v8249_v28, %v3923_v43  ;;  %v5384_v23 = vadd.f32 %v5383_v7, %v5382_v58 }
 0x60e   :  { %v5385_v3 = vpop.f32.mrf.mxu0 }
 0x60f   :  { %v4050_v35 = vmax.f32 %v4018_v29, 0.0  ;;  %v3928_v27 = vadd.f32 %v5594_v16, %v5384_v23  ;;  %v3790_v16 = vpop.f32.mrf.mxu1 }
 0x610   :  { %v5386_v36 = vpop.f32.mrf.mxu0 }
 0x611   :  { %4083 = vst.msk [vmem:[%s8420_s9 + $0x68] sm:$0xff] %vm4069_vm1, %v4050_v35  ;;  %v4019_v44 = vadd.f32 %v8249_v28, %v3928_v27  ;;  %v5387_v15 = vadd.f32 %v5386_v36, %v5385_v3  ;;  %v5603_v1 = vpop.f32.mrf.mxu1 }
 0x612   :  { %v5388_v12 = vpop.f32.mrf.mxu0 }
 0x613   :  { %v4051_v26 = vmax.f32 %v4019_v44, 0.0  ;;  %v3931_v59 = vadd.f32 %v5595_v54, %v5387_v15  ;;  %v3793_v54 = vpop.f32.mrf.mxu1 }
 0x614   :  { %v5389_v38 = vpop.f32.mrf.mxu0 }
 0x615   :  { %4084 = vst.msk [vmem:[%s8420_s9 + $0x70] sm:$0xff] %vm4069_vm1, %v4051_v26  ;;  %v4020_v19 = vadd.f32 %v8249_v28, %v3931_v59  ;;  %v5390_v40 = vadd.f32 %v5389_v38, %v5388_v12  ;;  %v5606_v63 = vpop.f32.mrf.mxu1 }
 0x616   :  { %v5391_v10 = vpop.f32.mrf.mxu0 }
 0x617   :  { %v4052_v60 = vmax.f32 %v4020_v19, 0.0  ;;  %v3936_v39 = vadd.f32 %v5390_v40, %v3774_v11 }
 0x618   :  { %v5392_v2 = vpop.f32.mrf.mxu0 }
 0x619   :  { %4085 = vst.msk [vmem:[%s8420_s9 + $0x78] sm:$0xff] %vm4069_vm1, %v4052_v60  ;;  %v4021_v42 = vadd.f32 %v8249_v28, %v3936_v39  ;;  %v5393_v51 = vadd.f32 %v5392_v2, %v5391_v10 }
 0x61a   :  { %v5394_v49 = vpop.f32.mrf.mxu0 }
 0x61b   :  { %v4053_v50 = vmax.f32 %v4021_v42, 0.0  ;;  %v3939_v53 = vadd.f32 %v5393_v51, %v3777_v46 }
 0x61c   :  { %v5395_v25 = vpop.f32.mrf.mxu0 }
 0x61d   :  { %4086 = vst.msk [vmem:[%s8420_s9 + $0x80] sm:$0xff] %vm4069_vm1, %v4053_v50  ;;  %v4022_v55 = vadd.f32 %v8249_v28, %v3939_v53  ;;  %v5396_v56 = vadd.f32 %v5395_v25, %v5394_v49 }
 0x61e   :  { %v5397_v30 = vpop.f32.mrf.mxu0 }
 0x61f   :  { %v4054_v52 = vmax.f32 %v4022_v55, 0.0  ;;  %v3944_v57 = vadd.f32 %v5598_v17, %v5396_v56  ;;  %v3806_v17 = vpop.f32.mrf.mxu1 }
 0x620   :  { %v5398_v32 = vpop.f32.mrf.mxu0 }
 0x621   :  { %4087 = vst.msk [vmem:[%s8420_s9 + $0x88] sm:$0xff] %vm4069_vm1, %v4054_v52  ;;  %v4023_v33 = vadd.f32 %v8249_v28, %v3944_v57  ;;  %v5399_v47 = vadd.f32 %v5398_v32, %v5397_v30  ;;  %v5607_v11 = vpop.f32.mrf.mxu1 }
 0x622   :  { %v5400_v8 = vpop.f32.mrf.mxu0 }
 0x623   :  { %v4055_v4 = vmax.f32 %v4023_v33, 0.0  ;;  %v3947_v5 = vadd.f32 %v5599_v6, %v5399_v47  ;;  %v3809_v6 = vpop.f32.mrf.mxu1 }
 0x624   :  { %v5401_v31 = vpop.f32.mrf.mxu0 }
 0x625   :  { %4088 = vst.msk [vmem:[%s8420_s9 + $0x90] sm:$0xff] %vm4069_vm1, %v4055_v4  ;;  %v4024_v22 = vadd.f32 %v8249_v28, %v3947_v5  ;;  %v5402_v0 = vadd.f32 %v5401_v31, %v5400_v8  ;;  %v5610_v46 = vpop.f32.mrf.mxu1 }
 0x626   :  { %v5403_v61 = vpop.f32.mrf.mxu0 }
 0x627   :  { %v4056_v13 = vmax.f32 %v4024_v22, 0.0  ;;  %v3952_v9 = vadd.f32 %v5402_v0, %v3790_v16 }
 0x628   :  { %v5404_v45 = vpop.f32.mrf.mxu0 }
 0x629   :  { %4089 = vst.msk [vmem:[%s8420_s9 + $0x98] sm:$0xff] %vm4069_vm1, %v4056_v13  ;;  %v4025_v20 = vadd.f32 %v8249_v28, %v3952_v9  ;;  %v5405_v14 = vadd.f32 %v5404_v45, %v5403_v61 }
 0x62a   :  { %v5406_v37 = vpop.f32.mrf.mxu0 }
 0x62b   :  { %v4057_v34 = vmax.f32 %v4025_v20, 0.0  ;;  %v3955_v21 = vadd.f32 %v5405_v14, %v3793_v54 }
 0x62c   :  { %v5407_v62 = vpop.f32.mrf.mxu0 }
 0x62d   :  { %4090 = vst.msk [vmem:[%s8420_s9 + $0xa0] sm:$0xff] %vm4069_vm1, %v4057_v34  ;;  %v4026_v24 = vadd.f32 %v8249_v28, %v3955_v21  ;;  %v5408_v41 = vadd.f32 %v5407_v62, %v5406_v37 }
 0x62e   :  { %v5409_v58 = vpop.f32.mrf.mxu0 }
 0x62f   :  { %v4058_v18 = vmax.f32 %v4026_v24, 0.0  ;;  %v3960_v43 = vadd.f32 %v5602_v48, %v5408_v41  ;;  %v3822_v48 = vpop.f32.mrf.mxu1 }
 0x630   :  { %v5410_v7 = vpop.f32.mrf.mxu0 }
 0x631   :  { %4091 = vst.msk [vmem:[%s8420_s9 + $0xa8] sm:$0xff] %vm4069_vm1, %v4058_v18  ;;  %v4027_v29 = vadd.f32 %v8249_v28, %v3960_v43  ;;  %v5411_v23 = vadd.f32 %v5410_v7, %v5409_v58  ;;  %v5611_v16 = vpop.f32.mrf.mxu1 }
 0x632   :  { %v5412_v3 = vpop.f32.mrf.mxu0 }
 0x633   :  { %v4059_v35 = vmax.f32 %v4027_v29, 0.0  ;;  %v3963_v27 = vadd.f32 %v5603_v1, %v5411_v23  ;;  %v3825_v1 = vpop.f32.mrf.mxu1 }
 0x634   :  { %v5413_v36 = vpop.f32.mrf.mxu0 }
 0x635   :  { %4092 = vst.msk [vmem:[%s8420_s9 + $0xb0] sm:$0xff] %vm4069_vm1, %v4059_v35  ;;  %v4028_v44 = vadd.f32 %v8249_v28, %v3963_v27  ;;  %v5414_v15 = vadd.f32 %v5413_v36, %v5412_v3 }
 0x636   :  { %v5415_v12 = vpop.f32.mrf.mxu0 }
 0x637   :  { %v4060_v26 = vmax.f32 %v4028_v44, 0.0  ;;  %v3968_v59 = vadd.f32 %v5414_v15, %v3806_v17 }
 0x638   :  { %v5416_v38 = vpop.f32.mrf.mxu0 }
 0x639   :  { %4093 = vst.msk [vmem:[%s8420_s9 + $0xb8] sm:$0xff] %vm4069_vm1, %v4060_v26  ;;  %v4029_v19 = vadd.f32 %v8249_v28, %v3968_v59  ;;  %v5417_v40 = vadd.f32 %v5416_v38, %v5415_v12 }
 0x63a   :  { %v5418_v10 = vpop.f32.mrf.mxu0 }
 0x63b   :  { %v4061_v60 = vmax.f32 %v4029_v19, 0.0  ;;  %v3971_v39 = vadd.f32 %v5417_v40, %v3809_v6 }
 0x63c   :  { %v5419_v2 = vpop.f32.mrf.mxu0 }
 0x63d   :  { %4094 = vst.msk [vmem:[%s8420_s9 + $0xc0] sm:$0xff] %vm4069_vm1, %v4061_v60  ;;  %v4030_v42 = vadd.f32 %v8249_v28, %v3971_v39  ;;  %v5420_v51 = vadd.f32 %v5419_v2, %v5418_v10 }
 0x63e   :  { %v5421_v49 = vpop.f32.mrf.mxu0 }
 0x63f   :  { %v4062_v50 = vmax.f32 %v4030_v42, 0.0  ;;  %v3976_v53 = vadd.f32 %v5606_v63, %v5420_v51 }
 0x640   :  { %v5422_v25 = vpop.f32.mrf.mxu0 }
 0x641   :  { %4095 = vst.msk [vmem:[%s8420_s9 + $0xc8] sm:$0xff] %vm4069_vm1, %v4062_v50  ;;  %v4031_v55 = vadd.f32 %v8249_v28, %v3976_v53  ;;  %v5423_v56 = vadd.f32 %v5422_v25, %v5421_v49 }
 0x642   :  { %v5424_v30 = vpop.f32.mrf.mxu0 }
 0x643   :  { %v4063_v52 = vmax.f32 %v4031_v55, 0.0  ;;  %v3979_v57 = vadd.f32 %v5607_v11, %v5423_v56 }
 0x644   :  { %v5425_v32 = vpop.f32.mrf.mxu0 }
 0x645   :  { %4096 = vst.msk [vmem:[%s8420_s9 + $0xd0] sm:$0xff] %vm4069_vm1, %v4063_v52  ;;  %v4032_v33 = vadd.f32 %v8249_v28, %v3979_v57  ;;  %v5426_v47 = vadd.f32 %v5425_v32, %v5424_v30 }
 0x646   :  { %v5427_v8 = vpop.f32.mrf.mxu0 }
 0x647   :  { %v4064_v4 = vmax.f32 %v4032_v33, 0.0  ;;  %v3984_v5 = vadd.f32 %v5426_v47, %v3822_v48 }
 0x648   :  { %v5428_v31 = vpop.f32.mrf.mxu0 }
 0x649   :  { %4097 = vst.msk [vmem:[%s8420_s9 + $0xd8] sm:$0xff] %vm4069_vm1, %v4064_v4  ;;  %v4033_v22 = vadd.f32 %v8249_v28, %v3984_v5  ;;  %v5429_v0 = vadd.f32 %v5428_v31, %v5427_v8 }
 0x64a   :  { %v5430_v61 = vpop.f32.mrf.mxu0 }
 0x64b   :  { %v4065_v13 = vmax.f32 %v4033_v22, 0.0  ;;  %v3987_v9 = vadd.f32 %v5429_v0, %v3825_v1 }
 0x64c   :  { %v5431_v45 = vpop.f32.mrf.mxu0 }
 0x64d   :  { %4098 = vst.msk [vmem:[%s8420_s9 + $0xe0] sm:$0xff] %vm4069_vm1, %v4065_v13  ;;  %v4034_v20 = vadd.f32 %v8249_v28, %v3987_v9  ;;  %v5432_v14 = vadd.f32 %v5431_v45, %v5430_v61 }
 0x64e   :  { %v5433_v54 = vpop.f32.mrf.mxu0 }
 0x64f   :  { %v4066_v37 = vmax.f32 %v4034_v20, 0.0  ;;  %v3992_v34 = vadd.f32 %v5610_v46, %v5432_v14 }
 0x650   :  { %v5434_v21 = vpop.f32.mrf.mxu0 }
 0x651   :  { %4099 = vst.msk [vmem:[%s8420_s9 + $0xe8] sm:$0xff] %vm4069_vm1, %v4066_v37  ;;  %v4035_v62 = vadd.f32 %v8249_v28, %v3992_v34  ;;  %v5435_v24 = vadd.f32 %v5434_v21, %v5433_v54 }
 0x653   :  { %v4067_v41 = vmax.f32 %v4035_v62, 0.0  ;;  %v3995_v63 = vadd.f32 %v5611_v16, %v5435_v24 }
 0x655   :  { %4100 = vst.msk [vmem:[%s8420_s9 + $0xf0] sm:$0xff] %vm4069_vm1, %v4067_v41  ;;  %v4036_v58 = vadd.f32 %v8249_v28, %v3995_v63 }
 0x657   :  { %v4068_v18 = vmax.f32 %v4036_v58, 0.0 }
 0x659   :  { %4101 = vst.msk [vmem:[%s8420_s9 + $0xf8] sm:$0xff] %vm4069_vm1, %v4068_v18 }

</bundles_post_ra>
